<compile_context>
chip_gen: v5e
topology: v5e:2x2
jax: 0.10.0
libtpu: 0.0.40
codegen_flags: <defaults>
</compile_context>

<pallas_src>
import jax
import jax.numpy as jnp
from jax.experimental import pallas as pl
from jax.experimental.pallas import tpu as pltpu


def _round_up(a, m):
    return ((a + m - 1) // m) * m


# ---------------------------------------------------------------------------
# Fused DynConv(edge) kernel: per-node projections + one-hot gather + ReLU-max aggregation.
# ---------------------------------------------------------------------------
def _dyn_edge_conv_kernel(nbr_ref, x_full_ref, w_dst_ref, w_src_ref, b_ref, out_ref):
    """out[i] = max(0, max_kk ( x[nbr[i,kk]] @ W2 + x[i] @ (W1 - W2) + b )).

    nbr_ref    : [tN, k]       int32    neighbour (source) indices of this node tile
    x_full_ref : [Np, Cin]     float32  all node features (resident in VMEM across the grid)
    w_dst_ref  : [Cin, Cp]     float32  W1 - W2   (Cout padded to Cp lanes)
    w_src_ref  : [Cin, Cp]     float32  W2
    b_ref      : [1, Cp]       float32
    out_ref    : [tN, Cp]      float32
    """
    tn, c_p = out_ref.shape
    n_pad = x_full_ref.shape[0]
    k = nbr_ref.shape[1]

    x_full = x_full_ref[...]
    w_src = w_src_ref[...]

    # Target-node slice of x (taken from the resident full copy: no extra tiled input stream).
    row0 = pl.multiple_of(pl.program_id(0) * tn, tn)
    x_tile = x_full_ref[pl.ds(row0, tn), :]                                   # [tN, Cin]

    # Hoisted edge-MLP:  concat([x_i, x_j - x_i]) @ W + b == x_i @ (W1 - W2) + b + x_j @ W2.
    p_dst = jnp.dot(x_tile, w_dst_ref[...],
                    preferred_element_type=jnp.float32) + b_ref[...]          # [tN, Cp]

    # One-hot gather of neighbour features on the MXU, fused ReLU + running max on the VPU.
    node_ids = jax.lax.broadcasted_iota(jnp.int32, (tn, n_pad), 1)            # hoisted out of loop
    acc = jnp.zeros_like(p_dst)                                               # 0-init == ReLU floor
    for kk in range(k):                                                       # k is small (9): unroll
        onehot = (node_ids == nbr_ref[:, kk:kk + 1]).astype(jnp.float32)      # [tN, Np]
        x_src = jnp.dot(onehot, x_full, preferred_element_type=jnp.float32)   # [tN, Cin] gather
        msg = jnp.dot(x_src, w_src, preferred_element_type=jnp.float32) + p_dst
        acc = jnp.maximum(acc, msg)
    out_ref[...] = acc


# ---------------------------------------------------------------------------
# EdgeConv (max aggregation) on a kNN graph, driven by the fused Pallas kernel.
# ---------------------------------------------------------------------------
def edge_conv_knn(x, nbr_idx, weight, bias, *, tile_n=128):
    """x: [N, Cin] f32; nbr_idx: [N, k] int32 (source j per target i); weight: [2*Cin, Cout]; bias: [Cout]."""
    n, c_in = x.shape
    k = nbr_idx.shape[1]
    c_out = weight.shape[1]

    c_p = _round_up(c_out, 128)                 # lane-dense padded feature width
    tn = min(tile_n, _round_up(n, 8))
    n_pad = pl.cdiv(n, tn) * tn

    # Split the edge-MLP weight:  concat([x_i, x_j - x_i]) @ W == x_i @ (W1 - W2) + x_j @ W2.
    w1, w2 = weight[:c_in], weight[c_in:]
    pad_c = ((0, 0), (0, c_p - c_out))
    w_dst = jnp.pad(w1 - w2, pad_c)                                           # [Cin, Cp]
    w_src = jnp.pad(w2, pad_c)                                                # [Cin, Cp]
    b_p = jnp.pad(bias, (0, c_p - c_out)).reshape(1, c_p)

    x_p = jnp.pad(x, ((0, n_pad - n), (0, 0)))
    nbr_p = jnp.pad(nbr_idx.astype(jnp.int32), ((0, n_pad - n), (0, 0)))      # pad rows -> node 0, sliced off

    grid = (n_pad // tn,)

    out = pl.pallas_call(
        _dyn_edge_conv_kernel,
        out_shape=jax.ShapeDtypeStruct((n_pad, c_p), jnp.float32),
        grid_spec=pl.GridSpec(
            grid=grid,
            in_specs=[pl.BlockSpec((tn, k), lambda i: (i, 0)),          # per-tile neighbour ids
                      pl.BlockSpec((n_pad, c_in), lambda i: (0, 0)),    # full x, resident in VMEM
                      pl.BlockSpec((c_in, c_p), lambda i: (0, 0)),
                      pl.BlockSpec((c_in, c_p), lambda i: (0, 0)),
                      pl.BlockSpec((1, c_p), lambda i: (0, 0))],
            out_specs=pl.BlockSpec((tn, c_p), lambda i: (i, 0))),
        compiler_params=pltpu.CompilerParams(dimension_semantics=("parallel",)),
    )(nbr_p, x_p, w_dst, w_src, b_p)

    return out[:n, :c_out]


# ---------------------------------------------------------------------------
# DilatedKnnGraph (dense pairwise distances + top-k) and the DenseDynBlock wrapper.
# ---------------------------------------------------------------------------
def knn_graph(x, k):
    """k nearest neighbours (self excluded) of each node. Returns [N, k] int32 source indices."""
    # TODO(synk): top_k has no clean Pallas TPU equivalent; kNN graph construction stays in XLA.
    n = x.shape[0]
    sq = jnp.sum(x * x, axis=1)
    d = sq[:, None] - 2.0 * (x @ x.T) + sq[None, :]
    d = jnp.where(jnp.eye(n, dtype=bool), jnp.inf, d)
    _, nbr = jax.lax.top_k(-d, k)
    return nbr.astype(jnp.int32)


def dense_dyn_block(x, weight, bias, *, kernel_size=9, dilation=1, batch=None):
    """DenseDynBlock forward: (concat([x, DynConv_edge(x)], axis=1), batch)."""
    # DilatedKnnGraph: knn with k = kernel_size * dilation, then keep every dilation-th edge.
    # TODO(synk): stochastic dilation and batched multi-graph handling not implemented (d=1, one graph).
    nbr = knn_graph(x, kernel_size * dilation)[:, ::dilation]
    dense = edge_conv_knn(x, nbr, weight, bias)
    return jnp.concatenate([x, dense], axis=1), batch


# ---------------------------------------------------------------------------
# Pure-JAX reference (general segment-max EdgeConv) for correctness checking.
# ---------------------------------------------------------------------------
def _reference(x, nbr_idx, weight, bias):
    n = x.shape[0]
    k = nbr_idx.shape[1]
    src = nbr_idx.reshape(-1)
    dst = jnp.repeat(jnp.arange(n, dtype=jnp.int32), k)
    x_i, x_j = x[dst], x[src]
    msg = jnp.maximum(jnp.concatenate([x_i, x_j - x_i], axis=1) @ weight + bias, 0.0)
    agg = jax.ops.segment_max(msg, dst, num_segments=n)
    counts = jax.ops.segment_sum(jnp.ones((src.shape[0],), jnp.float32), dst, num_segments=n)
    dense = jnp.where(counts[:, None] > 0, agg, 0.0)
    return jnp.concatenate([x, dense], axis=1)


if __name__ == "__main__":
    key = jax.random.PRNGKey(0)
    k_x, k_w, k_b = jax.random.split(key, 3)

    N, C_IN, C_OUT, K = 256, 16, 64, 9   # DenseDynBlock defaults: out_channels=64, kernel_size=9

    x = jax.random.normal(k_x, (N, C_IN), dtype=jnp.float32)

    # nn.Linear(2*C_IN, C_OUT, bias=True) init; weight stored transposed for x @ W.
    fan_in = 2 * C_IN
    lim = 1.0 / jnp.sqrt(jnp.float32(fan_in))
    weight = jax.random.uniform(k_w, (2 * C_IN, C_OUT), jnp.float32, -lim, lim)
    bias = jax.random.uniform(k_b, (C_OUT,), jnp.float32, -lim, lim)

    out, _ = dense_dyn_block(x, weight, bias, kernel_size=K, dilation=1)
    out = jax.block_until_ready(out)

    nbr = knn_graph(x, K)
    ref = _reference(x, nbr, weight, bias)

    assert out.shape == (N, C_IN + C_OUT)
    assert jnp.allclose(out, ref, atol=1e-4, rtol=1e-4), "mismatch vs reference"

    print("KERNEL_OK")
</pallas_src>

<mosaic_0001>
module attributes {stable_mosaic.version = 11 : i64} {
  func.func @_dyn_edge_conv_kernel(%arg0: i32, %arg1: memref<128x9xi32, #tpu.memory_space<vmem>>, %arg2: memref<256x16xf32, #tpu.memory_space<vmem>>, %arg3: memref<16x128xf32, #tpu.memory_space<vmem>>, %arg4: memref<16x128xf32, #tpu.memory_space<vmem>>, %arg5: memref<1x128xf32, #tpu.memory_space<vmem>>, %arg6: memref<128x128xf32, #tpu.memory_space<vmem>>) attributes {dimension_semantics = [#tpu.dimension_semantics<parallel>], iteration_bounds = array<i64: 2>, scalar_prefetch = 0 : i64, scratch_operands = 0 : i64, tpu.core_type = #tpu.core_type<tc>, window_params = [{transform_indices = @transform_0, window_bounds = array<i64: 128, 9>}, {pipeline_mode = #tpu.pipeline_mode<synchronous>, transform_indices = @transform_1, window_bounds = array<i64: 256, 16>}, {pipeline_mode = #tpu.pipeline_mode<synchronous>, transform_indices = @transform_2, window_bounds = array<i64: 16, 128>}, {pipeline_mode = #tpu.pipeline_mode<synchronous>, transform_indices = @transform_3, window_bounds = array<i64: 16, 128>}, {pipeline_mode = #tpu.pipeline_mode<synchronous>, transform_indices = @transform_4, window_bounds = array<i64: 1, 128>}, {transform_indices = @transform_5, window_bounds = array<i64: 128, 128>}]} {
    %c0 = arith.constant 0 : index
    %c0_0 = arith.constant 0 : index
    %0 = vector.load %arg2[%c0, %c0_0] : memref<256x16xf32, #tpu.memory_space<vmem>>, vector<256x16xf32>
    %c0_1 = arith.constant 0 : index
    %c0_2 = arith.constant 0 : index
    %1 = vector.load %arg4[%c0_1, %c0_2] : memref<16x128xf32, #tpu.memory_space<vmem>>, vector<16x128xf32>
    %c128_i32 = arith.constant 128 : i32
    %2 = arith.muli %arg0, %c128_i32 : i32
    %3 = tpu.assume_multiple %2, 128 : i32
    %4 = arith.index_cast %3 : i32 to index
    %c0_3 = arith.constant 0 : index
    %5 = vector.load %arg2[%4, %c0_3] : memref<256x16xf32, #tpu.memory_space<vmem>>, vector<128x16xf32>
    %c0_4 = arith.constant 0 : index
    %c0_5 = arith.constant 0 : index
    %6 = vector.load %arg3[%c0_4, %c0_5] : memref<16x128xf32, #tpu.memory_space<vmem>>, vector<16x128xf32>
    %cst = arith.constant dense<0.000000e+00> : vector<128x128xf32>
    %7 = tpu.matmul %5, %6, %cst {dimension_numbers = #tpu.dot_dimension_numbers<[1], [0], [0], [1], [0, 0, 1, 1], [], []>} : vector<128x16xf32>, vector<16x128xf32>, vector<128x128xf32> -> vector<128x128xf32>
    %c0_6 = arith.constant 0 : index
    %c0_7 = arith.constant 0 : index
    %8 = vector.load %arg5[%c0_6, %c0_7] : memref<1x128xf32, #tpu.memory_space<vmem>>, vector<1x128xf32>
    %9 = vector.broadcast %8 : vector<1x128xf32> to vector<128x128xf32>
    %10 = arith.addf %7, %9 : vector<128x128xf32>
    %11 = tpu.iota {dimensions = array<i32: 1>} : vector<128x256xi32>
    %cst_8 = arith.constant 0.000000e+00 : f32
    %12 = vector.broadcast %cst_8 : f32 to vector<128x128xf32>
    %c0_9 = arith.constant 0 : index
    %c0_10 = arith.constant 0 : index
    %13 = vector.load %arg1[%c0_9, %c0_10] : memref<128x9xi32, #tpu.memory_space<vmem>>, vector<128x1xi32>
    %14 = vector.broadcast %13 : vector<128x1xi32> to vector<128x256xi32>
    %15 = arith.cmpi eq, %11, %14 : vector<128x256xi32>
    %16 = arith.extui %15 : vector<128x256xi1> to vector<128x256xi32>
    %17 = arith.sitofp %16 : vector<128x256xi32> to vector<128x256xf32>
    %cst_11 = arith.constant dense<0.000000e+00> : vector<128x16xf32>
    %18 = tpu.matmul %17, %0, %cst_11 {dimension_numbers = #tpu.dot_dimension_numbers<[1], [0], [0], [1], [0, 0, 1, 1], [], []>} : vector<128x256xf32>, vector<256x16xf32>, vector<128x16xf32> -> vector<128x16xf32>
    %cst_12 = arith.constant dense<0.000000e+00> : vector<128x128xf32>
    %19 = tpu.matmul %18, %1, %cst_12 {dimension_numbers = #tpu.dot_dimension_numbers<[1], [0], [0], [1], [0, 0, 1, 1], [], []>} : vector<128x16xf32>, vector<16x128xf32>, vector<128x128xf32> -> vector<128x128xf32>
    %20 = arith.addf %19, %10 : vector<128x128xf32>
    %21 = arith.maximumf %12, %20 : vector<128x128xf32>
    %c0_13 = arith.constant 0 : index
    %c1 = arith.constant 1 : index
    %22 = vector.load %arg1[%c0_13, %c1] : memref<128x9xi32, #tpu.memory_space<vmem>>, vector<128x1xi32>
    %23 = vector.broadcast %22 : vector<128x1xi32> to vector<128x256xi32>
    %24 = arith.cmpi eq, %11, %23 : vector<128x256xi32>
    %25 = arith.extui %24 : vector<128x256xi1> to vector<128x256xi32>
    %26 = arith.sitofp %25 : vector<128x256xi32> to vector<128x256xf32>
    %cst_14 = arith.constant dense<0.000000e+00> : vector<128x16xf32>
    %27 = tpu.matmul %26, %0, %cst_14 {dimension_numbers = #tpu.dot_dimension_numbers<[1], [0], [0], [1], [0, 0, 1, 1], [], []>} : vector<128x256xf32>, vector<256x16xf32>, vector<128x16xf32> -> vector<128x16xf32>
    %cst_15 = arith.constant dense<0.000000e+00> : vector<128x128xf32>
    %28 = tpu.matmul %27, %1, %cst_15 {dimension_numbers = #tpu.dot_dimension_numbers<[1], [0], [0], [1], [0, 0, 1, 1], [], []>} : vector<128x16xf32>, vector<16x128xf32>, vector<128x128xf32> -> vector<128x128xf32>
    %29 = arith.addf %28, %10 : vector<128x128xf32>
    %30 = arith.maximumf %21, %29 : vector<128x128xf32>
    %c0_16 = arith.constant 0 : index
    %c2 = arith.constant 2 : index
    %31 = vector.load %arg1[%c0_16, %c2] : memref<128x9xi32, #tpu.memory_space<vmem>>, vector<128x1xi32>
    %32 = vector.broadcast %31 : vector<128x1xi32> to vector<128x256xi32>
    %33 = arith.cmpi eq, %11, %32 : vector<128x256xi32>
    %34 = arith.extui %33 : vector<128x256xi1> to vector<128x256xi32>
    %35 = arith.sitofp %34 : vector<128x256xi32> to vector<128x256xf32>
    %cst_17 = arith.constant dense<0.000000e+00> : vector<128x16xf32>
    %36 = tpu.matmul %35, %0, %cst_17 {dimension_numbers = #tpu.dot_dimension_numbers<[1], [0], [0], [1], [0, 0, 1, 1], [], []>} : vector<128x256xf32>, vector<256x16xf32>, vector<128x16xf32> -> vector<128x16xf32>
    %cst_18 = arith.constant dense<0.000000e+00> : vector<128x128xf32>
    %37 = tpu.matmul %36, %1, %cst_18 {dimension_numbers = #tpu.dot_dimension_numbers<[1], [0], [0], [1], [0, 0, 1, 1], [], []>} : vector<128x16xf32>, vector<16x128xf32>, vector<128x128xf32> -> vector<128x128xf32>
    %38 = arith.addf %37, %10 : vector<128x128xf32>
    %39 = arith.maximumf %30, %38 : vector<128x128xf32>
    %c0_19 = arith.constant 0 : index
    %c3 = arith.constant 3 : index
    %40 = vector.load %arg1[%c0_19, %c3] : memref<128x9xi32, #tpu.memory_space<vmem>>, vector<128x1xi32>
    %41 = vector.broadcast %40 : vector<128x1xi32> to vector<128x256xi32>
    %42 = arith.cmpi eq, %11, %41 : vector<128x256xi32>
    %43 = arith.extui %42 : vector<128x256xi1> to vector<128x256xi32>
    %44 = arith.sitofp %43 : vector<128x256xi32> to vector<128x256xf32>
    %cst_20 = arith.constant dense<0.000000e+00> : vector<128x16xf32>
    %45 = tpu.matmul %44, %0, %cst_20 {dimension_numbers = #tpu.dot_dimension_numbers<[1], [0], [0], [1], [0, 0, 1, 1], [], []>} : vector<128x256xf32>, vector<256x16xf32>, vector<128x16xf32> -> vector<128x16xf32>
    %cst_21 = arith.constant dense<0.000000e+00> : vector<128x128xf32>
    %46 = tpu.matmul %45, %1, %cst_21 {dimension_numbers = #tpu.dot_dimension_numbers<[1], [0], [0], [1], [0, 0, 1, 1], [], []>} : vector<128x16xf32>, vector<16x128xf32>, vector<128x128xf32> -> vector<128x128xf32>
    %47 = arith.addf %46, %10 : vector<128x128xf32>
    %48 = arith.maximumf %39, %47 : vector<128x128xf32>
    %c0_22 = arith.constant 0 : index
    %c4 = arith.constant 4 : index
    %49 = vector.load %arg1[%c0_22, %c4] : memref<128x9xi32, #tpu.memory_space<vmem>>, vector<128x1xi32>
    %50 = vector.broadcast %49 : vector<128x1xi32> to vector<128x256xi32>
    %51 = arith.cmpi eq, %11, %50 : vector<128x256xi32>
    %52 = arith.extui %51 : vector<128x256xi1> to vector<128x256xi32>
    %53 = arith.sitofp %52 : vector<128x256xi32> to vector<128x256xf32>
    %cst_23 = arith.constant dense<0.000000e+00> : vector<128x16xf32>
    %54 = tpu.matmul %53, %0, %cst_23 {dimension_numbers = #tpu.dot_dimension_numbers<[1], [0], [0], [1], [0, 0, 1, 1], [], []>} : vector<128x256xf32>, vector<256x16xf32>, vector<128x16xf32> -> vector<128x16xf32>
    %cst_24 = arith.constant dense<0.000000e+00> : vector<128x128xf32>
    %55 = tpu.matmul %54, %1, %cst_24 {dimension_numbers = #tpu.dot_dimension_numbers<[1], [0], [0], [1], [0, 0, 1, 1], [], []>} : vector<128x16xf32>, vector<16x128xf32>, vector<128x128xf32> -> vector<128x128xf32>
    %56 = arith.addf %55, %10 : vector<128x128xf32>
    %57 = arith.maximumf %48, %56 : vector<128x128xf32>
    %c0_25 = arith.constant 0 : index
    %c5 = arith.constant 5 : index
    %58 = vector.load %arg1[%c0_25, %c5] : memref<128x9xi32, #tpu.memory_space<vmem>>, vector<128x1xi32>
    %59 = vector.broadcast %58 : vector<128x1xi32> to vector<128x256xi32>
    %60 = arith.cmpi eq, %11, %59 : vector<128x256xi32>
    %61 = arith.extui %60 : vector<128x256xi1> to vector<128x256xi32>
    %62 = arith.sitofp %61 : vector<128x256xi32> to vector<128x256xf32>
    %cst_26 = arith.constant dense<0.000000e+00> : vector<128x16xf32>
    %63 = tpu.matmul %62, %0, %cst_26 {dimension_numbers = #tpu.dot_dimension_numbers<[1], [0], [0], [1], [0, 0, 1, 1], [], []>} : vector<128x256xf32>, vector<256x16xf32>, vector<128x16xf32> -> vector<128x16xf32>
    %cst_27 = arith.constant dense<0.000000e+00> : vector<128x128xf32>
    %64 = tpu.matmul %63, %1, %cst_27 {dimension_numbers = #tpu.dot_dimension_numbers<[1], [0], [0], [1], [0, 0, 1, 1], [], []>} : vector<128x16xf32>, vector<16x128xf32>, vector<128x128xf32> -> vector<128x128xf32>
    %65 = arith.addf %64, %10 : vector<128x128xf32>
    %66 = arith.maximumf %57, %65 : vector<128x128xf32>
    %c0_28 = arith.constant 0 : index
    %c6 = arith.constant 6 : index
    %67 = vector.load %arg1[%c0_28, %c6] : memref<128x9xi32, #tpu.memory_space<vmem>>, vector<128x1xi32>
    %68 = vector.broadcast %67 : vector<128x1xi32> to vector<128x256xi32>
    %69 = arith.cmpi eq, %11, %68 : vector<128x256xi32>
    %70 = arith.extui %69 : vector<128x256xi1> to vector<128x256xi32>
    %71 = arith.sitofp %70 : vector<128x256xi32> to vector<128x256xf32>
    %cst_29 = arith.constant dense<0.000000e+00> : vector<128x16xf32>
    %72 = tpu.matmul %71, %0, %cst_29 {dimension_numbers = #tpu.dot_dimension_numbers<[1], [0], [0], [1], [0, 0, 1, 1], [], []>} : vector<128x256xf32>, vector<256x16xf32>, vector<128x16xf32> -> vector<128x16xf32>
    %cst_30 = arith.constant dense<0.000000e+00> : vector<128x128xf32>
    %73 = tpu.matmul %72, %1, %cst_30 {dimension_numbers = #tpu.dot_dimension_numbers<[1], [0], [0], [1], [0, 0, 1, 1], [], []>} : vector<128x16xf32>, vector<16x128xf32>, vector<128x128xf32> -> vector<128x128xf32>
    %74 = arith.addf %73, %10 : vector<128x128xf32>
    %75 = arith.maximumf %66, %74 : vector<128x128xf32>
    %c0_31 = arith.constant 0 : index
    %c7 = arith.constant 7 : index
    %76 = vector.load %arg1[%c0_31, %c7] : memref<128x9xi32, #tpu.memory_space<vmem>>, vector<128x1xi32>
    %77 = vector.broadcast %76 : vector<128x1xi32> to vector<128x256xi32>
    %78 = arith.cmpi eq, %11, %77 : vector<128x256xi32>
    %79 = arith.extui %78 : vector<128x256xi1> to vector<128x256xi32>
    %80 = arith.sitofp %79 : vector<128x256xi32> to vector<128x256xf32>
    %cst_32 = arith.constant dense<0.000000e+00> : vector<128x16xf32>
    %81 = tpu.matmul %80, %0, %cst_32 {dimension_numbers = #tpu.dot_dimension_numbers<[1], [0], [0], [1], [0, 0, 1, 1], [], []>} : vector<128x256xf32>, vector<256x16xf32>, vector<128x16xf32> -> vector<128x16xf32>
    %cst_33 = arith.constant dense<0.000000e+00> : vector<128x128xf32>
    %82 = tpu.matmul %81, %1, %cst_33 {dimension_numbers = #tpu.dot_dimension_numbers<[1], [0], [0], [1], [0, 0, 1, 1], [], []>} : vector<128x16xf32>, vector<16x128xf32>, vector<128x128xf32> -> vector<128x128xf32>
    %83 = arith.addf %82, %10 : vector<128x128xf32>
    %84 = arith.maximumf %75, %83 : vector<128x128xf32>
    %c0_34 = arith.constant 0 : index
    %c8 = arith.constant 8 : index
    %85 = vector.load %arg1[%c0_34, %c8] : memref<128x9xi32, #tpu.memory_space<vmem>>, vector<128x1xi32>
    %86 = vector.broadcast %85 : vector<128x1xi32> to vector<128x256xi32>
    %87 = arith.cmpi eq, %11, %86 : vector<128x256xi32>
    %88 = arith.extui %87 : vector<128x256xi1> to vector<128x256xi32>
    %89 = arith.sitofp %88 : vector<128x256xi32> to vector<128x256xf32>
    %cst_35 = arith.constant dense<0.000000e+00> : vector<128x16xf32>
    %90 = tpu.matmul %89, %0, %cst_35 {dimension_numbers = #tpu.dot_dimension_numbers<[1], [0], [0], [1], [0, 0, 1, 1], [], []>} : vector<128x256xf32>, vector<256x16xf32>, vector<128x16xf32> -> vector<128x16xf32>
    %cst_36 = arith.constant dense<0.000000e+00> : vector<128x128xf32>
    %91 = tpu.matmul %90, %1, %cst_36 {dimension_numbers = #tpu.dot_dimension_numbers<[1], [0], [0], [1], [0, 0, 1, 1], [], []>} : vector<128x16xf32>, vector<16x128xf32>, vector<128x128xf32> -> vector<128x128xf32>
    %92 = arith.addf %91, %10 : vector<128x128xf32>
    %93 = arith.maximumf %84, %92 : vector<128x128xf32>
    %c0_37 = arith.constant 0 : index
    %c0_38 = arith.constant 0 : index
    %94 = vector.load %arg6[%c0_37, %c0_38] : memref<128x128xf32, #tpu.memory_space<vmem>>, vector<128x128xf32>
    tpu.vector_store %arg6[%c0_37, %c0_38], %93 {strides = array<i32>} : memref<128x128xf32, #tpu.memory_space<vmem>>, vector<128x128xf32>,
    return
  }
  func.func @transform_0(%arg0: i32) -> (i32, i32) {
    %c0_i32 = arith.constant 0 : i32
    %c0_i32_0 = arith.constant 0 : i32
    return %arg0, %c0_i32 : i32, i32
  }
  func.func @transform_1(%arg0: i32) -> (i32, i32) {
    %c0_i32 = arith.constant 0 : i32
    %c0_i32_0 = arith.constant 0 : i32
    %c0_i32_1 = arith.constant 0 : i32
    return %c0_i32, %c0_i32_0 : i32, i32
  }
  func.func @transform_2(%arg0: i32) -> (i32, i32) {
    %c0_i32 = arith.constant 0 : i32
    %c0_i32_0 = arith.constant 0 : i32
    %c0_i32_1 = arith.constant 0 : i32
    return %c0_i32, %c0_i32_0 : i32, i32
  }
  func.func @transform_3(%arg0: i32) -> (i32, i32) {
    %c0_i32 = arith.constant 0 : i32
    %c0_i32_0 = arith.constant 0 : i32
    %c0_i32_1 = arith.constant 0 : i32
    return %c0_i32, %c0_i32_0 : i32, i32
  }
  func.func @transform_4(%arg0: i32) -> (i32, i32) {
    %c0_i32 = arith.constant 0 : i32
    %c0_i32_0 = arith.constant 0 : i32
    %c0_i32_1 = arith.constant 0 : i32
    return %c0_i32, %c0_i32_0 : i32, i32
  }
  func.func @transform_5(%arg0: i32) -> (i32, i32) {
    %c0_i32 = arith.constant 0 : i32
    %c0_i32_0 = arith.constant 0 : i32
    return %arg0, %c0_i32 : i32, i32
  }
}

</mosaic_0001>

<bundles_post_ra>
// kernel: tpu_custom_call.1
= control target key start
LH: loop header
LB: loop body
LE: loop exit
PB: predicated region body
PF: predicated region fallthrough
CT: control target
= control target key end

     0   :  { %10 = vsyncpa [#allocation3], 0  ;;  %s8420_s0 = inlined_call_operand.vmem [shape: s32[256,9], index: 0, kind: input, shape index: {}]   ;;  %s8421_s1 = inlined_call_operand.vmem [shape: f32[256,16], index: 1, kind: input, shape index: {}]   ;;  %s8422_s2 = inlined_call_operand.vmem [shape: f32[16,128], index: 2, kind: input, shape index: {}]   ;;  %s8423_s3 = inlined_call_operand.vmem [shape: f32[16,128], index: 3, kind: input, shape index: {}]   ;;  %s8424_s4 = inlined_call_operand.vmem [shape: f32[1,128], index: 4, kind: input, shape index: {}]   ;;  %s8425_s5 = inlined_call_operand.hbm [shape: f32[256,128], index: 5, kind: output, shape index: {}]  }
   0x1   :  { %12 = vsyncpa [#allocation3 + $0x1], 0  ;;  %s5205_s18 = smov 0   ;;  %s5207_s19 = smov 0  }
   0x2   :  { %s5209_s20 = smov 0   ;;  %s5211_s21 = smov 0  }
   0x3 LB: > { %s5226_s22 = sadd.s32 4294967295, %s5161_s21   ;;  %s4140_s23 = sadd.s32 4294967294, %s5161_s21   ;;  %s5161_s21 = sphi %s5211_s21, %s8750_s21   ;;  %s5157_s20 = sphi %s5209_s20, %s8749_s20   ;;  %s5153_s19 = sphi %s5207_s19, %s8748_s19   ;;  %s5149_s18 = sphi %s5205_s18, %s8747_s18  }
   0x4   : > { %s5230_s24 = sadd.s32 1, %s5161_s21   ;;  %s135_s25 = sadd.s32 1, %s5157_s20 }
   0x5   : > { %s132_s26 = ssub.s32 %s5161_s21, %s5230_s24  ;;  %p145_p0 = scmp.ne.s32.totalorder %s5157_s20, %s5153_s19 }
   0x6   : > { %p133_p1 = scmp.eq.s32.totalorder %s132_s26, 0  ;;  %p146_p2 = scmp.eq.s32.totalorder %s5226_s22, 1 }
   0x7   : > { %p151_p3 = scmp.ne.s32.totalorder %s5153_s19, %s5149_s18  ;;  %p152_p4 = scmp.eq.s32.totalorder %s4140_s23, 1 }
   0x8   : > { %s5241_s27 = scalar_select %p133_p1, %s5157_s20, %s135_s25  }
   0x9   : > { %p5243_p5 = por %p146_p2, %p145_p0  ;;  %p5247_p6 = por %p152_p4, %p151_p3 }
   0xa   : > { %p4143_p7 = scmp.ge.s32.totalorder %s5161_s21, 1  ;;  %p191_p8 = scmp.lt.s32.totalorder %s5161_s21, 3 }
   0xc   : > { %p192_p9 = pnand %p4143_p7, %p191_p8 }
   0xe   : > { %195 = sbr.rel (%p192_p9) target bundleno = 1699 (0x6a3), region = 40 }
  0x13   : > { %s4145_s30 = sshll.u32 %s5226_s22, 4  ;;  %v279_v0 = vld [vmem:[%s8422_s2 + $0x8] sm:$0xff]  ;;  %s4147_s8 = sshll.u32 %s5226_s22, 7  ;;  %v5163_v1 = vmov 0   ;;  %v278_v2 = vld [vmem:[%s8422_s2] sm:$0xff]  ;;  %vm284_vm0 = vcmask 130048  }
  0x14   : > { %4974 = vset.pattern.permute.xlu1 %v5163_v1  ;;  %4973 = vset.pattern.permute.xlu0 %v5163_v1  ;;  %p220_p10 = scmp.lt.s32.totalorder %s4145_s30, 31  ;;  %s5266_s13 = scalar_lea.vmem %s8421_s1, %s4147_s8  ;;  %v5331_v19 = vld [vmem:[%s8421_s1 + $0x78] sm:$0xff]  ;;  %v5344_v22 = vld [vmem:[%s8421_s1 + $0x70] sm:$0xff]  ;;  %v5355_v24 = vld [vmem:[%s8421_s1 + $0x68] sm:$0xff]  ;;  %v5164_v40 = vmov 1  }
  0x15   : > { %4975 = vset.pattern.permute.xlu2 %v5163_v1  ;;  %347 = vmatpush.msra.mxu0 %v279_v0  ;;  %v262_v3 = vld [vmem:[%s5266_s13] sm:$0xff]  ;;  %v263_v7 = vld [vmem:[%s5266_s13 + $0x8] sm:$0xff]  ;;  %v264_v11 = vld [vmem:[%s5266_s13 + $0x10] sm:$0xff]  ;;  %s216_s12 = sand.u32 1, %s5153_s19   ;;  %s5119_s7 = scalar_lea.hbm %s8425_s5, 256 }
  0x16   : > { %s8752_s30 = smov (!%p220_p10, %s4145_s30), 31  ;;  %v265_v15 = vld [vmem:[%s5266_s13 + $0x18] sm:$0xff]  ;;  %v266_v21 = vld [vmem:[%s5266_s13 + $0x20] sm:$0xff]  ;;  %561 = vmatpush.msra.mxu1 %v5331_v19  ;;  %v5349_v23 = vld [vmem:[%s8421_s1 + $0xf0] sm:$0xff]  ;;  %s4061_s22 = scalar_lea.sflag [#allocation3], %s216_s12 }
  0x17   : > { %348 = vmatpush.msra.mxu0 %v278_v2  ;;  %s4146_s14 = sshll.u32 %s8752_s30, 3  ;;  %v5336_v20 = vld [vmem:[%s8421_s1 + $0xf8] sm:$0xff]  ;;  %v5362_v25 = vld [vmem:[%s8421_s1 + $0xe8] sm:$0xff]  ;;  %v5376_v28 = vld [vmem:[%s8421_s1 + $0x60] sm:$0xff]  ;;  %v398_v2 = vlaneseq }
  0x18   : > { %4148 = vmatmul.msk.f32.vlgmr.msra.gmra.mxu0 %vm284_vm0, %v262_v3  ;;  %s5273_s17 = scalar_lea.vmem %s8420_s0, %s4146_s14  ;;  %626 = vmatpush.msra.mxu2 %v5336_v20  ;;  %v5381_v29 = vld [vmem:[%s8421_s1 + $0xe0] sm:$0xff]  ;;  %v5393_v31 = vld [vmem:[%s8421_s1 + $0x58] sm:$0xff]  ;;  %v267_v33 = vld [vmem:[%s5266_s13 + $0x28] sm:$0xff]  ;;  %s4144_s14 = sshll.u32 %s216_s12, 7 }
  0x19   : > { %v5276_v4 = vld [vmem:[%s5273_s17 + $0x10] sm:$0xff]  ;;  %v5279_v5 = vld [vmem:[%s5273_s17] sm:$0xff]  ;;  %v5289_v8 = vld [vmem:[%s5273_s17 + $0x18] sm:$0xff]  ;;  %964 = vmatpush.msrb.mxu0 %v5331_v19  ;;  %562 = vmatpush.msra.mxu1 %v5344_v22  ;;  %v5611_v3 = vand.u32 127, %v398_v2  ;;  %s8293_s15 = scalar_lea.vmem [#allocation2], %s4144_s14 }
  0x1a   : > { %424 = vperm.xlu1 %4974, %v5276_v4   ;;  %418 = vperm.xlu0 %4973, %v5279_v5   ;;  %v5284_v6 = vld [vmem:[%s5273_s17 + $0x20] sm:$0xff]  ;;  %v5292_v9 = vld [vmem:[%s5273_s17 + $0x8] sm:$0xff]  ;;  %v5303_v12 = vld [vmem:[%s5273_s17 + $0x38] sm:$0xff]  ;;  %s4073_s25 = sshll.u32 %s8293_s15, 4  ;;  %s4074_s25 = int_to_ptr.vmem [resolvable:$true] %s4073_s25 }
  0x1b   : > { %430 = vperm.xlu2 %4975, %v5284_v6   ;;  %v5296_v10 = vld [vmem:[%s5273_s17 + $0x28] sm:$0xff]  ;;  %v5306_v13 = vld [vmem:[%s5273_s17 + $0x30] sm:$0xff]  ;;  %v5310_v14 = vld [vmem:[%s5273_s17 + $0x40] sm:$0xff]  ;;  %627 = vmatpush.msra.mxu2 %v5349_v23  ;;  %8489 = vst [vmem:[#allocation5_spill] sm:$0xff] %v5611_v3 }
  0x1c   : > { %v5317_v16 = vld [vmem:[%s5273_s17 + $0x50] sm:$0xff]  ;;  %v5320_v17 = vld [vmem:[%s5273_s17 + $0x48] sm:$0xff]  ;;  %v5324_v18 = vld [vmem:[%s5273_s17 + $0x58] sm:$0xff]  ;;  %563 = vmatpush.msra.mxu1 %v5355_v24  ;;  %965 = vmatpush.msrb.mxu0 %v5344_v22 }
  0x1d   : > { %v5365_v26 = vld [vmem:[%s5273_s17 + $0x68] sm:$0xff]  ;;  %v5368_v27 = vld [vmem:[%s5273_s17 + $0x60] sm:$0xff]  ;;  %v5385_v30 = vld [vmem:[%s5273_s17 + $0x70] sm:$0xff]  ;;  %628 = vmatpush.msra.mxu2 %v5362_v25 }
  0x1e   : > { %v5398_v32 = vld [vmem:[%s8421_s1 + $0xd8] sm:$0xff]  ;;  %564 = vmatpush.msra.mxu1 %v5376_v28  ;;  %v5407_v34 = vld [vmem:[%s8421_s1 + $0x50] sm:$0xff]  ;;  %966 = vmatpush.msrb.mxu0 %v5355_v24  ;;  %v5420_v36 = vld [vmem:[%s8421_s1 + $0x48] sm:$0xff] }
  0x1f   : > { %629 = vmatpush.msra.mxu2 %v5381_v29  ;;  %v5415_v35 = vld [vmem:[%s8421_s1 + $0xd0] sm:$0xff]  ;;  %v5424_v37 = vld [vmem:[%s5273_s17 + $0x78] sm:$0xff]  ;;  %v5432_v38 = vld [vmem:[%s8421_s1 + $0xc8] sm:$0xff] }
  0x20   : > { %4149 = vmatmul.msk.f32.gmra.mxu0 %vm284_vm0, %v263_v7  ;;  %565 = vmatpush.msra.mxu1 %v5393_v31  ;;  %v5439_v39 = vld [vmem:[%s8421_s1 + $0x40] sm:$0xff]  ;;  %v5452_v42 = vld [vmem:[%s8421_s1 + $0x38] sm:$0xff]  ;;  %v268_v43 = vld [vmem:[%s5266_s13 + $0x30] sm:$0xff] }
  0x21   : > { %630 = vmatpush.msra.mxu2 %v5398_v32  ;;  %967 = vmatpush.msrb.mxu0 %v5376_v28  ;;  %v5445_v41 = vld [vmem:[%s8421_s1 + $0xc0] sm:$0xff]  ;;  %v5459_v44 = vld [vmem:[%s8421_s1 + $0xb8] sm:$0xff]  ;;  %v5466_v45 = vld [vmem:[%s8421_s1 + $0x30] sm:$0xff] }
  0x22   : > { %427 = vperm.xlu1 %4974, %v5289_v8   ;;  %421 = vperm.xlu0 %4973, %v5292_v9   ;;  %v5472_v46 = vld [vmem:[%s8421_s1 + $0xb0] sm:$0xff]  ;;  %v5480_v47 = vld [vmem:[%s8421_s1 + $0x28] sm:$0xff]  ;;  %v5493_v49 = vld [vmem:[%s8421_s1 + $0x20] sm:$0xff] }
  0x23   : > { %433 = vperm.xlu2 %4975, %v5296_v10   ;;  %566 = vmatpush.msra.mxu1 %v5407_v34  ;;  %v5488_v48 = vld [vmem:[%s8421_s1 + $0xa8] sm:$0xff]  ;;  %v5501_v50 = vld [vmem:[%s8421_s1 + $0xa0] sm:$0xff]  ;;  %v5506_v51 = vld [vmem:[%s8421_s1 + $0x18] sm:$0xff] }
  0x24   : > { %631 = vmatpush.msra.mxu2 %v5415_v35  ;;  %968 = vmatpush.msrb.mxu0 %v5393_v31  ;;  %v269_v52 = vld [vmem:[%s5266_s13 + $0x38] sm:$0xff]  ;;  %v5520_v54 = vld [vmem:[%s8421_s1 + $0x10] sm:$0xff]  ;;  %v5534_v56 = vld [vmem:[%s8421_s1 + $0x8] sm:$0xff] }
  0x25   : > { %567 = vmatpush.msra.mxu1 %v5420_v36  ;;  %v5515_v53 = vld [vmem:[%s8421_s1 + $0x98] sm:$0xff]  ;;  %v5529_v55 = vld [vmem:[%s8421_s1 + $0x90] sm:$0xff]  ;;  %v5541_v57 = vld [vmem:[%s8421_s1 + $0x88] sm:$0xff] }
  0x26   : > { %632 = vmatpush.msra.mxu2 %v5432_v38  ;;  %969 = vmatpush.msrb.mxu0 %v5407_v34  ;;  %v270_v58 = vld [vmem:[%s5266_s13 + $0x40] sm:$0xff]  ;;  %v271_v59 = vld [vmem:[%s5266_s13 + $0x48] sm:$0xff]  ;;  %v272_v60 = vld [vmem:[%s5266_s13 + $0x50] sm:$0xff] }
  0x27   : > { %568 = vmatpush.msra.mxu1 %v5439_v39  ;;  %v5572_v61 = vld [vmem:[%s8421_s1] sm:$0xff]  ;;  %v273_v63 = vld [vmem:[%s5266_s13 + $0x58] sm:$0xff]  ;;  %v275_v1 = vld [vmem:[%s5266_s13 + $0x68] sm:$0xff] }
  0x28   : > { %4150 = vmatmul.msk.f32.gmra.mxu0 %vm284_vm0, %v264_v11  ;;  %633 = vmatpush.msra.mxu2 %v5445_v41  ;;  %v5577_v62 = vld [vmem:[%s8421_s1 + $0x80] sm:$0xff]  ;;  %v276_v7 = vld [vmem:[%s5266_s13 + $0x70] sm:$0xff] }
  0x29   : > { %569 = vmatpush.msra.mxu1 %v5452_v42  ;;  %970 = vmatpush.msrb.mxu0 %v5420_v36  ;;  %v274_v0 = vld [vmem:[%s5266_s13 + $0x60] sm:$0xff] }
  0x2a   : > { %439 = vperm.xlu1 %4974, %v5303_v12   ;;  %436 = vperm.xlu0 %4973, %v5306_v13  }
  0x2b   : > { %442 = vperm.xlu2 %4975, %v5310_v14   ;;  %634 = vmatpush.msra.mxu2 %v5459_v44 }
  0x2c   : > { %570 = vmatpush.msra.mxu1 %v5466_v45  ;;  %971 = vmatpush.msrb.mxu0 %v5439_v39 }
  0x2d   : > { %635 = vmatpush.msra.mxu2 %v5472_v46 }
  0x2e   : > { %571 = vmatpush.msra.mxu1 %v5480_v47  ;;  %972 = vmatpush.msrb.mxu0 %v5452_v42 }
  0x2f   : > { %636 = vmatpush.msra.mxu2 %v5488_v48 }
  0x30   : > { %4151 = vmatmul.msk.f32.gmra.mxu0 %vm284_vm0, %v265_v15  ;;  %572 = vmatpush.msra.mxu1 %v5493_v49  ;;  %v5622_v15 = vadd.s32 128, %v5611_v3 }
  0x31   : > { %637 = vmatpush.msra.mxu2 %v5501_v50  ;;  %973 = vmatpush.msrb.mxu0 %v5466_v45 }
  0x32   : > { %448 = vperm.xlu1 %4974, %v5317_v16   ;;  %445 = vperm.xlu0 %4973, %v5320_v17  }
  0x33   : > { %451 = vperm.xlu2 %4975, %v5324_v18   ;;  %573 = vmatpush.msra.mxu1 %v5506_v51 }
  0x34   : > { %638 = vmatpush.msra.mxu2 %v5515_v53  ;;  %974 = vmatpush.msrb.mxu0 %v5480_v47 }
  0x35   : > { %574 = vmatpush.msra.mxu1 %v5520_v54 }
  0x36   : > { %639 = vmatpush.msra.mxu2 %v5529_v55  ;;  %975 = vmatpush.msrb.mxu0 %v5493_v49 }
  0x37   : > { %575 = vmatpush.msra.mxu1 %v5534_v56 }
  0x38   : > { %4152 = vmatmul.msk.f32.gmra.mxu0 %vm284_vm0, %v266_v21  ;;  %640 = vmatpush.msra.mxu2 %v5541_v57 }
  0x39   : > { %976 = vmatpush.msrb.mxu0 %v5506_v51  ;;  %576 = vmatpush.msra.mxu1 %v5572_v61 }
  0x3a   : > { %457 = vperm.xlu1 %4974, %v5365_v26   ;;  %454 = vperm.xlu0 %4973, %v5368_v27  }
  0x3b   : > { %460 = vperm.xlu2 %4975, %v5385_v30   ;;  %977 = vmatpush.msrb.mxu0 %v5520_v54 }
  0x3c   : > { %641 = vmatpush.msra.mxu2 %v5577_v62 }
  0x3d   : > { %978 = vmatpush.msrb.mxu0 %v5534_v56 }
  0x3e   : > { %1367 = vmatpush.msrb.mxu2 %v5331_v19 }
  0x3f   : > { %979 = vmatpush.msrb.mxu0 %v5572_v61 }
  0x40   : > { %4153 = vmatmul.msk.f32.gmra.mxu0 %vm284_vm0, %v267_v33  ;;  %1368 = vmatpush.msrb.mxu2 %v5344_v22 }
  0x41   : > { %1432 = vmatpush.msra.mxu0 %v5336_v20 }
  0x42   : > { %4976 = vset.pattern.permute.xlu1 %v5164_v40  ;;  %463 = vperm.xlu0 %4973, %v5424_v37  }
  0x43   : > { %821 = vperm.xlu1 %4976, %v5279_v5   ;;  %4977 = vset.pattern.permute.xlu2 %v5164_v40 }
  0x44   : > { %824 = vperm.xlu2 %4977, %v5292_v9   ;;  %1433 = vmatpush.msra.mxu0 %v5349_v23 }
  0x45   : > { %1369 = vmatpush.msrb.mxu2 %v5355_v24 }
  0x46   : > { %1434 = vmatpush.msra.mxu0 %v5362_v25 }
  0x47   : > { %1370 = vmatpush.msrb.mxu2 %v5376_v28 }
  0x48   : > { %4154 = vmatmul.msk.f32.gmra.mxu0 %vm284_vm0, %v268_v43  ;;  %v277_v43 = vld [vmem:[%s5266_s13 + $0x78] sm:$0xff] }
  0x49   : > { %1435 = vmatpush.msra.mxu0 %v5381_v29  ;;  %1371 = vmatpush.msrb.mxu2 %v5393_v31 }
  0x4a   : > { %4978 = vset.pattern.permute.xlu0 %v5164_v40  ;;  %v8427_v40 = vmov 1.0  }
  0x4b   : > { %827 = vperm.xlu0 %4978, %v5276_v4   ;;  %830 = vperm.xlu1 %4976, %v5289_v8  }
  0x4c   : > { %833 = vperm.xlu2 %4977, %v5284_v6   ;;  %1436 = vmatpush.msra.mxu0 %v5398_v32 }
  0x4d   : > { %1372 = vmatpush.msrb.mxu2 %v5407_v34 }
  0x4e   : > { %1437 = vmatpush.msra.mxu0 %v5415_v35 }
  0x4f   : > { %1373 = vmatpush.msrb.mxu2 %v5420_v36 }
  0x50   : > { %4155 = vmatmul.msk.f32.gmra.mxu0 %vm284_vm0, %v269_v52 }
  0x51   : > { %1438 = vmatpush.msra.mxu0 %v5432_v38  ;;  %1374 = vmatpush.msrb.mxu2 %v5439_v39 }
  0x53   : > { %836 = vperm.xlu1 %4976, %v5296_v10   ;;  %842 = vperm.xlu0 %4978, %v5303_v12  }
  0x54   : > { %839 = vperm.xlu2 %4977, %v5306_v13   ;;  %1439 = vmatpush.msra.mxu0 %v5445_v41 }
  0x55   : > { %1375 = vmatpush.msrb.mxu2 %v5452_v42 }
  0x56   : > { %1440 = vmatpush.msra.mxu0 %v5459_v44 }
  0x57   : > { %1376 = vmatpush.msrb.mxu2 %v5466_v45 }
  0x58   : > { %4156 = vmatmul.msk.f32.gmra.mxu0 %vm284_vm0, %v270_v58 }
  0x59   : > { %1441 = vmatpush.msra.mxu0 %v5472_v46  ;;  %1377 = vmatpush.msrb.mxu2 %v5480_v47 }
  0x5b   : > { %845 = vperm.xlu1 %4976, %v5310_v14   ;;  %851 = vperm.xlu0 %4978, %v5317_v16  }
  0x5c   : > { %848 = vperm.xlu2 %4977, %v5320_v17   ;;  %1442 = vmatpush.msra.mxu0 %v5488_v48 }
  0x5d   : > { %1378 = vmatpush.msrb.mxu2 %v5493_v49 }
  0x5e   : > { %1443 = vmatpush.msra.mxu0 %v5501_v50 }
  0x5f   : > { %1379 = vmatpush.msrb.mxu2 %v5506_v51 }
  0x60   : > { %4157 = vmatmul.msk.f32.gmra.mxu0 %vm284_vm0, %v271_v59 }
  0x61   : > { %1444 = vmatpush.msra.mxu0 %v5515_v53  ;;  %1380 = vmatpush.msrb.mxu2 %v5520_v54 }
  0x63   : > { %854 = vperm.xlu1 %4976, %v5324_v18   ;;  %860 = vperm.xlu0 %4978, %v5365_v26  }
  0x64   : > { %857 = vperm.xlu2 %4977, %v5368_v27   ;;  %1445 = vmatpush.msra.mxu0 %v5529_v55 }
  0x65   : > { %1381 = vmatpush.msrb.mxu2 %v5534_v56 }
  0x66   : > { %1446 = vmatpush.msra.mxu0 %v5541_v57 }
  0x67   : > { %1382 = vmatpush.msrb.mxu2 %v5572_v61 }
  0x68   : > { %4158 = vmatmul.msk.f32.gmra.mxu0 %vm284_vm0, %v272_v60 }
  0x69   : > { %1447 = vmatpush.msra.mxu0 %v5577_v62 }
  0x6b   : > { %863 = vperm.xlu1 %4976, %v5385_v30  }
  0x6c   : > { %866 = vperm.xlu2 %4977, %v5424_v37  }
  0x70   : > { %4159 = vmatmul.msk.f32.gmra.mxu0 %vm284_vm0, %v273_v63 }
  0x75   : > { %v5619_v11 = vpop.permute.xlu2 %430 }
  0x76   : > { %vm473_vm9 = vcmp.eq.s32.totalorder %v5611_v3, %v5619_v11  ;;  %vm474_vm10 = vcmp.eq.s32.totalorder %v5622_v15, %v5619_v11 }
  0x78   : > { %4160 = vmatmul.msk.f32.gmra.mxu0 %vm284_vm0, %v274_v0 }
  0x7d   : > { %v5638_v52 = vpop.permute.xlu2 %433 }
  0x7e   : > { %vm475_vm11 = vcmp.eq.s32.totalorder %v5611_v3, %v5638_v52  ;;  %vm476_vm12 = vcmp.eq.s32.totalorder %v5622_v15, %v5638_v52 }
  0x80   : > { %4161 = vmatmul.msk.f32.gmra.mxu0 %vm284_vm0, %v275_v1 }
  0x85   : > { %v5656_v1 = vpop.permute.xlu2 %442 }
  0x88   : > { %4162 = vmatmul.msk.f32.gmra.mxu0 %vm284_vm0, %v276_v7  ;;  %v5166_v7 = vmov 2  }
  0x89   : > { %4979 = vset.pattern.permute.xlu0 %v5166_v7  ;;  %4980 = vset.pattern.permute.xlu1 %v5166_v7 }
  0x8a   : > { %1224 = vperm.xlu0 %4979, %v5279_v5   ;;  %1227 = vperm.xlu1 %4980, %v5292_v9  }
  0x8b   : > { %4981 = vset.pattern.permute.xlu2 %v5166_v7 }
  0x8c   : > { %v425_v21 = vpop.permute.xlu1 %424  ;;  %v419_v33 = vpop.permute.xlu0 %418  ;;  %1230 = vperm.xlu2 %4981, %v5276_v4  }
  0x8d   : > { %vm465_vm1 = vcmp.eq.s32.totalorder %v5611_v3, %v419_v33  ;;  %vm466_vm2 = vcmp.eq.s32.totalorder %v5622_v15, %v419_v33  ;;  %vm469_vm5 = vcmp.eq.s32.totalorder %v5611_v3, %v425_v21  ;;  %vm470_vm6 = vcmp.eq.s32.totalorder %v5622_v15, %v425_v21 }
  0x8e   : > { %4196 = vmatmul.msk.f32.vlgmr.msra.gmra.mxu1 %vm465_vm1, %v8427_v40  ;;  %4212 = vmatmul.msk.f32.vlgmr.msra.gmra.mxu2 %vm466_vm2, %v8427_v40 }
  0x8f   : > { %1835 = vmatpush.msra.mxu2 %v5336_v20 }
  0x90   : > { %4163 = vmatmul.msk.f32.gmra.mxu0 %vm284_vm0, %v277_v43  ;;  %v5677_v43 = vpop.permute.xlu2 %451 }
  0x91   : > { %1836 = vmatpush.msra.mxu2 %v5349_v23 }
  0x92   : > { %1233 = vperm.xlu1 %4980, %v5289_v8   ;;  %1239 = vperm.xlu0 %4979, %v5296_v10  }
  0x93   : > { %1837 = vmatpush.msra.mxu2 %v5362_v25 }
  0x94   : > { %v428_v58 = vpop.permute.xlu1 %427  ;;  %v422_v59 = vpop.permute.xlu0 %421  ;;  %1236 = vperm.xlu2 %4981, %v5284_v6  }
  0x95   : > { %vm467_vm3 = vcmp.eq.s32.totalorder %v5611_v3, %v422_v59  ;;  %vm468_vm4 = vcmp.eq.s32.totalorder %v5622_v15, %v422_v59  ;;  %v5643_v60 = vpop.f32.mrf.mxu0  ;;  %1838 = vmatpush.msra.mxu2 %v5381_v29  ;;  %vm471_vm7 = vcmp.eq.s32.totalorder %v5611_v3, %v428_v58  ;;  %vm472_vm8 = vcmp.eq.s32.totalorder %v5622_v15, %v428_v58 }
  0x96   : > { %8490 = vst [vmem:[#allocation6_spill] sm:$0xff] %v5643_v60  ;;  %4197 = vmatmul.msk.f32.gmra.mxu1 %vm467_vm3, %v8427_v40  ;;  %4213 = vmatmul.msk.f32.gmra.mxu2 %vm468_vm4, %v8427_v40 }
  0x97   : > { %1839 = vmatpush.msra.mxu2 %v5398_v32 }
  0x99   : > { %1840 = vmatpush.msra.mxu2 %v5415_v35 }
  0x9a   : > { %1242 = vperm.xlu1 %4980, %v5306_v13   ;;  %1248 = vperm.xlu0 %4979, %v5310_v14  }
  0x9b   : > { %1841 = vmatpush.msra.mxu2 %v5432_v38 }
  0x9c   : > { %v5652_v63 = vpop.permute.xlu1 %439  ;;  %v5654_v0 = vpop.permute.xlu0 %436  ;;  %1245 = vperm.xlu2 %4981, %v5303_v12  }
  0x9d   : > { %v5661_v2 = vpop.f32.mrf.mxu0  ;;  %1842 = vmatpush.msra.mxu2 %v5445_v41  ;;  %vm477_vm15 = vcmp.eq.s32.totalorder %v5611_v3, %v5654_v0  ;;  %vm478_vm1 = vcmp.eq.s32.totalorder %v5622_v15, %v5654_v0  ;;  %vm479_vm3 = vcmp.eq.s32.totalorder %v5611_v3, %v5652_v63  ;;  %vm480_vm4 = vcmp.eq.s32.totalorder %v5622_v15, %v5652_v63 }
  0x9e   : > { %4198 = vmatmul.msk.f32.gmra.mxu1 %vm469_vm5, %v8427_v40  ;;  %4214 = vmatmul.msk.f32.gmra.mxu2 %vm470_vm6, %v8427_v40  ;;  %8491 = vst [vmem:[#allocation7_spill] sm:$0xff] %v5661_v2  ;;  %vm481_vm6 = vcmp.eq.s32.totalorder %v5611_v3, %v5656_v1 }
  0x9f   : > { %1843 = vmatpush.msra.mxu2 %v5459_v44 }
  0xa1   : > { %1844 = vmatpush.msra.mxu2 %v5472_v46 }
  0xa2   : > { %1251 = vperm.xlu1 %4980, %v5320_v17   ;;  %1257 = vperm.xlu0 %4979, %v5324_v18  }
  0xa3   : > { %1845 = vmatpush.msra.mxu2 %v5488_v48 }
  0xa4   : > { %v5668_v21 = vpop.permute.xlu1 %448  ;;  %v5671_v33 = vpop.permute.xlu0 %445  ;;  %1254 = vperm.xlu2 %4981, %v5317_v16  }
  0xa5   : > { %v5680_v59 = vpop.f32.mrf.mxu0  ;;  %1846 = vmatpush.msra.mxu2 %v5501_v50 }
  0xa6   : > { %4199 = vmatmul.msk.f32.gmra.mxu1 %vm471_vm7, %v8427_v40  ;;  %4215 = vmatmul.msk.f32.gmra.mxu2 %vm472_vm8, %v8427_v40  ;;  %8492 = vst [vmem:[#allocation8_spill] sm:$0xff] %v5680_v59  ;;  %v5698_v59 = vpop.permute.xlu2 %460  ;;  %vm482_vm7 = vcmp.eq.s32.totalorder %v5622_v15, %v5656_v1 }
  0xa7   : > { %1847 = vmatpush.msra.mxu2 %v5515_v53 }
  0xa9   : > { %1848 = vmatpush.msra.mxu2 %v5529_v55 }
  0xaa   : > { %1260 = vperm.xlu1 %4980, %v5368_v27   ;;  %1266 = vperm.xlu0 %4979, %v5385_v30  }
  0xab   : > { %1849 = vmatpush.msra.mxu2 %v5541_v57 }
  0xac   : > { %v5690_v58 = vpop.permute.xlu1 %457  ;;  %v5695_v7 = vpop.permute.xlu0 %454  ;;  %1263 = vperm.xlu2 %4981, %v5365_v26  }
  0xad   : > { %v5702_v11 = vpop.f32.mrf.mxu0  ;;  %1850 = vmatpush.msra.mxu2 %v5577_v62 }
  0xae   : > { %4200 = vmatmul.msk.f32.gmra.mxu1 %vm473_vm9, %v8427_v40  ;;  %4216 = vmatmul.msk.f32.gmra.mxu2 %vm474_vm10, %v8427_v40  ;;  %8493 = vst [vmem:[#allocation9_spill] sm:$0xff] %v5702_v11  ;;  %v5721_v11 = vpop.permute.xlu2 %824  ;;  %vm483_vm9 = vcmp.eq.s32.totalorder %v5611_v3, %v5671_v33  ;;  %vm484_vm10 = vcmp.eq.s32.totalorder %v5622_v15, %v5671_v33 }
  0xaf   : > { %vm870_vm14 = vcmp.eq.s32.totalorder %v5611_v3, %v5721_v11 }
  0xb2   : > { %1269 = vperm.xlu1 %4980, %v5424_v37  }
  0xb4   : > { %v5719_v14 = vpop.permute.xlu0 %463 }
  0xb5   : > { %v5707_v2 = vpop.permute.xlu1 %821  ;;  %v5729_v52 = vpop.f32.mrf.mxu0 }
  0xb6   : > { %vm868_vm13 = vcmp.eq.s32.totalorder %v5611_v3, %v5707_v2  ;;  %4201 = vmatmul.msk.f32.gmra.mxu1 %vm475_vm11, %v8427_v40  ;;  %4217 = vmatmul.msk.f32.gmra.mxu2 %vm476_vm12, %v8427_v40  ;;  %8494 = vst [vmem:[#allocation10_spill] sm:$0xff] %v5729_v52  ;;  %vm485_vm12 = vcmp.eq.s32.totalorder %v5611_v3, %v5668_v21 }
  0xb7   : > { %4276 = vmatmul.msk.f32.vlgmr.msrb.gmra.mxu0 %vm868_vm13, %v8427_v40  ;;  %vm486_vm13 = vcmp.eq.s32.totalorder %v5622_v15, %v5668_v21 }
  0xb8   : > { %1770 = vmatpush.msrb.mxu0 %v5331_v19 }
  0xba   : > { %1771 = vmatpush.msrb.mxu0 %v5344_v22 }
  0xbc   : > { %1772 = vmatpush.msrb.mxu0 %v5355_v24 }
  0xbd   : > { %v5740_v18 = vpop.permute.xlu0 %827  ;;  %v5755_v0 = vpop.f32.mrf.mxu0 }
  0xbe   : > { %4202 = vmatmul.msk.f32.gmra.mxu1 %vm477_vm15, %v8427_v40  ;;  %4218 = vmatmul.msk.f32.gmra.mxu2 %vm478_vm1, %v8427_v40  ;;  %vm872_vm2 = vcmp.eq.s32.totalorder %v5611_v3, %v5740_v18  ;;  %8495 = vst [vmem:[#allocation11_spill] sm:$0xff] %v5755_v0  ;;  %v5759_v52 = vpop.permute.xlu1 %830  ;;  %v5776_v0 = vpop.permute.xlu2 %833  ;;  %vm487_vm15 = vcmp.eq.s32.totalorder %v5611_v3, %v5677_v43 }
  0xbf   : > { %4277 = vmatmul.msk.f32.gmra.mxu0 %vm870_vm14, %v8427_v40  ;;  %vm874_vm5 = vcmp.eq.s32.totalorder %v5611_v3, %v5759_v52  ;;  %vm876_vm8 = vcmp.eq.s32.totalorder %v5611_v3, %v5776_v0  ;;  %vm488_vm1 = vcmp.eq.s32.totalorder %v5622_v15, %v5677_v43 }
  0xc0   : > { %1773 = vmatpush.msrb.mxu0 %v5376_v28 }
  0xc2   : > { %1774 = vmatpush.msrb.mxu0 %v5393_v31 }
  0xc4   : > { %1775 = vmatpush.msrb.mxu0 %v5407_v34 }
  0xc5   : > { %v5773_v63 = vpop.f32.mrf.mxu0  ;;  %v5819_v21 = vpop.permute.xlu0 %842 }
  0xc6   : > { %4203 = vmatmul.msk.f32.gmra.mxu1 %vm479_vm3, %v8427_v40  ;;  %4219 = vmatmul.msk.f32.gmra.mxu2 %vm480_vm4, %v8427_v40  ;;  %8496 = vst [vmem:[#allocation12_spill] sm:$0xff] %v5773_v63  ;;  %v5790_v1 = vpop.permute.xlu1 %836  ;;  %v5806_v33 = vpop.permute.xlu2 %839  ;;  %vm489_vm3 = vcmp.eq.s32.totalorder %v5611_v3, %v5695_v7  ;;  %vm490_vm4 = vcmp.eq.s32.totalorder %v5622_v15, %v5695_v7  ;;  %v5844_v7 = vld [vmem:[%s8423_s3] sm:$0xff] }
  0xc7   : > { %4278 = vmatmul.msk.f32.gmra.mxu0 %vm872_vm2, %v8427_v40  ;;  %vm878_vm11 = vcmp.eq.s32.totalorder %v5611_v3, %v5790_v1  ;;  %vm880_vm14 = vcmp.eq.s32.totalorder %v5611_v3, %v5806_v33  ;;  %vm882_vm2 = vcmp.eq.s32.totalorder %v5611_v3, %v5819_v21 }
  0xc8   : > { %1776 = vmatpush.msrb.mxu0 %v5420_v36 }
  0xca   : > { %1777 = vmatpush.msrb.mxu0 %v5439_v39 }
  0xcc   : > { %1778 = vmatpush.msrb.mxu0 %v5452_v42 }
  0xcd   : > { %v5792_v63 = vpop.f32.mrf.mxu0 }
  0xce   : > { %4204 = vmatmul.msk.f32.gmra.mxu1 %vm481_vm6, %v8427_v40  ;;  %4220 = vmatmul.msk.f32.gmra.mxu2 %vm482_vm7, %v8427_v40  ;;  %8497 = vst [vmem:[#allocation13_spill] sm:$0xff] %v5792_v63  ;;  %v5837_v60 = vpop.permute.xlu1 %845  ;;  %vm491_vm6 = vcmp.eq.s32.totalorder %v5611_v3, %v5690_v58  ;;  %vm492_vm7 = vcmp.eq.s32.totalorder %v5622_v15, %v5690_v58 }
  0xcf   : > { %4279 = vmatmul.msk.f32.gmra.mxu0 %vm874_vm5, %v8427_v40  ;;  %vm884_vm5 = vcmp.eq.s32.totalorder %v5611_v3, %v5837_v60 }
  0xd0   : > { %1779 = vmatpush.msrb.mxu0 %v5466_v45 }
  0xd2   : > { %1780 = vmatpush.msrb.mxu0 %v5480_v47 }
  0xd4   : > { %1781 = vmatpush.msrb.mxu0 %v5493_v49 }
  0xd5   : > { %v5810_v63 = vpop.f32.mrf.mxu0 }
  0xd6   : > { %4205 = vmatmul.msk.f32.gmra.mxu1 %vm483_vm9, %v8427_v40  ;;  %4221 = vmatmul.msk.f32.gmra.mxu2 %vm484_vm10, %v8427_v40  ;;  %8498 = vst [vmem:[#allocation14_spill] sm:$0xff] %v5810_v63  ;;  %v5835_v63 = vld [vmem:[%s8423_s3 + $0x8] sm:$0xff]  ;;  %vm493_vm9 = vcmp.eq.s32.totalorder %v5611_v3, %v5698_v59  ;;  %vm494_vm10 = vcmp.eq.s32.totalorder %v5622_v15, %v5698_v59 }
  0xd7   : > { %4280 = vmatmul.msk.f32.gmra.mxu0 %vm876_vm8, %v8427_v40  ;;  %753 = vmatpush.msra.mxu3 %v5835_v63 }
  0xd8   : > { %1782 = vmatpush.msrb.mxu0 %v5506_v51  ;;  %1156 = vmatpush.msrb.mxu1 %v5835_v63 }
  0xd9   : > { %754 = vmatpush.msra.mxu3 %v5844_v7 }
  0xda   : > { %1783 = vmatpush.msrb.mxu0 %v5520_v54  ;;  %1157 = vmatpush.msrb.mxu1 %v5844_v7 }
  0xdb   : > { %1029 = vmatpush.msrb.mxu3 %v5336_v20  ;;  %v5863_v20 = vpop.permute.xlu2 %848 }
  0xdc   : > { %1784 = vmatpush.msrb.mxu0 %v5534_v56  ;;  %4906 = vmatpush.msra.mxu1 %v5331_v19  ;;  %vm886_vm8 = vcmp.eq.s32.totalorder %v5611_v3, %v5863_v20 }
  0xdd   : > { %v5829_v43 = vpop.f32.mrf.mxu0  ;;  %1030 = vmatpush.msrb.mxu3 %v5349_v23  ;;  %v5881_v23 = vpop.permute.xlu0 %851 }
  0xde   : > { %4206 = vmatmul.msk.f32.gmra.mxu1 %vm485_vm12, %v8427_v40  ;;  %4222 = vmatmul.msk.f32.gmra.mxu2 %vm486_vm13, %v8427_v40  ;;  %8499 = vst [vmem:[#allocation15_spill] sm:$0xff] %v5829_v43  ;;  %vm495_vm12 = vcmp.eq.s32.totalorder %v5611_v3, %v5719_v14  ;;  %vm496_vm13 = vcmp.eq.s32.totalorder %v5622_v15, %v5719_v14 }
  0xdf   : > { %4281 = vmatmul.msk.f32.gmra.mxu0 %vm878_vm11, %v8427_v40  ;;  %4907 = vmatpush.msra.mxu1 %v5344_v22  ;;  %vm888_vm11 = vcmp.eq.s32.totalorder %v5611_v3, %v5881_v23 }
  0xe0   : > { %1785 = vmatpush.msrb.mxu0 %v5572_v61  ;;  %1031 = vmatpush.msrb.mxu3 %v5362_v25 }
  0xe1   : > { %4908 = vmatpush.msra.mxu1 %v5355_v24 }
  0xe2   : > { %1032 = vmatpush.msrb.mxu3 %v5381_v29  ;;  %v5901_v29 = vpop.permute.xlu1 %854 }
  0xe3   : > { %4909 = vmatpush.msra.mxu1 %v5376_v28 }
  0xe4   : > { %1033 = vmatpush.msrb.mxu3 %v5398_v32 }
  0xe5   : > { %v5860_v43 = vpop.f32.mrf.mxu0  ;;  %4910 = vmatpush.msra.mxu1 %v5393_v31 }
  0xe6   : > { %4207 = vmatmul.msk.f32.gmra.mxu1 %vm487_vm15, %v8427_v40  ;;  %4223 = vmatmul.msk.f32.gmra.mxu2 %vm488_vm1, %v8427_v40  ;;  %8500 = vst [vmem:[#allocation16_spill] sm:$0xff] %v5860_v43 }
  0xe7   : > { %4282 = vmatmul.msk.f32.gmra.mxu0 %vm880_vm14, %v8427_v40  ;;  %1034 = vmatpush.msrb.mxu3 %v5415_v35  ;;  %vm890_vm14 = vcmp.eq.s32.totalorder %v5611_v3, %v5901_v29 }
  0xe8   : > { %4911 = vmatpush.msra.mxu1 %v5407_v34 }
  0xe9   : > { %1035 = vmatpush.msrb.mxu3 %v5432_v38  ;;  %v5910_v38 = vpop.permute.xlu0 %860 }
  0xea   : > { %4912 = vmatpush.msra.mxu1 %v5420_v36 }
  0xeb   : > { %1036 = vmatpush.msrb.mxu3 %v5445_v41 }
  0xec   : > { %4913 = vmatpush.msra.mxu1 %v5439_v39 }
  0xed   : > { %v5884_v25 = vpop.f32.mrf.mxu0  ;;  %1037 = vmatpush.msrb.mxu3 %v5459_v44  ;;  %v5918_v44 = vpop.permute.xlu2 %857 }
  0xee   : > { %4208 = vmatmul.msk.f32.gmra.mxu1 %vm489_vm3, %v8427_v40  ;;  %4224 = vmatmul.msk.f32.gmra.mxu2 %vm490_vm4, %v8427_v40  ;;  %8501 = vst [vmem:[#allocation17_spill] sm:$0xff] %v5884_v25  ;;  %vm892_vm15 = vcmp.eq.s32.totalorder %v5611_v3, %v5918_v44 }
  0xef   : > { %4283 = vmatmul.msk.f32.gmra.mxu0 %vm882_vm2, %v8427_v40  ;;  %1038 = vmatpush.msrb.mxu3 %v5472_v46  ;;  %vm894_vm2 = vcmp.eq.s32.totalorder %v5611_v3, %v5910_v38 }
  0xf0   : > { %4914 = vmatpush.msra.mxu1 %v5452_v42 }
  0xf1   : > { %1039 = vmatpush.msrb.mxu3 %v5488_v48 }
  0xf2   : > { %4915 = vmatpush.msra.mxu1 %v5466_v45 }
  0xf3   : > { %1040 = vmatpush.msrb.mxu3 %v5501_v50 }
  0xf4   : > { %4916 = vmatpush.msra.mxu1 %v5480_v47 }
  0xf5   : > { %v5908_v35 = vpop.f32.mrf.mxu0  ;;  %1041 = vmatpush.msrb.mxu3 %v5515_v53 }
  0xf6   : > { %4209 = vmatmul.msk.f32.gmra.mxu1 %vm491_vm6, %v8427_v40  ;;  %4225 = vmatmul.msk.f32.gmra.mxu2 %vm492_vm7, %v8427_v40  ;;  %8502 = vst [vmem:[#allocation18_spill] sm:$0xff] %v5908_v35 }
  0xf7   : > { %4284 = vmatmul.msk.f32.gmra.mxu0 %vm884_vm5, %v8427_v40  ;;  %1042 = vmatpush.msrb.mxu3 %v5529_v55  ;;  %v5937_v55 = vpop.permute.xlu1 %863 }
  0xf8   : > { %4917 = vmatpush.msra.mxu1 %v5493_v49  ;;  %vm896_vm4 = vcmp.eq.s32.totalorder %v5611_v3, %v5937_v55 }
  0xf9   : > { %1043 = vmatpush.msrb.mxu3 %v5541_v57 }
  0xfa   : > { %4918 = vmatpush.msra.mxu1 %v5506_v51 }
  0xfb   : > { %1044 = vmatpush.msrb.mxu3 %v5577_v62 }
  0xfc   : > { %v5926_v50 = vpop.permute.xlu0 %1224  ;;  %4919 = vmatpush.msra.mxu1 %v5520_v54 }
  0xfd   : > { %vm1271_vm1 = vcmp.eq.s32.totalorder %v5611_v3, %v5926_v50  ;;  %v5932_v53 = vpop.f32.mrf.mxu0 }
  0xfe   : > { %4210 = vmatmul.msk.f32.gmra.mxu1 %vm493_vm9, %v8427_v40  ;;  %4226 = vmatmul.msk.f32.gmra.mxu2 %vm494_vm10, %v8427_v40  ;;  %8503 = vst [vmem:[#allocation19_spill] sm:$0xff] %v5932_v53 }
  0xff   : > { %4285 = vmatmul.msk.f32.gmra.mxu0 %vm886_vm8, %v8427_v40  ;;  %4920 = vmatpush.msra.mxu1 %v5534_v56  ;;  %v1228_v59 = vpop.permute.xlu1 %1227  ;;  %vm1272_vm8 = vcmp.eq.s32.totalorder %v5622_v15, %v5926_v50 }
 0x100   : > { %vm1273_vm3 = vcmp.eq.s32.totalorder %v5611_v3, %v1228_v59  ;;  %vm1274_vm10 = vcmp.eq.s32.totalorder %v5622_v15, %v1228_v59 }
 0x101   : > { %4921 = vmatpush.msra.mxu1 %v5572_v61 }
 0x106   : > { %4211 = vmatmul.msk.f32.gmra.mxu1 %vm495_vm12, %v8427_v40  ;;  %4227 = vmatmul.msk.f32.gmra.mxu2 %vm496_vm13, %v8427_v40 }
 0x107   : > { %4286 = vmatmul.msk.f32.gmra.mxu0 %vm888_vm11, %v8427_v40 }
 0x10b   : > { %v578_v32 = vpop.f32.mrf.mxu1 }
 0x10e   : > { %4356 = vmatmul.msk.f32.vlgmr.msrb.gmra.mxu2 %vm1271_vm1, %v8427_v40 }
 0x10f   : > { %4287 = vmatmul.msk.f32.gmra.mxu0 %vm890_vm14, %v8427_v40  ;;  %2365 = vmatpush.msrb.mxu2 %v5835_v63 }
 0x111   : > { %v643_v41 = vpop.f32.mrf.mxu2  ;;  %2366 = vmatpush.msrb.mxu2 %v5844_v7 }
 0x112   : > { %v644_v46 = vadd.f32 %v643_v41, %v578_v32 }
 0x113   : > { %v581_v48 = vpop.f32.mrf.mxu1 }
 0x114   : > { %4228 = vmatmul.msk.f32.vlgmr.msra.gmra.mxu3 %vm284_vm0, %v644_v46 }
 0x115   : > { %4890 = vmatpush.msra.mxu3 %v5331_v19 }
 0x116   : > { %4357 = vmatmul.msk.f32.gmra.mxu2 %vm1273_vm3, %v8427_v40 }
 0x117   : > { %4288 = vmatmul.msk.f32.gmra.mxu0 %vm892_vm15, %v8427_v40  ;;  %4891 = vmatpush.msra.mxu3 %v5344_v22  ;;  %v5950_v22 = vpop.permute.xlu2 %866 }
 0x118   : > { %vm898_vm6 = vcmp.eq.s32.totalorder %v5611_v3, %v5950_v22 }
 0x119   : > { %v646_v57 = vpop.f32.mrf.mxu2  ;;  %4892 = vmatpush.msra.mxu3 %v5355_v24  ;;  %v5953_v24 = vpop.f32.mrf.mxu0 }
 0x11a   : > { %v647_v19 = vadd.f32 %v646_v57, %v581_v48  ;;  %8504 = vst [vmem:[#allocation20_spill] sm:$0xff] %v5953_v24 }
 0x11b   : > { %v584_v62 = vpop.f32.mrf.mxu1  ;;  %4893 = vmatpush.msra.mxu3 %v5376_v28 }
 0x11c   : > { %4229 = vmatmul.msk.f32.gmra.mxu3 %vm284_vm0, %v647_v19 }
 0x11d   : > { %4894 = vmatpush.msra.mxu3 %v5393_v31 }
 0x11f   : > { %4289 = vmatmul.msk.f32.gmra.mxu0 %vm894_vm2, %v8427_v40  ;;  %4895 = vmatpush.msra.mxu3 %v5407_v34  ;;  %v1231_v31 = vpop.permute.xlu2 %1230 }
 0x120   : > { %vm1275_vm5 = vcmp.eq.s32.totalorder %v5611_v3, %v1231_v31  ;;  %vm1276_vm12 = vcmp.eq.s32.totalorder %v5622_v15, %v1231_v31 }
 0x121   : > { %v649_v58 = vpop.f32.mrf.mxu2  ;;  %4896 = vmatpush.msra.mxu3 %v5420_v36  ;;  %4358 = vmatmul.msk.f32.gmra.mxu2 %vm1275_vm5, %v8427_v40 }
 0x122   : > { %v650_v28 = vadd.f32 %v649_v58, %v584_v62 }
 0x123   : > { %v587_v14 = vpop.f32.mrf.mxu1  ;;  %4897 = vmatpush.msra.mxu3 %v5439_v39  ;;  %v5968_v39 = vpop.f32.mrf.mxu0 }
 0x124   : > { %4230 = vmatmul.msk.f32.gmra.mxu3 %vm284_vm0, %v650_v28  ;;  %8505 = vst [vmem:[#allocation21_spill] sm:$0xff] %v5968_v39 }
 0x125   : > { %4898 = vmatpush.msra.mxu3 %v5452_v42  ;;  %v1234_v42 = vpop.permute.xlu1 %1233 }
 0x126   : > { %vm1277_vm7 = vcmp.eq.s32.totalorder %v5611_v3, %v1234_v42  ;;  %vm1278_vm14 = vcmp.eq.s32.totalorder %v5622_v15, %v1234_v42 }
 0x127   : > { %4290 = vmatmul.msk.f32.gmra.mxu0 %vm896_vm4, %v8427_v40  ;;  %4899 = vmatpush.msra.mxu3 %v5466_v45 }
 0x129   : > { %v652_v34 = vpop.f32.mrf.mxu2  ;;  %4900 = vmatpush.msra.mxu3 %v5480_v47  ;;  %4359 = vmatmul.msk.f32.gmra.mxu2 %vm1277_vm7, %v8427_v40 }
 0x12a   : > { %v653_v36 = vadd.f32 %v652_v34, %v587_v14 }
 0x12b   : > { %v590_v32 = vpop.f32.mrf.mxu1  ;;  %4901 = vmatpush.msra.mxu3 %v5493_v49 }
 0x12c   : > { %4231 = vmatmul.msk.f32.gmra.mxu3 %vm284_vm0, %v653_v36 }
 0x12d   : > { %4902 = vmatpush.msra.mxu3 %v5506_v51  ;;  %v5167_v51 = vmov 3  }
 0x12e   : > { %4982 = vset.pattern.permute.xlu2 %v5167_v51  ;;  %4983 = vset.pattern.permute.xlu0 %v5167_v51 }
 0x12f   : > { %4291 = vmatmul.msk.f32.gmra.mxu0 %vm898_vm6, %v8427_v40  ;;  %4903 = vmatpush.msra.mxu3 %v5520_v54  ;;  %v1237_v54 = vpop.permute.xlu2 %1236 }
 0x130   : > { %1627 = vperm.xlu2 %4982, %v5279_v5   ;;  %1630 = vperm.xlu0 %4983, %v5292_v9   ;;  %vm1279_vm9 = vcmp.eq.s32.totalorder %v5611_v3, %v1237_v54  ;;  %vm1280_vm1 = vcmp.eq.s32.totalorder %v5622_v15, %v1237_v54 }
 0x131   : > { %v655_v45 = vpop.f32.mrf.mxu2  ;;  %4904 = vmatpush.msra.mxu3 %v5534_v56  ;;  %4984 = vset.pattern.permute.xlu1 %v5167_v51 }
 0x132   : > { %v656_v47 = vadd.f32 %v655_v45, %v590_v32  ;;  %1633 = vperm.xlu1 %4984, %v5276_v4   ;;  %4360 = vmatmul.msk.f32.gmra.mxu2 %vm1279_vm9, %v8427_v40  ;;  %v1240_v4 = vpop.permute.xlu0 %1239 }
 0x133   : > { %v593_v49 = vpop.f32.mrf.mxu1  ;;  %4905 = vmatpush.msra.mxu3 %v5572_v61  ;;  %vm1281_vm11 = vcmp.eq.s32.totalorder %v5611_v3, %v1240_v4  ;;  %vm1282_vm3 = vcmp.eq.s32.totalorder %v5622_v15, %v1240_v4 }
 0x134   : > { %4232 = vmatmul.msk.f32.gmra.mxu3 %vm284_vm0, %v656_v47  ;;  %v5982_v41 = vpop.f32.mrf.mxu0 }
 0x137   : > { %4372 = vmatmul.msk.f32.vlgmr.msra.gmra.mxu0 %vm1272_vm8, %v8427_v40 }
 0x138   : > { %1962 = vmatpush.msra.mxu0 %v5835_v63  ;;  %1636 = vperm.xlu2 %4982, %v5289_v8  }
 0x139   : > { %v658_v56 = vpop.f32.mrf.mxu2  ;;  %1645 = vperm.xlu0 %4983, %v5306_v13  }
 0x13a   : > { %v659_v61 = vadd.f32 %v658_v56, %v593_v49  ;;  %1963 = vmatpush.msra.mxu0 %v5844_v7  ;;  %1639 = vperm.xlu1 %4984, %v5284_v6   ;;  %v1243_v6 = vpop.permute.xlu1 %1242  ;;  %v1249_v14 = vpop.permute.xlu0 %1248 }
 0x13b   : > { %v596_v5 = vpop.f32.mrf.mxu1  ;;  %4361 = vmatmul.msk.f32.gmra.mxu2 %vm1281_vm11, %v8427_v40  ;;  %vm1283_vm13 = vcmp.eq.s32.totalorder %v5611_v3, %v1243_v6  ;;  %vm1287_vm2 = vcmp.eq.s32.totalorder %v5611_v3, %v1249_v14  ;;  %vm1284_vm5 = vcmp.eq.s32.totalorder %v5622_v15, %v1243_v6  ;;  %vm1288_vm9 = vcmp.eq.s32.totalorder %v5622_v15, %v1249_v14 }
 0x13c   : > { %4233 = vmatmul.msk.f32.gmra.mxu3 %vm284_vm0, %v659_v61  ;;  %v5995_v9 = vpop.f32.mrf.mxu0 }
 0x13f   : > { %4373 = vmatmul.msk.f32.gmra.mxu0 %vm1274_vm10, %v8427_v40 }
 0x140   : > { %1642 = vperm.xlu2 %4982, %v5296_v10   ;;  %v6019_v10 = vld [vmem:[%s5273_s17 + $0x40] sm:$0xff] }
 0x141   : > { %v661_v46 = vpop.f32.mrf.mxu2  ;;  %1654 = vperm.xlu0 %4983, %v5320_v17  }
 0x142   : > { %v662_v48 = vadd.f32 %v661_v46, %v596_v5  ;;  %1648 = vperm.xlu1 %4984, %v5303_v12   ;;  %v1246_v12 = vpop.permute.xlu2 %1245  ;;  %v1252_v32 = vpop.permute.xlu1 %1251 }
 0x143   : > { %v599_v50 = vpop.f32.mrf.mxu1  ;;  %4362 = vmatmul.msk.f32.gmra.mxu2 %vm1283_vm13, %v8427_v40  ;;  %vm1285_vm15 = vcmp.eq.s32.totalorder %v5611_v3, %v1246_v12  ;;  %vm1289_vm4 = vcmp.eq.s32.totalorder %v5611_v3, %v1252_v32  ;;  %vm1286_vm7 = vcmp.eq.s32.totalorder %v5622_v15, %v1246_v12  ;;  %v1258_v56 = vpop.permute.xlu0 %1257  ;;  %vm1290_vm11 = vcmp.eq.s32.totalorder %v5622_v15, %v1252_v32 }
 0x144   : > { %4234 = vmatmul.msk.f32.gmra.mxu3 %vm284_vm0, %v662_v48  ;;  %v6005_v57 = vpop.f32.mrf.mxu0  ;;  %vm1293_vm8 = vcmp.eq.s32.totalorder %v5611_v3, %v1258_v56 }
 0x147   : > { %4374 = vmatmul.msk.f32.gmra.mxu0 %vm1276_vm12, %v8427_v40 }
 0x148   : > { %1651 = vperm.xlu2 %4982, %v6019_v10  }
 0x149   : > { %v664_v8 = vpop.f32.mrf.mxu2  ;;  %1663 = vperm.xlu0 %4983, %v5368_v27   ;;  %v6032_v27 = vld [vmem:[%s5273_s17 + $0x58] sm:$0xff] }
 0x14a   : > { %v665_v13 = vadd.f32 %v664_v8, %v599_v50  ;;  %1657 = vperm.xlu1 %4984, %v5317_v16   ;;  %v1255_v47 = vpop.permute.xlu2 %1254  ;;  %v1261_v48 = vpop.permute.xlu1 %1260 }
 0x14b   : > { %v602_v19 = vpop.f32.mrf.mxu1  ;;  %4363 = vmatmul.msk.f32.gmra.mxu2 %vm1285_vm15, %v8427_v40  ;;  %vm1291_vm6 = vcmp.eq.s32.totalorder %v5611_v3, %v1255_v47  ;;  %vm1295_vm10 = vcmp.eq.s32.totalorder %v5611_v3, %v1261_v48  ;;  %vm1292_vm13 = vcmp.eq.s32.totalorder %v5622_v15, %v1255_v47  ;;  %vm1294_vm15 = vcmp.eq.s32.totalorder %v5622_v15, %v1258_v56  ;;  %v6115_v47 = vld [vmem:[%s8421_s1 + $0x68] sm:$0xff] }
 0x14c   : > { %4235 = vmatmul.msk.f32.gmra.mxu3 %vm284_vm0, %v665_v13  ;;  %v6015_v62 = vpop.f32.mrf.mxu0  ;;  %8509 = vst [vmem:[#allocation25_spill] sm:$0xff] %v6115_v47  ;;  %v6151_v56 = vld [vmem:[%s8421_s1 + $0x48] sm:$0xff] }
 0x14d   : > { %8515 = vst [vmem:[#allocation31_spill] sm:$0xff] %v6151_v56 }
 0x14f   : > { %4375 = vmatmul.msk.f32.gmra.mxu0 %vm1278_vm14, %v8427_v40 }
 0x150   : > { %1660 = vperm.xlu2 %4982, %v6032_v27  }
 0x151   : > { %v667_v17 = vpop.f32.mrf.mxu2  ;;  %1672 = vperm.xlu0 %4983, %v5424_v37  }
 0x152   : > { %v668_v59 = vadd.f32 %v667_v17, %v602_v19  ;;  %1666 = vperm.xlu1 %4984, %v5365_v26   ;;  %v1264_v13 = vpop.permute.xlu2 %1263 }
 0x153   : > { %v605_v58 = vpop.f32.mrf.mxu1  ;;  %4364 = vmatmul.msk.f32.gmra.mxu2 %vm1287_vm2, %v8427_v40  ;;  %vm1297_vm12 = vcmp.eq.s32.totalorder %v5611_v3, %v1264_v13  ;;  %vm869_vm2 = vcmp.eq.s32.totalorder %v5622_v15, %v5707_v2 }
 0x154   : > { %4236 = vmatmul.msk.f32.gmra.mxu3 %vm284_vm0, %v668_v59  ;;  %v6028_v28 = vpop.f32.mrf.mxu0 }
 0x157   : > { %4376 = vmatmul.msk.f32.gmra.mxu0 %vm1280_vm1, %v8427_v40 }
 0x158   : > { %1669 = vperm.xlu2 %4982, %v5385_v30  }
 0x159   : > { %v670_v16 = vpop.f32.mrf.mxu2 }
 0x15a   : > { %v671_v31 = vadd.f32 %v670_v16, %v605_v58  ;;  %v1267_v58 = vpop.permute.xlu0 %1266 }
 0x15b   : > { %v608_v34 = vpop.f32.mrf.mxu1  ;;  %4365 = vmatmul.msk.f32.gmra.mxu2 %vm1289_vm4, %v8427_v40  ;;  %vm1299_vm14 = vcmp.eq.s32.totalorder %v5611_v3, %v1267_v58  ;;  %vm871_vm4 = vcmp.eq.s32.totalorder %v5622_v15, %v5721_v11 }
 0x15c   : > { %4237 = vmatmul.msk.f32.gmra.mxu3 %vm284_vm0, %v671_v31  ;;  %v6041_v36 = vpop.f32.mrf.mxu0 }
 0x15f   : > { %4377 = vmatmul.msk.f32.gmra.mxu0 %vm1282_vm3, %v8427_v40  ;;  %vm1296_vm3 = vcmp.eq.s32.totalorder %v5622_v15, %v1261_v48  ;;  %v6178_v48 = vld [vmem:[%s8421_s1 + $0x30] sm:$0xff] }
 0x160   : > { %8520 = vst [vmem:[#allocation36_spill] sm:$0xff] %v6178_v48 }
 0x161   : > { %v673_v37 = vpop.f32.mrf.mxu2 }
 0x162   : > { %v674_v26 = vadd.f32 %v673_v37, %v608_v34  ;;  %v6096_v37 = vld [vmem:[%s8421_s1 + $0x78] sm:$0xff] }
 0x163   : > { %v611_v42 = vpop.f32.mrf.mxu1  ;;  %4366 = vmatmul.msk.f32.gmra.mxu2 %vm1291_vm6, %v8427_v40  ;;  %8506 = vst [vmem:[#allocation22_spill] sm:$0xff] %v6096_v37  ;;  %vm873_vm6 = vcmp.eq.s32.totalorder %v5622_v15, %v5740_v18 }
 0x164   : > { %4238 = vmatmul.msk.f32.gmra.mxu3 %vm284_vm0, %v674_v26  ;;  %v6049_v45 = vpop.f32.mrf.mxu0 }
 0x167   : > { %4378 = vmatmul.msk.f32.gmra.mxu0 %vm1284_vm5, %v8427_v40  ;;  %vm1298_vm5 = vcmp.eq.s32.totalorder %v5622_v15, %v1264_v13  ;;  %v6195_v13 = vld [vmem:[%s8421_s1 + $0x20] sm:$0xff] }
 0x168   : > { %8523 = vst [vmem:[#allocation39_spill] sm:$0xff] %v6195_v13 }
 0x169   : > { %v676_v30 = vpop.f32.mrf.mxu2 }
 0x16a   : > { %v677_v49 = vadd.f32 %v676_v30, %v611_v42  ;;  %v6108_v42 = vld [vmem:[%s8421_s1 + $0x70] sm:$0xff]  ;;  %v6125_v30 = vld [vmem:[%s8421_s1 + $0x60] sm:$0xff] }
 0x16b   : > { %v614_v51 = vpop.f32.mrf.mxu1  ;;  %4367 = vmatmul.msk.f32.gmra.mxu2 %vm1293_vm8, %v8427_v40  ;;  %8508 = vst [vmem:[#allocation24_spill] sm:$0xff] %v6108_v42  ;;  %vm875_vm8 = vcmp.eq.s32.totalorder %v5622_v15, %v5759_v52 }
 0x16c   : > { %4239 = vmatmul.msk.f32.gmra.mxu3 %vm284_vm0, %v677_v49  ;;  %v6056_v54 = vpop.f32.mrf.mxu0  ;;  %8511 = vst [vmem:[#allocation27_spill] sm:$0xff] %v6125_v30 }
 0x16f   : > { %4379 = vmatmul.msk.f32.gmra.mxu0 %vm1286_vm7, %v8427_v40  ;;  %vm1300_vm7 = vcmp.eq.s32.totalorder %v5622_v15, %v1267_v58  ;;  %v6216_v58 = vld [vmem:[%s8421_s1 + $0x10] sm:$0xff] }
 0x170   : > { %8526 = vst [vmem:[#allocation42_spill] sm:$0xff] %v6216_v58 }
 0x171   : > { %v679_v61 = vpop.f32.mrf.mxu2 }
 0x172   : > { %v680_v5 = vadd.f32 %v679_v61, %v614_v51  ;;  %v6145_v51 = vld [vmem:[%s8421_s1 + $0x50] sm:$0xff]  ;;  %v6160_v61 = vld [vmem:[%s8421_s1 + $0x40] sm:$0xff] }
 0x173   : > { %v617_v46 = vpop.f32.mrf.mxu1  ;;  %4368 = vmatmul.msk.f32.gmra.mxu2 %vm1295_vm10, %v8427_v40  ;;  %8514 = vst [vmem:[#allocation30_spill] sm:$0xff] %v6145_v51  ;;  %vm877_vm10 = vcmp.eq.s32.totalorder %v5622_v15, %v5776_v0 }
 0x174   : > { %4240 = vmatmul.msk.f32.gmra.mxu3 %vm284_vm0, %v680_v5  ;;  %v6063_v4 = vpop.f32.mrf.mxu0  ;;  %8517 = vst [vmem:[#allocation33_spill] sm:$0xff] %v6160_v61  ;;  %v6166_v5 = vld [vmem:[%s8421_s1 + $0x38] sm:$0xff] }
 0x175   : > { %8518 = vst [vmem:[#allocation34_spill] sm:$0xff] %v6166_v5 }
 0x177   : > { %4380 = vmatmul.msk.f32.gmra.mxu0 %vm1288_vm9, %v8427_v40 }
 0x179   : > { %v682_v50 = vpop.f32.mrf.mxu2 }
 0x17a   : > { %v683_v6 = vadd.f32 %v682_v50, %v617_v46 }
 0x17b   : > { %v620_v19 = vpop.f32.mrf.mxu1  ;;  %4369 = vmatmul.msk.f32.gmra.mxu2 %vm1297_vm12, %v8427_v40  ;;  %vm879_vm12 = vcmp.eq.s32.totalorder %v5622_v15, %v5790_v1 }
 0x17c   : > { %4241 = vmatmul.msk.f32.gmra.mxu3 %vm284_vm0, %v683_v6  ;;  %v6070_v8 = vpop.f32.mrf.mxu0  ;;  %v6186_v6 = vld [vmem:[%s8421_s1 + $0x28] sm:$0xff] }
 0x17d   : > { %8521 = vst [vmem:[#allocation37_spill] sm:$0xff] %v6186_v6 }
 0x17f   : > { %4381 = vmatmul.msk.f32.gmra.mxu0 %vm1290_vm11, %v8427_v40 }
 0x181   : > { %v685_v12 = vpop.f32.mrf.mxu2 }
 0x182   : > { %v686_v17 = vadd.f32 %v685_v12, %v620_v19  ;;  %v6198_v19 = vpop.permute.xlu1 %1269  ;;  %v6203_v12 = vld [vmem:[%s8421_s1 + $0x18] sm:$0xff] }
 0x183   : > { %v623_v14 = vpop.f32.mrf.mxu1  ;;  %4370 = vmatmul.msk.f32.gmra.mxu2 %vm1299_vm14, %v8427_v40  ;;  %8524 = vst [vmem:[#allocation40_spill] sm:$0xff] %v6203_v12  ;;  %vm1302_vm9 = vcmp.eq.s32.totalorder %v5622_v15, %v6198_v19  ;;  %vm883_vm14 = vcmp.eq.s32.totalorder %v5622_v15, %v5819_v21 }
 0x184   : > { %4242 = vmatmul.msk.f32.gmra.mxu3 %vm284_vm0, %v686_v17  ;;  %v6077_v59 = vpop.f32.mrf.mxu0 }
 0x187   : > { %4382 = vmatmul.msk.f32.gmra.mxu0 %vm1292_vm13, %v8427_v40  ;;  %vm881_vm13 = vcmp.eq.s32.totalorder %v5622_v15, %v5806_v33 }
 0x189   : > { %v688_v16 = vpop.f32.mrf.mxu2 }
 0x18a   : > { %v689_v31 = vadd.f32 %v688_v16, %v623_v14  ;;  %v6088_v32 = vpop.permute.xlu2 %1627  ;;  %v6222_v14 = vld [vmem:[%s8421_s1 + $0x8] sm:$0xff] }
 0x18b   : > { %vm1675_vm1 = vcmp.eq.s32.totalorder %v5622_v15, %v6088_v32  ;;  %8527 = vst [vmem:[#allocation43_spill] sm:$0xff] %v6222_v14  ;;  %vm1674_vm11 = vcmp.eq.s32.totalorder %v5611_v3, %v6088_v32 }
 0x18c   : > { %4243 = vmatmul.msk.f32.gmra.mxu3 %vm284_vm0, %v689_v31  ;;  %v6084_v34 = vpop.f32.mrf.mxu0  ;;  %4452 = vmatmul.msk.f32.vlgmr.msra.gmra.mxu2 %vm1675_vm1, %v8427_v40  ;;  %v6233_v31 = vld [vmem:[%s8421_s1] sm:$0xff]  ;;  %vm887_vm1 = vcmp.eq.s32.totalorder %v5622_v15, %v5863_v20 }
 0x18d   : > { %2979 = vmatpush.msra.mxu2 %v6096_v37  ;;  %8529 = vst [vmem:[#allocation45_spill] sm:$0xff] %v6233_v31 }
 0x18f   : > { %4383 = vmatmul.msk.f32.gmra.mxu0 %vm1294_vm15, %v8427_v40  ;;  %2980 = vmatpush.msra.mxu2 %v6108_v42  ;;  %vm885_vm15 = vcmp.eq.s32.totalorder %v5622_v15, %v5837_v60 }
 0x191   : > { %2981 = vmatpush.msra.mxu2 %v6115_v47 }
 0x193   : > { %2982 = vmatpush.msra.mxu2 %v6125_v30 }
 0x194   : > { %v6101_v26 = vpop.f32.mrf.mxu0  ;;  %4292 = vmatmul.msk.f32.vlgmr.msrb.gmra.mxu3 %vm869_vm2, %v8427_v40  ;;  %vm889_vm2 = vcmp.eq.s32.totalorder %v5622_v15, %v5881_v23 }
 0x195   : > { %8507 = vst [vmem:[#allocation23_spill] sm:$0xff] %v6101_v26  ;;  %1559 = vmatpush.msrb.mxu3 %v5835_v63  ;;  %v6131_v63 = vld [vmem:[%s8421_s1 + $0x58] sm:$0xff]  ;;  %v8547_v26 = vmov 1.0  }
 0x196   : > { %8512 = vst [vmem:[#allocation28_spill] sm:$0xff] %v6131_v63  ;;  %2983 = vmatpush.msra.mxu2 %v6131_v63 }
 0x197   : > { %v6118_v2 = vpop.f32.mrf.mxu3  ;;  %4384 = vmatmul.msk.f32.gmra.mxu0 %vm1296_vm3, %v8427_v40  ;;  %1560 = vmatpush.msrb.mxu3 %v5844_v7  ;;  %v6140_v7 = vpop.f32.mrf.mxu2  ;;  %vm891_vm3 = vcmp.eq.s32.totalorder %v5622_v15, %v5901_v29 }
 0x198   : > { %8510 = vst [vmem:[#allocation26_spill] sm:$0xff] %v6118_v2  ;;  %2984 = vmatpush.msra.mxu2 %v6145_v51 }
 0x19a   : > { %2985 = vmatpush.msra.mxu2 %v6151_v56 }
 0x19c   : > { %v6136_v49 = vpop.f32.mrf.mxu0  ;;  %4293 = vmatmul.msk.f32.gmra.mxu3 %vm871_vm4, %v8427_v40  ;;  %2986 = vmatpush.msra.mxu2 %v6160_v61  ;;  %vm893_vm4 = vcmp.eq.s32.totalorder %v5622_v15, %v5918_v44 }
 0x19d   : > { %8513 = vst [vmem:[#allocation29_spill] sm:$0xff] %v6136_v49 }
 0x19e   : > { %2987 = vmatpush.msra.mxu2 %v6166_v5 }
 0x19f   : > { %v6154_v11 = vpop.f32.mrf.mxu3  ;;  %4385 = vmatmul.msk.f32.gmra.mxu0 %vm1298_vm5, %v8427_v40  ;;  %v6181_v50 = vpop.f32.mrf.mxu2  ;;  %vm895_vm5 = vcmp.eq.s32.totalorder %v5622_v15, %v5910_v38 }
 0x1a0   : > { %8516 = vst [vmem:[#allocation32_spill] sm:$0xff] %v6154_v11  ;;  %2988 = vmatpush.msra.mxu2 %v6178_v48 }
 0x1a2   : > { %2989 = vmatpush.msra.mxu2 %v6186_v6  ;;  %v6348_v38 = vpop.permute.xlu0 %1630 }
 0x1a3   : > { %8541 = vst [vmem:[#allocation57_spill] sm:$0xff] %v6348_v38 }
 0x1a4   : > { %v6171_v46 = vpop.f32.mrf.mxu0  ;;  %4294 = vmatmul.msk.f32.gmra.mxu3 %vm873_vm6, %v8427_v40  ;;  %2990 = vmatpush.msra.mxu2 %v6195_v13  ;;  %vm897_vm6 = vcmp.eq.s32.totalorder %v5622_v15, %v5937_v55 }
 0x1a5   : > { %8519 = vst [vmem:[#allocation35_spill] sm:$0xff] %v6171_v46  ;;  %v5168_v46 = vmov 4  }
 0x1a6   : > { %2991 = vmatpush.msra.mxu2 %v6203_v12  ;;  %4985 = vset.pattern.permute.xlu1 %v5168_v46 }
 0x1a7   : > { %v6189_v18 = vpop.f32.mrf.mxu3  ;;  %4386 = vmatmul.msk.f32.gmra.mxu0 %vm1300_vm7, %v8427_v40  ;;  %v6228_v16 = vpop.f32.mrf.mxu2  ;;  %vm1677_vm7 = vcmp.eq.s32.totalorder %v5622_v15, %v6348_v38  ;;  %4987 = vset.pattern.permute.xlu0 %v5168_v46  ;;  %v6365_v38 = vld [vmem:[%s5273_s17 + $0x10] sm:$0xff] }
 0x1a8   : > { %8522 = vst [vmem:[#allocation38_spill] sm:$0xff] %v6189_v18  ;;  %2992 = vmatpush.msra.mxu2 %v6216_v58  ;;  %2036 = vperm.xlu0 %4987, %v6365_v38  }
 0x1a9   : > { %4453 = vmatmul.msk.f32.gmra.mxu2 %vm1677_vm7, %v8427_v40  ;;  %8543 = vst [vmem:[#allocation59_spill] sm:$0xff] %v6365_v38  ;;  %4986 = vset.pattern.permute.xlu2 %v5168_v46 }
 0x1aa   : > { %2993 = vmatpush.msra.mxu2 %v6222_v14 }
 0x1ac   : > { %v6208_v17 = vpop.f32.mrf.mxu0  ;;  %4295 = vmatmul.msk.f32.gmra.mxu3 %vm875_vm8, %v8427_v40  ;;  %2994 = vmatpush.msra.mxu2 %v6233_v31  ;;  %vm899_vm8 = vcmp.eq.s32.totalorder %v5622_v15, %v5950_v22  ;;  %v6370_v22 = vpop.permute.xlu1 %1633 }
 0x1ad   : > { %8525 = vst [vmem:[#allocation41_spill] sm:$0xff] %v6208_v17 }
 0x1ae   : > { %8545 = vst [vmem:[#allocation61_spill] sm:$0xff] %v6370_v22 }
 0x1af   : > { %v6225_v52 = vpop.f32.mrf.mxu3  ;;  %4387 = vmatmul.msk.f32.gmra.mxu0 %vm1302_vm9, %v8427_v40  ;;  %v6247_v35 = vpop.f32.mrf.mxu2  ;;  %vm1679_vm9 = vcmp.eq.s32.totalorder %v5622_v15, %v6370_v22 }
 0x1b0   : > { %8528 = vst [vmem:[#allocation44_spill] sm:$0xff] %v6225_v52 }
 0x1b1   : > { %4454 = vmatmul.msk.f32.gmra.mxu2 %vm1679_vm9, %v8547_v26 }
 0x1b4   : > { %4296 = vmatmul.msk.f32.gmra.mxu3 %vm877_vm10, %v8427_v40  ;;  %v6241_v24 = vpop.f32.mrf.mxu0  ;;  %vm1301_vm10 = vcmp.eq.s32.totalorder %v5611_v3, %v6198_v19 }
 0x1b5   : > { %v1450_v19 = vadd.f32 %v6241_v24, %v6140_v7  ;;  %v6414_v24 = vld [vmem:[%s8421_s1 + $0xf8] sm:$0xff] }
 0x1b7   : > { %v6243_v53 = vpop.f32.mrf.mxu3  ;;  %4436 = vmatmul.msk.f32.vlgmr.msrb.gmra.mxu0 %vm1674_vm11, %v8427_v40  ;;  %v6266_v25 = vpop.f32.mrf.mxu2 }
 0x1b8   : > { %8530 = vst [vmem:[#allocation46_spill] sm:$0xff] %v6243_v53  ;;  %2576 = vmatpush.msrb.mxu0 %v6096_v37 }
 0x1ba   : > { %2577 = vmatpush.msrb.mxu0 %v6108_v42 }
 0x1bc   : > { %4297 = vmatmul.msk.f32.gmra.mxu3 %vm879_vm12, %v8427_v40  ;;  %v6253_v0 = vpop.f32.mrf.mxu0  ;;  %2578 = vmatpush.msrb.mxu0 %v6115_v47 }
 0x1be   : > { %2579 = vmatpush.msrb.mxu0 %v6125_v30 }
 0x1bf   : > { %v6257_v32 = vpop.f32.mrf.mxu3 }
 0x1c0   : > { %8531 = vst [vmem:[#allocation47_spill] sm:$0xff] %v6257_v32  ;;  %2580 = vmatpush.msrb.mxu0 %v6131_v63  ;;  %v6280_v32 = vpop.f32.mrf.mxu2 }
 0x1c2   : > { %2581 = vmatpush.msrb.mxu0 %v6145_v51 }
 0x1c4   : > { %4298 = vmatmul.msk.f32.gmra.mxu3 %vm881_vm13, %v8427_v40  ;;  %v6264_v1 = vpop.f32.mrf.mxu0  ;;  %2582 = vmatpush.msrb.mxu0 %v6151_v56 }
 0x1c6   : > { %2583 = vmatpush.msrb.mxu0 %v6160_v61 }
 0x1c7   : > { %v6270_v43 = vpop.f32.mrf.mxu3 }
 0x1c8   : > { %8532 = vst [vmem:[#allocation48_spill] sm:$0xff] %v6270_v43  ;;  %2584 = vmatpush.msrb.mxu0 %v6166_v5  ;;  %v6296_v52 = vpop.f32.mrf.mxu2 }
 0x1ca   : > { %2585 = vmatpush.msrb.mxu0 %v6178_v48 }
 0x1cc   : > { %4299 = vmatmul.msk.f32.gmra.mxu3 %vm883_vm14, %v8427_v40  ;;  %v6277_v33 = vpop.f32.mrf.mxu0  ;;  %2586 = vmatpush.msrb.mxu0 %v6186_v6 }
 0x1ce   : > { %2587 = vmatpush.msrb.mxu0 %v6195_v13 }
 0x1cf   : > { %v6283_v53 = vpop.f32.mrf.mxu3 }
 0x1d0   : > { %8533 = vst [vmem:[#allocation49_spill] sm:$0xff] %v6283_v53  ;;  %2588 = vmatpush.msrb.mxu0 %v6203_v12  ;;  %v6305_v18 = vpop.f32.mrf.mxu2 }
 0x1d2   : > { %2589 = vmatpush.msrb.mxu0 %v6216_v58 }
 0x1d4   : > { %4300 = vmatmul.msk.f32.gmra.mxu3 %vm885_vm15, %v8427_v40  ;;  %v6290_v21 = vpop.f32.mrf.mxu0  ;;  %2590 = vmatpush.msrb.mxu0 %v6222_v14 }
 0x1d6   : > { %2591 = vmatpush.msrb.mxu0 %v6233_v31 }
 0x1d7   : > { %v6294_v43 = vpop.f32.mrf.mxu3 }
 0x1d8   : > { %8534 = vst [vmem:[#allocation50_spill] sm:$0xff] %v6294_v43  ;;  %v6319_v2 = vpop.f32.mrf.mxu2 }
 0x1dc   : > { %4301 = vmatmul.msk.f32.gmra.mxu3 %vm887_vm1, %v8427_v40  ;;  %v6301_v53 = vpop.f32.mrf.mxu0 }
 0x1df   : > { %v6303_v60 = vpop.f32.mrf.mxu3 }
 0x1e0   : > { %8535 = vst [vmem:[#allocation51_spill] sm:$0xff] %v6303_v60  ;;  %v6328_v39 = vpop.f32.mrf.mxu2 }
 0x1e4   : > { %4302 = vmatmul.msk.f32.gmra.mxu3 %vm889_vm2, %v8427_v40  ;;  %v6310_v11 = vpop.f32.mrf.mxu0 }
 0x1e7   : > { %v6312_v43 = vpop.f32.mrf.mxu3 }
 0x1e8   : > { %8536 = vst [vmem:[#allocation52_spill] sm:$0xff] %v6312_v43 }
 0x1ec   : > { %4303 = vmatmul.msk.f32.gmra.mxu3 %vm891_vm3, %v8427_v40  ;;  %v6317_v20 = vpop.f32.mrf.mxu0 }
 0x1ef   : > { %v6321_v60 = vpop.f32.mrf.mxu3 }
 0x1f0   : > { %8537 = vst [vmem:[#allocation53_spill] sm:$0xff] %v6321_v60  ;;  %v6339_v60 = vpop.f32.mrf.mxu2 }
 0x1f4   : > { %4304 = vmatmul.msk.f32.gmra.mxu3 %vm893_vm4, %v8427_v40  ;;  %v6326_v23 = vpop.f32.mrf.mxu0 }
 0x1f7   : > { %v6330_v43 = vpop.f32.mrf.mxu3 }
 0x1f8   : > { %8538 = vst [vmem:[#allocation54_spill] sm:$0xff] %v6330_v43 }
 0x1fc   : > { %4305 = vmatmul.msk.f32.gmra.mxu3 %vm895_vm5, %v8427_v40  ;;  %v6335_v29 = vpop.f32.mrf.mxu0 }
 0x1ff   : > { %v6337_v17 = vpop.f32.mrf.mxu3 }
 0x200   : > { %8539 = vst [vmem:[#allocation55_spill] sm:$0xff] %v6337_v17  ;;  %v6352_v17 = vpop.f32.mrf.mxu2 }
 0x204   : > { %4306 = vmatmul.msk.f32.gmra.mxu3 %vm897_vm6, %v8427_v40  ;;  %v6344_v44 = vpop.f32.mrf.mxu0 }
 0x207   : > { %v6346_v43 = vpop.f32.mrf.mxu3 }
 0x208   : > { %8540 = vst [vmem:[#allocation56_spill] sm:$0xff] %v6346_v43  ;;  %v6361_v43 = vld [vmem:[%s5273_s17] sm:$0xff]  ;;  %v6384_v46 = vpop.f32.mrf.mxu2 }
 0x209   : > { %8542 = vst [vmem:[#allocation58_spill] sm:$0xff] %v6361_v43  ;;  %2030 = vperm.xlu1 %4985, %v6361_v43   ;;  %v6399_v43 = vpop.permute.xlu2 %1636 }
 0x20a   : > { %8549 = vst [vmem:[#allocation64_spill] sm:$0xff] %v6399_v43  ;;  %vm1681_vm11 = vcmp.eq.s32.totalorder %v5622_v15, %v6399_v43  ;;  %v6447_v43 = vpop.permute.xlu1 %1639 }
 0x20b   : > { %4455 = vmatmul.msk.f32.gmra.mxu2 %vm1681_vm11, %v8547_v26  ;;  %8550 = vst [vmem:[#allocation65_spill] sm:$0xff] %v6447_v43  ;;  %vm1683_vm12 = vcmp.eq.s32.totalorder %v5622_v15, %v6447_v43 }
 0x20c   : > { %4307 = vmatmul.msk.f32.gmra.mxu3 %vm899_vm8, %v8427_v40  ;;  %v6358_v55 = vpop.f32.mrf.mxu0  ;;  %v6373_v40 = vld [vmem:[%s5273_s17 + $0x8] sm:$0xff] }
 0x20d   : > { %8546 = vst [vmem:[#allocation62_spill] sm:$0xff] %v6373_v40  ;;  %2033 = vperm.xlu2 %4986, %v6373_v40   ;;  %v6392_v40 = vld [vmem:[%s5273_s17 + $0x38] sm:$0xff] }
 0x20e   : > { %8548 = vst [vmem:[#allocation63_spill] sm:$0xff] %v6392_v40  ;;  %2051 = vperm.xlu0 %4987, %v6392_v40   ;;  %v6450_v40 = vld [vmem:[%s5273_s17 + $0x30] sm:$0xff] }
 0x20f   : > { %v6368_v49 = vpop.f32.mrf.mxu3 }
 0x210   : > { %8544 = vst [vmem:[#allocation60_spill] sm:$0xff] %v6368_v49  ;;  %v6388_v49 = vld [vmem:[%s5273_s17 + $0x18] sm:$0xff]  ;;  %v6427_v7 = vpop.f32.mrf.mxu2 }
 0x211   : > { %2039 = vperm.xlu1 %4985, %v6388_v49   ;;  %v6498_v43 = vpop.permute.xlu2 %1642 }
 0x212   : > { %8552 = vst [vmem:[#allocation67_spill] sm:$0xff] %v6498_v43  ;;  %vm1685_vm13 = vcmp.eq.s32.totalorder %v5622_v15, %v6498_v43  ;;  %v6592_v43 = vld [vmem:[%s5273_s17 + $0x78] sm:$0xff] }
 0x213   : > { %4456 = vmatmul.msk.f32.gmra.mxu2 %vm1683_vm12, %v8547_v26 }
 0x214   : > { %4371 = vmatmul.msk.f32.vlgmr.msra.gmra.mxu3 %vm1301_vm10, %v8547_v26  ;;  %v6382_v38 = vpop.f32.mrf.mxu0 }
 0x215   : > { %2173 = vmatpush.msra.mxu3 %v6096_v37  ;;  %v6402_v37 = vld [vmem:[%s5273_s17 + $0x20] sm:$0xff] }
 0x216   : > { %2042 = vperm.xlu2 %4986, %v6402_v37  }
 0x217   : > { %v1046_v22 = vpop.f32.mrf.mxu3  ;;  %2174 = vmatpush.msra.mxu3 %v6108_v42 }
 0x218   : > { %v1047_v3 = vadd.f32 %v1046_v22, %v5982_v41  ;;  %v6430_v22 = vld [vmem:[%s5273_s17 + $0x28] sm:$0xff] }
 0x219   : > { %2175 = vmatpush.msra.mxu3 %v6115_v47  ;;  %2045 = vperm.xlu1 %4985, %v6430_v22   ;;  %v1453_v47 = vadd.f32 %v6253_v0, %v6181_v50  ;;  %v6483_v0 = vld [vmem:[%s5273_s17 + $0x68] sm:$0xff] }
 0x21a   : > { %4308 = vmatmul.msk.f32.vlgmr.msrb.gmra.mxu1 %vm284_vm0, %v1047_v3  ;;  %v6424_v3 = vld [vmem:[%s8421_s1 + $0xf0] sm:$0xff]  ;;  %8551 = vst [vmem:[#allocation66_spill] sm:$0xff] %v6483_v0 }
 0x21b   : > { %2176 = vmatpush.msra.mxu3 %v6125_v30  ;;  %2238 = vmatpush.msrb.mxu1 %v6414_v24  ;;  %v6434_v30 = vld [vmem:[%s5273_s17 + $0x50] sm:$0xff] }
 0x21c   : > { %v6417_v41 = vpop.f32.mrf.mxu0  ;;  %4388 = vmatmul.msk.f32.vlgmr.msrb.gmra.mxu3 %vm284_vm0, %v1450_v19  ;;  %2060 = vperm.xlu0 %4987, %v6434_v30  }
 0x21d   : > { %2177 = vmatpush.msra.mxu3 %v6131_v63  ;;  %2239 = vmatpush.msrb.mxu1 %v6424_v3  ;;  %v6441_v63 = vld [vmem:[%s8421_s1 + $0xe8] sm:$0xff] }
 0x21e   : > { %2048 = vperm.xlu2 %4986, %v6450_v40   ;;  %4457 = vmatmul.msk.f32.gmra.mxu2 %vm1685_vm13, %v8547_v26 }
 0x21f   : > { %v1049_v19 = vpop.f32.mrf.mxu3  ;;  %2178 = vmatpush.msra.mxu3 %v6145_v51  ;;  %2240 = vmatpush.msrb.mxu1 %v6441_v63  ;;  %v6459_v51 = vld [vmem:[%s8421_s1 + $0xe0] sm:$0xff] }
 0x220   : > { %v1050_v42 = vadd.f32 %v1049_v19, %v5995_v9  ;;  %v6468_v9 = vld [vmem:[%s8421_s1 + $0xd8] sm:$0xff] }
 0x221   : > { %2179 = vmatpush.msra.mxu3 %v6151_v56  ;;  %2241 = vmatpush.msrb.mxu1 %v6459_v51  ;;  %v6496_v56 = vpop.f32.mrf.mxu2 }
 0x222   : > { %4309 = vmatmul.msk.f32.gmra.mxu1 %vm284_vm0, %v1050_v42  ;;  %v6478_v42 = vld [vmem:[%s8421_s1 + $0xd0] sm:$0xff]  ;;  %2054 = vperm.xlu1 %4985, %v6019_v10  }
 0x223   : > { %2180 = vmatpush.msra.mxu3 %v6160_v61  ;;  %2242 = vmatpush.msrb.mxu1 %v6468_v9 }
 0x224   : > { %v6471_v50 = vpop.f32.mrf.mxu0  ;;  %4389 = vmatmul.msk.f32.gmra.mxu3 %vm284_vm0, %v1453_v47  ;;  %2069 = vperm.xlu0 %4987, %v6483_v0   ;;  %v6490_v47 = vld [vmem:[%s8421_s1 + $0xc8] sm:$0xff] }
 0x225   : > { %2181 = vmatpush.msra.mxu3 %v6166_v5  ;;  %2243 = vmatpush.msrb.mxu1 %v6478_v42  ;;  %v1456_v5 = vadd.f32 %v6264_v1, %v6228_v16  ;;  %v6501_v0 = vld [vmem:[%s5273_s17 + $0x48] sm:$0xff] }
 0x226   : > { %2057 = vperm.xlu2 %4986, %v6501_v0  }
 0x227   : > { %v1052_v19 = vpop.f32.mrf.mxu3  ;;  %2182 = vmatpush.msra.mxu3 %v6178_v48  ;;  %2244 = vmatpush.msrb.mxu1 %v6490_v47  ;;  %v6510_v48 = vld [vmem:[%s8421_s1 + $0xc0] sm:$0xff] }
 0x228   : > { %v1053_v61 = vadd.f32 %v1052_v19, %v6005_v57  ;;  %v6519_v57 = vld [vmem:[%s8421_s1 + $0xb8] sm:$0xff]  ;;  %v6537_v19 = vld [vmem:[%s8421_s1 + $0xa8] sm:$0xff] }
 0x229   : > { %2183 = vmatpush.msra.mxu3 %v6186_v6  ;;  %2245 = vmatpush.msrb.mxu1 %v6510_v48  ;;  %v6546_v6 = vld [vmem:[%s5273_s17 + $0x60] sm:$0xff] }
 0x22a   : > { %4310 = vmatmul.msk.f32.gmra.mxu1 %vm284_vm0, %v1053_v61  ;;  %v6529_v61 = vld [vmem:[%s8421_s1 + $0xb0] sm:$0xff]  ;;  %2063 = vperm.xlu1 %4985, %v6032_v27  }
 0x22b   : > { %2184 = vmatpush.msra.mxu3 %v6195_v13  ;;  %2246 = vmatpush.msrb.mxu1 %v6519_v57  ;;  %v6543_v13 = vpop.permute.xlu0 %1645 }
 0x22c   : > { %v6522_v16 = vpop.f32.mrf.mxu0  ;;  %4390 = vmatmul.msk.f32.gmra.mxu3 %vm284_vm0, %v1456_v5  ;;  %v1459_v5 = vadd.f32 %v6277_v33, %v6247_v35  ;;  %8553 = vst [vmem:[#allocation68_spill] sm:$0xff] %v6543_v13  ;;  %vm1687_vm14 = vcmp.eq.s32.totalorder %v5622_v15, %v6543_v13  ;;  %v1852_v35 = vpop.f32.mrf.mxu2 }
 0x22d   : > { %2185 = vmatpush.msra.mxu3 %v6203_v12  ;;  %2247 = vmatpush.msrb.mxu1 %v6529_v61  ;;  %v6589_v13 = vpop.permute.xlu1 %1648 }
 0x22e   : > { %2066 = vperm.xlu2 %4986, %v6546_v6   ;;  %4458 = vmatmul.msk.f32.gmra.mxu2 %vm1687_vm14, %v8547_v26  ;;  %vm1689_vm15 = vcmp.eq.s32.totalorder %v5622_v15, %v6589_v13 }
 0x22f   : > { %v1055_v1 = vpop.f32.mrf.mxu3  ;;  %2186 = vmatpush.msra.mxu3 %v6216_v58  ;;  %2248 = vmatpush.msrb.mxu1 %v6537_v19  ;;  %v6555_v58 = vld [vmem:[%s8421_s1 + $0xa0] sm:$0xff] }
 0x230   : > { %v1056_v12 = vadd.f32 %v1055_v1, %v6015_v62  ;;  %v6564_v62 = vld [vmem:[%s8421_s1 + $0x98] sm:$0xff] }
 0x231   : > { %2187 = vmatpush.msra.mxu3 %v6222_v14  ;;  %2249 = vmatpush.msrb.mxu1 %v6555_v58 }
 0x232   : > { %4311 = vmatmul.msk.f32.gmra.mxu1 %vm284_vm0, %v1056_v12  ;;  %v6571_v12 = vld [vmem:[%s8421_s1 + $0x90] sm:$0xff] }
 0x233   : > { %2188 = vmatpush.msra.mxu3 %v6233_v31  ;;  %2250 = vmatpush.msrb.mxu1 %v6564_v62  ;;  %v6576_v31 = vld [vmem:[%s5273_s17 + $0x70] sm:$0xff] }
 0x234   : > { %4391 = vmatmul.msk.f32.gmra.mxu3 %vm284_vm0, %v1459_v5  ;;  %v1787_v33 = vpop.f32.mrf.mxu0  ;;  %2072 = vperm.xlu1 %4985, %v6576_v31   ;;  %v6583_v5 = vld [vmem:[%s8421_s1 + $0x88] sm:$0xff] }
 0x235   : > { %v1853_v1 = vadd.f32 %v1852_v35, %v1787_v33  ;;  %2251 = vmatpush.msrb.mxu1 %v6571_v12  ;;  %2641 = vmatpush.msrb.mxu3 %v6414_v24  ;;  %v1462_v35 = vadd.f32 %v6290_v21, %v6266_v25  ;;  %v6617_v21 = vpop.permute.xlu2 %1651 }
 0x236   : > { %2075 = vperm.xlu2 %4986, %v6592_v43   ;;  %4459 = vmatmul.msk.f32.gmra.mxu2 %vm1689_vm15, %v8547_v26  ;;  %vm1691_vm1 = vcmp.eq.s32.totalorder %v5622_v15, %v6617_v21 }
 0x237   : > { %v1058_v14 = vpop.f32.mrf.mxu3  ;;  %4468 = vmatmul.msk.f32.vlgmr.msra.gmra.mxu0 %vm284_vm0, %v1853_v1  ;;  %2252 = vmatpush.msrb.mxu1 %v6583_v5  ;;  %v6601_v1 = vld [vmem:[%s8421_s1 + $0x80] sm:$0xff] }
 0x238   : > { %v1059_v33 = vadd.f32 %v1058_v14, %v6028_v28  ;;  %2642 = vmatpush.msrb.mxu3 %v6424_v3  ;;  %3044 = vmatpush.msra.mxu0 %v6414_v24  ;;  %v1465_v28 = vadd.f32 %v6301_v53, %v6280_v32  ;;  %v1477_v24 = vadd.f32 %v6335_v29, %v6328_v39 }
 0x239   : > { %2253 = vmatpush.msrb.mxu1 %v6601_v1  ;;  %v1483_v29 = vadd.f32 %v6358_v55, %v6352_v17  ;;  %v1489_v55 = vadd.f32 %v6417_v41, %v6427_v7  ;;  %v5169_v41 = vmov 5   ;;  %v8558_v7 = vld [vmem:[#allocation58_spill] sm:$0xff] }
 0x23a   : > { %4312 = vmatmul.msk.f32.gmra.mxu1 %vm284_vm0, %v1059_v33  ;;  %2643 = vmatpush.msrb.mxu3 %v6441_v63  ;;  %v1492_v33 = vadd.f32 %v6471_v50, %v6496_v56  ;;  %v8561_v56 = vld [vmem:[#allocation57_spill] sm:$0xff] }
 0x23b   : > { %3045 = vmatpush.msra.mxu0 %v6424_v3  ;;  %4988 = vset.pattern.permute.xlu0 %v5169_v41  ;;  %v8562_v50 = vld [vmem:[#allocation5_spill] sm:$0xff] }
 0x23c   : > { %4392 = vmatmul.msk.f32.gmra.mxu3 %vm284_vm0, %v1462_v35  ;;  %4989 = vset.pattern.permute.xlu1 %v5169_v41  ;;  %vm1676_vm9 = vcmp.eq.s32.totalorder %v8562_v50, %v8561_v56 }
 0x23d   : > { %2644 = vmatpush.msrb.mxu3 %v6459_v51  ;;  %3046 = vmatpush.msra.mxu0 %v6441_v63  ;;  %v6670_v32 = vpop.permute.xlu2 %1660 }
 0x23e   : > { %4460 = vmatmul.msk.f32.gmra.mxu2 %vm1691_vm1, %v8547_v26  ;;  %vm1697_vm4 = vcmp.eq.s32.totalorder %v5622_v15, %v6670_v32  ;;  %2433 = vperm.xlu0 %4988, %v8558_v7  }
 0x23f   : > { %v1061_v25 = vpop.f32.mrf.mxu3  ;;  %2645 = vmatpush.msrb.mxu3 %v6468_v9  ;;  %3047 = vmatpush.msra.mxu0 %v6459_v51  ;;  %v6635_v51 = vpop.permute.xlu0 %1654 }
 0x240   : > { %v1062_v14 = vadd.f32 %v1061_v25, %v6041_v36  ;;  %v1468_v36 = vadd.f32 %v6310_v11, %v6296_v52  ;;  %vm1693_vm2 = vcmp.eq.s32.totalorder %v5622_v15, %v6635_v51  ;;  %v1471_v11 = vadd.f32 %v6317_v20, %v6305_v18  ;;  %v6653_v52 = vpop.permute.xlu1 %1657  ;;  %4990 = vset.pattern.permute.xlu2 %v5169_v41 }
 0x241   : > { %2646 = vmatpush.msrb.mxu3 %v6478_v42  ;;  %3048 = vmatpush.msra.mxu0 %v6468_v9  ;;  %vm1695_vm3 = vcmp.eq.s32.totalorder %v5622_v15, %v6653_v52  ;;  %v1474_v18 = vadd.f32 %v6326_v23, %v6319_v2  ;;  %v1480_v23 = vadd.f32 %v6344_v44, %v6339_v60 }
 0x242   : > { %4313 = vmatmul.msk.f32.gmra.mxu1 %vm284_vm0, %v1062_v14  ;;  %v1486_v44 = vadd.f32 %v6382_v38, %v6384_v46  ;;  %v8556_v46 = vld [vmem:[#allocation35_spill] sm:$0xff] }
 0x243   : > { %2647 = vmatpush.msrb.mxu3 %v6490_v47  ;;  %3049 = vmatpush.msra.mxu0 %v6478_v42 }
 0x244   : > { %4393 = vmatmul.msk.f32.gmra.mxu3 %vm284_vm0, %v1465_v28  ;;  %v8557_v28 = vld [vmem:[#allocation41_spill] sm:$0xff] }
 0x245   : > { %2648 = vmatpush.msrb.mxu3 %v6510_v48  ;;  %3050 = vmatpush.msra.mxu0 %v6490_v47  ;;  %v6700_v60 = vpop.permute.xlu2 %1669  ;;  %v8554_v47 = vld [vmem:[#allocation23_spill] sm:$0xff] }
 0x246   : > { %4461 = vmatmul.msk.f32.gmra.mxu2 %vm1693_vm2, %v8547_v26  ;;  %vm1703_vm7 = vcmp.eq.s32.totalorder %v5622_v15, %v6700_v60  ;;  %2448 = vperm.xlu0 %4988, %v6430_v22  }
 0x247   : > { %v1064_v53 = vpop.f32.mrf.mxu3  ;;  %2649 = vmatpush.msrb.mxu3 %v6519_v57  ;;  %3051 = vmatpush.msra.mxu0 %v6510_v48  ;;  %v6680_v2 = vpop.permute.xlu0 %1663 }
 0x248   : > { %v1065_v63 = vadd.f32 %v1064_v53, %v6049_v45  ;;  %vm1699_vm5 = vcmp.eq.s32.totalorder %v5622_v15, %v6680_v2  ;;  %v6690_v39 = vpop.permute.xlu1 %1666  ;;  %v8559_v53 = vld [vmem:[#allocation62_spill] sm:$0xff] }
 0x249   : > { %2650 = vmatpush.msrb.mxu3 %v6529_v61  ;;  %3052 = vmatpush.msra.mxu0 %v6519_v57  ;;  %vm1701_vm6 = vcmp.eq.s32.totalorder %v5622_v15, %v6690_v39 }
 0x24a   : > { %4314 = vmatmul.msk.f32.gmra.mxu1 %vm284_vm0, %v1065_v63  ;;  %2436 = vperm.xlu1 %4989, %v8559_v53  }
 0x24b   : > { %2651 = vmatpush.msrb.mxu3 %v6537_v19  ;;  %3053 = vmatpush.msra.mxu0 %v6529_v61  ;;  %v8555_v61 = vld [vmem:[#allocation29_spill] sm:$0xff] }
 0x24c   : > { %4394 = vmatmul.msk.f32.gmra.mxu3 %vm284_vm0, %v1468_v36  ;;  %v8560_v36 = vld [vmem:[#allocation59_spill] sm:$0xff] }
 0x24d   : > { %2652 = vmatpush.msrb.mxu3 %v6555_v58  ;;  %3054 = vmatpush.msra.mxu0 %v6537_v19 }
 0x24e   : > { %4462 = vmatmul.msk.f32.gmra.mxu2 %vm1695_vm3, %v8547_v26  ;;  %2439 = vperm.xlu2 %4990, %v8560_v36  }
 0x24f   : > { %v1067_v45 = vpop.f32.mrf.mxu3  ;;  %2653 = vmatpush.msrb.mxu3 %v6564_v62  ;;  %3055 = vmatpush.msra.mxu0 %v6555_v58  ;;  %v6710_v17 = vpop.permute.xlu0 %1672 }
 0x250   : > { %v1068_v48 = vadd.f32 %v1067_v45, %v6056_v54  ;;  %vm1705_vm8 = vcmp.eq.s32.totalorder %v5622_v15, %v6710_v17  ;;  %2457 = vperm.xlu0 %4988, %v6019_v10  }
 0x251   : > { %2654 = vmatpush.msrb.mxu3 %v6571_v12  ;;  %3056 = vmatpush.msra.mxu0 %v6564_v62 }
 0x252   : > { %4315 = vmatmul.msk.f32.gmra.mxu1 %vm284_vm0, %v1068_v48  ;;  %v6742_v48 = vld [vmem:[%s8423_s3 + $0x8] sm:$0xff]  ;;  %2442 = vperm.xlu1 %4989, %v6388_v49  }
 0x253   : > { %2655 = vmatpush.msrb.mxu3 %v6583_v5  ;;  %3057 = vmatpush.msra.mxu0 %v6571_v12 }
 0x254   : > { %4395 = vmatmul.msk.f32.gmra.mxu3 %vm284_vm0, %v1471_v11 }
 0x255   : > { %2656 = vmatpush.msrb.mxu3 %v6601_v1  ;;  %3058 = vmatpush.msra.mxu0 %v6583_v5 }
 0x256   : > { %4463 = vmatmul.msk.f32.gmra.mxu2 %vm1697_vm4, %v8547_v26  ;;  %2445 = vperm.xlu2 %4990, %v6402_v37  }
 0x257   : > { %v1070_v54 = vpop.f32.mrf.mxu3  ;;  %3059 = vmatpush.msra.mxu0 %v6601_v1 }
 0x258   : > { %v1071_v58 = vadd.f32 %v1070_v54, %v6063_v4  ;;  %2466 = vperm.xlu0 %4988, %v6032_v27   ;;  %v8567_v27 = vld [vmem:[#allocation66_spill] sm:$0xff] }
 0x25a   : > { %4316 = vmatmul.msk.f32.gmra.mxu1 %vm284_vm0, %v1071_v58  ;;  %2451 = vperm.xlu1 %4989, %v6450_v40  }
 0x25c   : > { %4396 = vmatmul.msk.f32.gmra.mxu3 %vm284_vm0, %v1474_v18  ;;  %v8563_v18 = vld [vmem:[#allocation61_spill] sm:$0xff] }
 0x25d   : > { %vm1678_vm10 = vcmp.eq.s32.totalorder %v8562_v50, %v8563_v18 }
 0x25e   : > { %4464 = vmatmul.msk.f32.gmra.mxu2 %vm1699_vm5, %v8547_v26 }
 0x25f   : > { %v1073_v20 = vpop.f32.mrf.mxu3 }
 0x260   : > { %v1074_v3 = vadd.f32 %v1073_v20, %v6070_v8  ;;  %2475 = vperm.xlu0 %4988, %v6576_v31  }
 0x262   : > { %4317 = vmatmul.msk.f32.gmra.mxu1 %vm284_vm0, %v1074_v3  ;;  %v8564_v3 = vld [vmem:[#allocation63_spill] sm:$0xff]  ;;  %2460 = vperm.xlu1 %4989, %v6501_v0  }
 0x263   : > { %2454 = vperm.xlu2 %4990, %v8564_v3  }
 0x264   : > { %4397 = vmatmul.msk.f32.gmra.mxu3 %vm284_vm0, %v1477_v24 }
 0x266   : > { %4465 = vmatmul.msk.f32.gmra.mxu2 %vm1701_vm6, %v8547_v26  ;;  %vm1688_vm6 = vcmp.eq.s32.totalorder %v8562_v50, %v6589_v13 }
 0x267   : > { %v1076_v4 = vpop.f32.mrf.mxu3  ;;  %v6767_v24 = vpop.permute.xlu2 %2033 }
 0x268   : > { %v1077_v9 = vadd.f32 %v1076_v4, %v6077_v59  ;;  %vm2079_vm12 = vcmp.eq.s32.totalorder %v8562_v50, %v6767_v24 }
 0x26a   : > { %4318 = vmatmul.msk.f32.gmra.mxu1 %vm284_vm0, %v1077_v9  ;;  %v8565_v9 = vld [vmem:[#allocation64_spill] sm:$0xff]  ;;  %2469 = vperm.xlu1 %4989, %v6546_v6  }
 0x26b   : > { %vm1680_vm13 = vcmp.eq.s32.totalorder %v8562_v50, %v8565_v9  ;;  %2463 = vperm.xlu2 %4990, %v6434_v30  }
 0x26c   : > { %4398 = vmatmul.msk.f32.gmra.mxu3 %vm284_vm0, %v1480_v23 }
 0x26e   : > { %4466 = vmatmul.msk.f32.gmra.mxu2 %vm1703_vm7, %v8547_v26 }
 0x26f   : > { %v1079_v8 = vpop.f32.mrf.mxu3 }
 0x270   : > { %v1080_v42 = vadd.f32 %v1079_v8, %v6084_v34  ;;  %v6783_v8 = vpop.permute.xlu0 %2036 }
 0x271   : > { %vm2081_vm14 = vcmp.eq.s32.totalorder %v8562_v50, %v6783_v8 }
 0x272   : > { %4319 = vmatmul.msk.f32.gmra.mxu1 %vm284_vm0, %v1080_v42  ;;  %v8566_v42 = vld [vmem:[#allocation65_spill] sm:$0xff]  ;;  %2478 = vperm.xlu1 %4989, %v6592_v43  }
 0x273   : > { %vm1682_vm15 = vcmp.eq.s32.totalorder %v8562_v50, %v8566_v42  ;;  %2472 = vperm.xlu2 %4990, %v8567_v27  }
 0x274   : > { %4399 = vmatmul.msk.f32.gmra.mxu3 %vm284_vm0, %v1483_v29 }
 0x276   : > { %4467 = vmatmul.msk.f32.gmra.mxu2 %vm1705_vm8, %v8547_v26  ;;  %vm1690_vm8 = vcmp.eq.s32.totalorder %v8562_v50, %v6617_v21 }
 0x277   : > { %v1082_v59 = vpop.f32.mrf.mxu3 }
 0x278   : > { %v1083_v57 = vadd.f32 %v1082_v59, %v8554_v47 }
 0x27a   : > { %4320 = vmatmul.msk.f32.gmra.mxu1 %vm284_vm0, %v1083_v57  ;;  %v8568_v57 = vld [vmem:[#allocation67_spill] sm:$0xff] }
 0x27b   : > { %v6745_v54 = vpop.permute.xlu1 %2030  ;;  %vm1684_vm2 = vcmp.eq.s32.totalorder %v8562_v50, %v8568_v57 }
 0x27c   : > { %4400 = vmatmul.msk.f32.gmra.mxu3 %vm284_vm0, %v1486_v44  ;;  %vm2077_vm11 = vcmp.eq.s32.totalorder %v8562_v50, %v6745_v54 }
 0x27f   : > { %v1085_v34 = vpop.f32.mrf.mxu3 }
 0x280   : > { %v1086_v19 = vadd.f32 %v1085_v34, %v8555_v61  ;;  %v6813_v34 = vpop.permute.xlu2 %2042  ;;  %v6850_v13 = vpop.permute.xlu0 %2051 }
 0x281   : > { %vm2085_vm3 = vcmp.eq.s32.totalorder %v8562_v50, %v6813_v34 }
 0x282   : > { %4321 = vmatmul.msk.f32.gmra.mxu1 %vm284_vm0, %v1086_v19  ;;  %v8571_v19 = vld [vmem:[#allocation68_spill] sm:$0xff] }
 0x283   : > { %v6798_v59 = vpop.permute.xlu1 %2039  ;;  %vm1686_vm4 = vcmp.eq.s32.totalorder %v8562_v50, %v8571_v19 }
 0x284   : > { %4401 = vmatmul.msk.f32.gmra.mxu3 %vm284_vm0, %v1489_v55  ;;  %vm2083_vm1 = vcmp.eq.s32.totalorder %v8562_v50, %v6798_v59 }
 0x287   : > { %v1088_v38 = vpop.f32.mrf.mxu3 }
 0x288   : > { %v1089_v35 = vadd.f32 %v1088_v38, %v8556_v46 }
 0x28a   : > { %4322 = vmatmul.msk.f32.gmra.mxu1 %vm284_vm0, %v1089_v35 }
 0x28b   : > { %v6826_v38 = vpop.permute.xlu1 %2045 }
 0x28c   : > { %4402 = vmatmul.msk.f32.gmra.mxu3 %vm284_vm0, %v1492_v33  ;;  %vm2087_vm5 = vcmp.eq.s32.totalorder %v8562_v50, %v6826_v38  ;;  %v6838_v33 = vpop.permute.xlu2 %2048 }
 0x28d   : > { %vm2089_vm7 = vcmp.eq.s32.totalorder %v8562_v50, %v6838_v33 }
 0x28f   : > { %v1091_v25 = vpop.f32.mrf.mxu3 }
 0x290   : > { %v1092_v14 = vadd.f32 %v1091_v25, %v8557_v28 }
 0x292   : > { %4323 = vmatmul.msk.f32.gmra.mxu1 %vm284_vm0, %v1092_v14 }
 0x294   : > { %v6862_v21 = vpop.permute.xlu1 %2054 }
 0x297   : > { %v6734_v63 = vpop.f32.mrf.mxu1  ;;  %v1429_v45 = vpop.f32.mrf.mxu3 }
 0x298   : > { %v1495_v11 = vadd.f32 %v6522_v16, %v1429_v45  ;;  %v6752_v16 = vld [vmem:[%s8423_s3] sm:$0xff] }
 0x29a   : > { %4403 = vmatmul.msk.f32.gmra.mxu3 %vm284_vm0, %v1495_v11  ;;  %4437 = vmatmul.msk.f32.vlgmr.msra.gmra.mxu1 %vm1676_vm9, %v8547_v26  ;;  %vm2091_vm9 = vcmp.eq.s32.totalorder %v8562_v50, %v6850_v13 }
 0x29b   : > { %2768 = vmatpush.msra.mxu1 %v6742_v48 }
 0x29d   : > { %2769 = vmatpush.msra.mxu1 %v6752_v16 }
 0x29f   : > { %v6758_v58 = vpop.f32.mrf.mxu1  ;;  %v6760_v20 = vpop.f32.mrf.mxu3 }
 0x2a2   : > { %4438 = vmatmul.msk.f32.gmra.mxu1 %vm1678_vm10, %v8547_v26  ;;  %4516 = vmatmul.msk.f32.vlgmr.msra.gmra.mxu3 %vm2077_vm11, %v8547_v26  ;;  %vm1692_vm10 = vcmp.eq.s32.totalorder %v8562_v50, %v6635_v51  ;;  %vm2093_vm11 = vcmp.eq.s32.totalorder %v8562_v50, %v6862_v21  ;;  %v6874_v51 = vpop.permute.xlu2 %2057 }
 0x2a3   : > { %3171 = vmatpush.msra.mxu3 %v6742_v48 }
 0x2a5   : > { %3172 = vmatpush.msra.mxu3 %v6752_v16 }
 0x2a7   : > { %v6773_v4 = vpop.f32.mrf.mxu1  ;;  %v6775_v23 = vpop.f32.mrf.mxu3 }
 0x2aa   : > { %4439 = vmatmul.msk.f32.gmra.mxu1 %vm1680_vm13, %v8547_v26  ;;  %4517 = vmatmul.msk.f32.gmra.mxu3 %vm2079_vm12, %v8547_v26  ;;  %vm1694_vm12 = vcmp.eq.s32.totalorder %v8562_v50, %v6653_v52  ;;  %vm2095_vm13 = vcmp.eq.s32.totalorder %v8562_v50, %v6874_v51  ;;  %v6886_v52 = vpop.permute.xlu0 %2060 }
 0x2af   : > { %v6788_v10 = vpop.f32.mrf.mxu1  ;;  %v6790_v29 = vpop.f32.mrf.mxu3 }
 0x2b2   : > { %4440 = vmatmul.msk.f32.gmra.mxu1 %vm1682_vm15, %v8547_v26  ;;  %4518 = vmatmul.msk.f32.gmra.mxu3 %vm2081_vm14, %v8547_v26  ;;  %vm1696_vm14 = vcmp.eq.s32.totalorder %v8562_v50, %v6670_v32  ;;  %vm2097_vm15 = vcmp.eq.s32.totalorder %v8562_v50, %v6886_v52  ;;  %v6898_v32 = vpop.permute.xlu1 %2063 }
 0x2b7   : > { %v6803_v44 = vpop.f32.mrf.mxu1  ;;  %v6805_v47 = vpop.f32.mrf.mxu3 }
 0x2ba   : > { %4441 = vmatmul.msk.f32.gmra.mxu1 %vm1684_vm2, %v8547_v26  ;;  %4519 = vmatmul.msk.f32.gmra.mxu3 %vm2083_vm1, %v8547_v26  ;;  %vm1698_vm1 = vcmp.eq.s32.totalorder %v8562_v50, %v6680_v2  ;;  %vm2099_vm2 = vcmp.eq.s32.totalorder %v8562_v50, %v6898_v32  ;;  %v1855_v2 = vpop.f32.mrf.mxu2 }
 0x2bf   : > { %v6816_v55 = vpop.f32.mrf.mxu1  ;;  %v6818_v61 = vpop.f32.mrf.mxu3 }
 0x2c0   : > { %8569 = vst [vmem:[#allocation23_spill] sm:$0xff] %v6816_v55 }
 0x2c1   : > { %8570 = vst [vmem:[#allocation29_spill] sm:$0xff] %v6818_v61  ;;  %v8602_v61 = vld [vmem:[#allocation31_spill] sm:$0xff] }
 0x2c2   : > { %4442 = vmatmul.msk.f32.gmra.mxu1 %vm1686_vm4, %v8547_v26  ;;  %4520 = vmatmul.msk.f32.gmra.mxu3 %vm2085_vm3, %v8547_v26  ;;  %vm1700_vm3 = vcmp.eq.s32.totalorder %v8562_v50, %v6690_v39  ;;  %v6922_v39 = vpop.permute.xlu0 %2069 }
 0x2c7   : > { %v6828_v46 = vpop.f32.mrf.mxu1  ;;  %v6830_v35 = vpop.f32.mrf.mxu3 }
 0x2c8   : > { %8572 = vst [vmem:[#allocation35_spill] sm:$0xff] %v6828_v46 }
 0x2c9   : > { %8573 = vst [vmem:[#allocation41_spill] sm:$0xff] %v6830_v35 }
 0x2ca   : > { %4443 = vmatmul.msk.f32.gmra.mxu1 %vm1688_vm6, %v8547_v26  ;;  %4521 = vmatmul.msk.f32.gmra.mxu3 %vm2087_vm5, %v8547_v26  ;;  %vm1702_vm5 = vcmp.eq.s32.totalorder %v8562_v50, %v6700_v60  ;;  %vm2103_vm6 = vcmp.eq.s32.totalorder %v8562_v50, %v6922_v39 }
 0x2cf   : > { %v6840_v25 = vpop.f32.mrf.mxu1  ;;  %v6842_v28 = vpop.f32.mrf.mxu3 }
 0x2d0   : > { %8574 = vst [vmem:[#allocation58_spill] sm:$0xff] %v6840_v25  ;;  %v8595_v25 = vld [vmem:[#allocation25_spill] sm:$0xff] }
 0x2d1   : > { %8575 = vst [vmem:[#allocation62_spill] sm:$0xff] %v6842_v28 }
 0x2d2   : > { %4444 = vmatmul.msk.f32.gmra.mxu1 %vm1690_vm8, %v8547_v26  ;;  %4522 = vmatmul.msk.f32.gmra.mxu3 %vm2089_vm7, %v8547_v26  ;;  %vm1704_vm7 = vcmp.eq.s32.totalorder %v8562_v50, %v6710_v17  ;;  %vm2078_vm8 = vcmp.eq.s32.totalorder %v5622_v15, %v6745_v54  ;;  %v8590_v17 = vld [vmem:[#allocation22_spill] sm:$0xff] }
 0x2d7   : > { %v6852_v14 = vpop.f32.mrf.mxu1  ;;  %v6854_v41 = vpop.f32.mrf.mxu3 }
 0x2d8   : > { %8576 = vst [vmem:[#allocation59_spill] sm:$0xff] %v6852_v14 }
 0x2d9   : > { %8577 = vst [vmem:[#allocation57_spill] sm:$0xff] %v6854_v41 }
 0x2da   : > { %4445 = vmatmul.msk.f32.gmra.mxu1 %vm1692_vm10, %v8547_v26  ;;  %4523 = vmatmul.msk.f32.gmra.mxu3 %vm2091_vm9, %v8547_v26 }
 0x2df   : > { %v6864_v56 = vpop.f32.mrf.mxu1  ;;  %v6866_v45 = vpop.f32.mrf.mxu3 }
 0x2e0   : > { %8578 = vst [vmem:[#allocation5_spill] sm:$0xff] %v6864_v56  ;;  %v8592_v56 = vld [vmem:[#allocation24_spill] sm:$0xff] }
 0x2e1   : > { %8579 = vst [vmem:[#allocation61_spill] sm:$0xff] %v6866_v45  ;;  %v8593_v45 = vld [vmem:[#allocation21_spill] sm:$0xff] }
 0x2e2   : > { %4446 = vmatmul.msk.f32.gmra.mxu1 %vm1694_vm12, %v8547_v26  ;;  %4524 = vmatmul.msk.f32.gmra.mxu3 %vm2093_vm11, %v8547_v26  ;;  %vm2080_vm11 = vcmp.eq.s32.totalorder %v5622_v15, %v6767_v24  ;;  %v8601_v24 = vld [vmem:[#allocation30_spill] sm:$0xff] }
 0x2e7   : > { %v6876_v11 = vpop.f32.mrf.mxu1  ;;  %v6878_v18 = vpop.f32.mrf.mxu3 }
 0x2e8   : > { %8580 = vst [vmem:[#allocation63_spill] sm:$0xff] %v6876_v11 }
 0x2e9   : > { %8581 = vst [vmem:[#allocation64_spill] sm:$0xff] %v6878_v18 }
 0x2ea   : > { %4447 = vmatmul.msk.f32.gmra.mxu1 %vm1696_vm14, %v8547_v26  ;;  %4525 = vmatmul.msk.f32.gmra.mxu3 %vm2095_vm13, %v8547_v26  ;;  %vm2082_vm13 = vcmp.eq.s32.totalorder %v5622_v15, %v6783_v8 }
 0x2ef   : > { %v6888_v9 = vpop.f32.mrf.mxu1  ;;  %v6890_v42 = vpop.f32.mrf.mxu3 }
 0x2f0   : > { %8582 = vst [vmem:[#allocation65_spill] sm:$0xff] %v6888_v9  ;;  %v6910_v9 = vpop.permute.xlu2 %2066 }
 0x2f1   : > { %8583 = vst [vmem:[#allocation66_spill] sm:$0xff] %v6890_v42  ;;  %vm2101_vm4 = vcmp.eq.s32.totalorder %v8562_v50, %v6910_v9 }
 0x2f2   : > { %4448 = vmatmul.msk.f32.gmra.mxu1 %vm1698_vm1, %v8547_v26  ;;  %4526 = vmatmul.msk.f32.gmra.mxu3 %vm2097_vm15, %v8547_v26  ;;  %vm2084_vm15 = vcmp.eq.s32.totalorder %v5622_v15, %v6798_v59  ;;  %v5055_v59 = vld [vmem:[%s8421_s1 + $0x50] sm:$0xff] }
 0x2f7   : > { %v6900_v57 = vpop.f32.mrf.mxu1  ;;  %v6902_v19 = vpop.f32.mrf.mxu3 }
 0x2f8   : > { %8584 = vst [vmem:[#allocation67_spill] sm:$0xff] %v6900_v57  ;;  %v6955_v14 = vpop.permute.xlu2 %2075 }
 0x2f9   : > { %8585 = vst [vmem:[#allocation68_spill] sm:$0xff] %v6902_v19  ;;  %v1858_v19 = vpop.f32.mrf.mxu2  ;;  %vm2107_vm10 = vcmp.eq.s32.totalorder %v8562_v50, %v6955_v14 }
 0x2fa   : > { %4449 = vmatmul.msk.f32.gmra.mxu1 %vm1700_vm3, %v8547_v26  ;;  %4527 = vmatmul.msk.f32.gmra.mxu3 %vm2099_vm2, %v8547_v26  ;;  %vm2086_vm2 = vcmp.eq.s32.totalorder %v5622_v15, %v6813_v34  ;;  %v8610_v34 = vld [vmem:[#allocation43_spill] sm:$0xff] }
 0x2ff   : > { %v6912_v42 = vpop.f32.mrf.mxu1  ;;  %v6918_v57 = vpop.f32.mrf.mxu3 }
 0x300   : > { %8586 = vst [vmem:[#allocation69_spill] sm:$0xff] %v6912_v42  ;;  %v6934_v42 = vpop.permute.xlu1 %2072 }
 0x301   : > { %8587 = vst [vmem:[#allocation70_spill] sm:$0xff] %v6918_v57  ;;  %v1861_v57 = vpop.f32.mrf.mxu2  ;;  %vm2105_vm9 = vcmp.eq.s32.totalorder %v8562_v50, %v6934_v42 }
 0x302   : > { %4450 = vmatmul.msk.f32.gmra.mxu1 %vm1702_vm5, %v8547_v26  ;;  %4528 = vmatmul.msk.f32.gmra.mxu3 %vm2101_vm4, %v8547_v26  ;;  %vm2088_vm4 = vcmp.eq.s32.totalorder %v5622_v15, %v6826_v38  ;;  %v5064_v38 = vld [vmem:[%s8421_s1 + $0x8] sm:$0xff] }
 0x307   : > { %v6924_v11 = vpop.f32.mrf.mxu1  ;;  %v6932_v60 = vpop.f32.mrf.mxu3 }
 0x308   : > { %8588 = vst [vmem:[#allocation71_spill] sm:$0xff] %v6924_v11  ;;  %v6946_v11 = vld [vmem:[%s8424_s4] ss:$0 sm:$0xff] }
 0x309   : > { %8589 = vst [vmem:[#allocation72_spill] sm:$0xff] %v6932_v60  ;;  %v6953_v54 = vadd.f32 %v6946_v11, %v8593_v45  ;;  %v1864_v35 = vpop.f32.mrf.mxu2 }
 0x30a   : > { %4451 = vmatmul.msk.f32.gmra.mxu1 %vm1704_vm7, %v8547_v26  ;;  %4529 = vmatmul.msk.f32.gmra.mxu3 %vm2103_vm6, %v8547_v26  ;;  %vm2090_vm6 = vcmp.eq.s32.totalorder %v5622_v15, %v6838_v33 }
 0x30b   : > { %8594 = vst [vmem:[#allocation24_spill] sm:$0xff] %v6953_v54 }
 0x30f   : > { %v1204_v18 = vpop.f32.mrf.mxu1  ;;  %v6948_v60 = vpop.f32.mrf.mxu3 }
 0x310   : > { %8591 = vst [vmem:[#allocation22_spill] sm:$0xff] %v6948_v60  ;;  %v8597_v60 = vld [vmem:[#allocation27_spill] sm:$0xff]  ;;  %v1205_v45 = vadd.f32 %v1204_v18, %v6953_v54 }
 0x312   : > { %4530 = vmatmul.msk.f32.gmra.mxu3 %vm2105_vm9, %v8547_v26  ;;  %4532 = vmatmul.msk.f32.vlgmr.msrb.gmra.mxu1 %vm2078_vm8, %v8547_v26  ;;  %vm2092_vm8 = vcmp.eq.s32.totalorder %v5622_v15, %v6850_v13 }
 0x313   : > { %3382 = vmatpush.msrb.mxu1 %v8590_v17  ;;  %v8596_v17 = vld [vmem:[#allocation60_spill] sm:$0xff] }
 0x314   : > { %v802_v28 = vadd.f32 %v8596_v17, %v6953_v54  ;;  %v6969_v17 = vpop.permute.xlu0 %2433 }
 0x315   : > { %3383 = vmatpush.msrb.mxu1 %v8592_v56  ;;  %vm2481_vm12 = vcmp.eq.s32.totalorder %v5622_v15, %v6969_v17 }
 0x317   : > { %v1790_v41 = vpop.f32.mrf.mxu1  ;;  %3384 = vmatpush.msrb.mxu1 %v8595_v25  ;;  %v819_v25 = vmax.f32 %v802_v28, 0.0 }
 0x318   : > { %v1856_v46 = vadd.f32 %v1855_v2, %v1790_v41  ;;  %v8598_v41 = vld [vmem:[#allocation28_spill] sm:$0xff] }
 0x319   : > { %3385 = vmatpush.msrb.mxu1 %v8597_v60  ;;  %v6972_v55 = vmax.f32 %v819_v25, %v1205_v45  ;;  %v1867_v45 = vpop.f32.mrf.mxu2  ;;  %v5051_v25 = vld [vmem:[%s8421_s1 + $0x78] sm:$0xff] }
 0x31a   : > { %4469 = vmatmul.msk.f32.gmra.mxu0 %vm284_vm0, %v1856_v46  ;;  %4531 = vmatmul.msk.f32.gmra.mxu3 %vm2107_vm10, %v8547_v26  ;;  %vm2094_vm10 = vcmp.eq.s32.totalorder %v5622_v15, %v6862_v21  ;;  %v7401_v46 = vld [vmem:[%s5273_s17 + $0x30] sm:$0xff] }
 0x31b   : > { %4533 = vmatmul.msk.f32.gmra.mxu1 %vm2080_vm11, %v8547_v26  ;;  %8599 = vst [vmem:[#allocation21_spill] sm:$0xff] %v6972_v55  ;;  %v7416_v55 = vld [vmem:[%s5273_s17 + $0x48] sm:$0xff] }
 0x31c   : > { %3386 = vmatpush.msrb.mxu1 %v8598_v41  ;;  %v6991_v41 = vpop.permute.xlu1 %2436  ;;  %8615 = vst [vmem:[#allocation30_spill] sm:$0xff] %v7416_v55 }
 0x31d   : > { %v1607_v2 = vpop.f32.mrf.mxu3  ;;  %vm2483_vm14 = vcmp.eq.s32.totalorder %v5622_v15, %v6991_v41 }
 0x31e   : > { %v6975_v60 = vadd.f32 %v1607_v2, %v6953_v54  ;;  %3387 = vmatpush.msrb.mxu1 %v8601_v24  ;;  %v5052_v2 = vld [vmem:[%s8421_s1 + $0x68] sm:$0xff] }
 0x31f   : > { %v1793_v18 = vpop.f32.mrf.mxu1  ;;  %v7420_v54 = vld [vmem:[%s5273_s17 + $0x68] sm:$0xff] }
 0x320   : > { %8600 = vst [vmem:[#allocation25_spill] sm:$0xff] %v6975_v60  ;;  %v1859_v28 = vadd.f32 %v1858_v19, %v1793_v18  ;;  %3388 = vmatpush.msrb.mxu1 %v8602_v61  ;;  %v8603_v19 = vld [vmem:[#allocation33_spill] sm:$0xff]  ;;  %v8604_v61 = vld [vmem:[#allocation34_spill] sm:$0xff]  ;;  %v8605_v18 = vld [vmem:[#allocation36_spill] sm:$0xff] }
 0x321   : > { %v7405_v60 = vld [vmem:[%s5273_s17 + $0x50] sm:$0xff]  ;;  %8616 = vst [vmem:[#allocation31_spill] sm:$0xff] %v7420_v54 }
 0x322   : > { %4470 = vmatmul.msk.f32.gmra.mxu0 %vm284_vm0, %v1859_v28  ;;  %4612 = vmatmul.msk.f32.vlgmr.msrb.gmra.mxu3 %vm2481_vm12, %v8547_v26  ;;  %v5053_v28 = vld [vmem:[%s8421_s1 + $0x60] sm:$0xff]  ;;  %vm2096_vm12 = vcmp.eq.s32.totalorder %v5622_v15, %v6874_v51  ;;  %8613 = vst [vmem:[#allocation27_spill] sm:$0xff] %v7405_v60 }
 0x323   : > { %4534 = vmatmul.msk.f32.gmra.mxu1 %vm2082_vm13, %v8547_v26  ;;  %3785 = vmatpush.msrb.mxu3 %v5051_v25  ;;  %v8606_v25 = vld [vmem:[#allocation37_spill] sm:$0xff] }
 0x324   : > { %3389 = vmatpush.msrb.mxu1 %v8603_v19  ;;  %v1870_v19 = vpop.f32.mrf.mxu2 }
 0x325   : > { %3786 = vmatpush.msrb.mxu3 %v8592_v56  ;;  %v5054_v56 = vld [vmem:[%s8421_s1 + $0x58] sm:$0xff]  ;;  %v7096_v13 = vpop.f32.mrf.mxu3 }
 0x326   : > { %3390 = vmatpush.msrb.mxu1 %v8604_v61  ;;  %v8607_v61 = vld [vmem:[#allocation39_spill] sm:$0xff] }
 0x327   : > { %v1796_v8 = vpop.f32.mrf.mxu1  ;;  %3787 = vmatpush.msrb.mxu3 %v5052_v2  ;;  %v5056_v2 = vld [vmem:[%s8421_s1 + $0x48] sm:$0xff] }
 0x328   : > { %v1862_v24 = vadd.f32 %v1861_v57, %v1796_v8  ;;  %3391 = vmatpush.msrb.mxu1 %v8605_v18  ;;  %v7013_v57 = vpop.permute.xlu2 %2439  ;;  %v8608_v18 = vld [vmem:[#allocation40_spill] sm:$0xff] }
 0x329   : > { %3788 = vmatpush.msrb.mxu3 %v5053_v28  ;;  %vm2485_vm1 = vcmp.eq.s32.totalorder %v5622_v15, %v7013_v57  ;;  %v5057_v28 = vld [vmem:[%s8421_s1 + $0x40] sm:$0xff] }
 0x32a   : > { %4471 = vmatmul.msk.f32.gmra.mxu0 %vm284_vm0, %v1862_v24  ;;  %4613 = vmatmul.msk.f32.gmra.mxu3 %vm2483_vm14, %v8547_v26  ;;  %vm2098_vm14 = vcmp.eq.s32.totalorder %v5622_v15, %v6886_v52 }
 0x32b   : > { %4535 = vmatmul.msk.f32.gmra.mxu1 %vm2084_vm15, %v8547_v26  ;;  %3789 = vmatpush.msrb.mxu3 %v5054_v56  ;;  %v7037_v56 = vpop.permute.xlu1 %2442 }
 0x32c   : > { %3392 = vmatpush.msrb.mxu1 %v8606_v25  ;;  %v8609_v25 = vld [vmem:[#allocation42_spill] sm:$0xff]  ;;  %vm2487_vm3 = vcmp.eq.s32.totalorder %v5622_v15, %v7037_v56 }
 0x32d   : > { %3790 = vmatpush.msrb.mxu3 %v5055_v59  ;;  %v5059_v59 = vld [vmem:[%s8421_s1 + $0x30] sm:$0xff] }
 0x32e   : > { %3393 = vmatpush.msrb.mxu1 %v8607_v61  ;;  %v1873_v61 = vpop.f32.mrf.mxu2 }
 0x32f   : > { %v1799_v8 = vpop.f32.mrf.mxu1  ;;  %3791 = vmatpush.msrb.mxu3 %v5056_v2  ;;  %v5060_v2 = vld [vmem:[%s8421_s1 + $0x28] sm:$0xff] }
 0x330   : > { %v1865_v24 = vadd.f32 %v1864_v35, %v1799_v8  ;;  %3394 = vmatpush.msrb.mxu1 %v8608_v18  ;;  %v5058_v35 = vld [vmem:[%s8421_s1 + $0x38] sm:$0xff]  ;;  %v8611_v18 = vld [vmem:[#allocation45_spill] sm:$0xff] }
 0x331   : > { %3792 = vmatpush.msrb.mxu3 %v5057_v28  ;;  %v5061_v28 = vld [vmem:[%s8421_s1 + $0x20] sm:$0xff] }
 0x332   : > { %4472 = vmatmul.msk.f32.gmra.mxu0 %vm284_vm0, %v1865_v24  ;;  %4614 = vmatmul.msk.f32.gmra.mxu3 %vm2485_vm1, %v8547_v26  ;;  %vm2100_vm1 = vcmp.eq.s32.totalorder %v5622_v15, %v6898_v32 }
 0x333   : > { %4536 = vmatmul.msk.f32.gmra.mxu1 %vm2086_vm2, %v8547_v26  ;;  %3793 = vmatpush.msrb.mxu3 %v5058_v35  ;;  %v7061_v35 = vpop.permute.xlu2 %2445 }
 0x334   : > { %3395 = vmatpush.msrb.mxu1 %v8609_v25  ;;  %v5063_v25 = vld [vmem:[%s8421_s1 + $0x10] sm:$0xff]  ;;  %vm2489_vm5 = vcmp.eq.s32.totalorder %v5622_v15, %v7061_v35 }
 0x335   : > { %3794 = vmatpush.msrb.mxu3 %v5059_v59 }
 0x336   : > { %3396 = vmatpush.msrb.mxu1 %v8610_v34 }
 0x337   : > { %v1802_v8 = vpop.f32.mrf.mxu1  ;;  %3795 = vmatpush.msrb.mxu3 %v5060_v2  ;;  %v5065_v2 = vld [vmem:[%s8421_s1] sm:$0xff] }
 0x338   : > { %v1868_v24 = vadd.f32 %v1867_v45, %v1802_v8  ;;  %3397 = vmatpush.msrb.mxu1 %v8611_v18  ;;  %v5062_v45 = vld [vmem:[%s8421_s1 + $0x18] sm:$0xff]  ;;  %v1876_v8 = vpop.f32.mrf.mxu2 }
 0x339   : > { %3796 = vmatpush.msrb.mxu3 %v5061_v28  ;;  %v7088_v28 = vpop.permute.xlu1 %2451 }
 0x33a   : > { %4473 = vmatmul.msk.f32.gmra.mxu0 %vm284_vm0, %v1868_v24  ;;  %4615 = vmatmul.msk.f32.gmra.mxu3 %vm2487_vm3, %v8547_v26  ;;  %v7079_v24 = vpop.permute.xlu0 %2448  ;;  %vm2493_vm9 = vcmp.eq.s32.totalorder %v5622_v15, %v7088_v28  ;;  %vm2102_vm3 = vcmp.eq.s32.totalorder %v5622_v15, %v6910_v9 }
 0x33b   : > { %4537 = vmatmul.msk.f32.gmra.mxu1 %vm2088_vm4, %v8547_v26  ;;  %3797 = vmatpush.msrb.mxu3 %v5062_v45  ;;  %vm2491_vm7 = vcmp.eq.s32.totalorder %v5622_v15, %v7079_v24 }
 0x33d   : > { %3798 = vmatpush.msrb.mxu3 %v5063_v25 }
 0x33f   : > { %v1805_v59 = vpop.f32.mrf.mxu1  ;;  %3799 = vmatpush.msrb.mxu3 %v5064_v38 }
 0x340   : > { %v1871_v34 = vadd.f32 %v1870_v19, %v1805_v59  ;;  %v1879_v33 = vpop.f32.mrf.mxu2 }
 0x341   : > { %3800 = vmatpush.msrb.mxu3 %v5065_v2  ;;  %v7119_v51 = vpop.permute.xlu1 %2460 }
 0x342   : > { %4474 = vmatmul.msk.f32.gmra.mxu0 %vm284_vm0, %v1871_v34  ;;  %4616 = vmatmul.msk.f32.gmra.mxu3 %vm2489_vm5, %v8547_v26  ;;  %v7108_v21 = vpop.permute.xlu0 %2457  ;;  %vm2499_vm15 = vcmp.eq.s32.totalorder %v5622_v15, %v7119_v51  ;;  %vm2104_vm5 = vcmp.eq.s32.totalorder %v5622_v15, %v6922_v39 }
 0x343   : > { %4538 = vmatmul.msk.f32.gmra.mxu1 %vm2090_vm6, %v8547_v26  ;;  %vm2497_vm13 = vcmp.eq.s32.totalorder %v5622_v15, %v7108_v21 }
 0x347   : > { %v1808_v18 = vpop.f32.mrf.mxu1 }
 0x348   : > { %v1874_v19 = vadd.f32 %v1873_v61, %v1808_v18  ;;  %v7099_v61 = vpop.permute.xlu2 %2454  ;;  %v1882_v59 = vpop.f32.mrf.mxu2 }
 0x349   : > { %vm2495_vm11 = vcmp.eq.s32.totalorder %v5622_v15, %v7099_v61 }
 0x34a   : > { %4475 = vmatmul.msk.f32.gmra.mxu0 %vm284_vm0, %v1874_v19  ;;  %4617 = vmatmul.msk.f32.gmra.mxu3 %vm2491_vm7, %v8547_v26  ;;  %vm2106_vm7 = vcmp.eq.s32.totalorder %v5622_v15, %v6934_v42 }
 0x34b   : > { %4539 = vmatmul.msk.f32.gmra.mxu1 %vm2092_vm8, %v8547_v26 }
 0x34f   : > { %v1811_v45 = vpop.f32.mrf.mxu1 }
 0x350   : > { %v1877_v25 = vadd.f32 %v1876_v8, %v1811_v45  ;;  %v7110_v8 = vpop.f32.mrf.mxu3  ;;  %v1885_v2 = vpop.f32.mrf.mxu2 }
 0x352   : > { %4476 = vmatmul.msk.f32.gmra.mxu0 %vm284_vm0, %v1877_v25  ;;  %4618 = vmatmul.msk.f32.gmra.mxu3 %vm2493_vm9, %v8547_v26  ;;  %vm2108_vm9 = vcmp.eq.s32.totalorder %v5622_v15, %v6955_v14 }
 0x353   : > { %4540 = vmatmul.msk.f32.gmra.mxu1 %vm2094_vm10, %v8547_v26  ;;  %vm2480_vm10 = vcmp.eq.s32.totalorder %v8562_v50, %v6969_v17 }
 0x357   : > { %v1814_v38 = vpop.f32.mrf.mxu1 }
 0x358   : > { %v1880_v34 = vadd.f32 %v1879_v33, %v1814_v38  ;;  %v5170_v33 = vmov 6   ;;  %v7124_v45 = vpop.f32.mrf.mxu3 }
 0x359   : > { %4992 = vset.pattern.permute.xlu0 %v5170_v33  ;;  %4991 = vset.pattern.permute.xlu2 %v5170_v33 }
 0x35a   : > { %4477 = vmatmul.msk.f32.gmra.mxu0 %vm284_vm0, %v1880_v34  ;;  %4619 = vmatmul.msk.f32.gmra.mxu3 %vm2495_vm11, %v8547_v26 }
 0x35b   : > { %4541 = vmatmul.msk.f32.gmra.mxu1 %vm2096_vm12, %v8547_v26  ;;  %2839 = vperm.xlu0 %4992, %v8559_v53   ;;  %vm2482_vm12 = vcmp.eq.s32.totalorder %v8562_v50, %v6991_v41  ;;  %v7242_v41 = vld [vmem:[%s8421_s1 + $0xe0] sm:$0xff] }
 0x35c   : > { %4993 = vset.pattern.permute.xlu1 %v5170_v33  ;;  %2836 = vperm.xlu2 %4991, %v8558_v7   ;;  %v7133_v7 = vpop.permute.xlu2 %2463  ;;  %v7195_v33 = vpop.f32.mrf.mxu0 }
 0x35d   : > { %2842 = vperm.xlu1 %4993, %v8560_v36   ;;  %vm2501_vm2 = vcmp.eq.s32.totalorder %v5622_v15, %v7133_v7 }
 0x35f   : > { %v1817_v18 = vpop.f32.mrf.mxu1 }
 0x360   : > { %v1883_v19 = vadd.f32 %v1882_v59, %v1817_v18  ;;  %v1888_v59 = vpop.f32.mrf.mxu2  ;;  %v7140_v32 = vpop.f32.mrf.mxu3 }
 0x362   : > { %4478 = vmatmul.msk.f32.gmra.mxu0 %vm284_vm0, %v1883_v19  ;;  %4620 = vmatmul.msk.f32.gmra.mxu3 %vm2497_vm13, %v8547_v26 }
 0x363   : > { %4542 = vmatmul.msk.f32.gmra.mxu1 %vm2098_vm14, %v8547_v26  ;;  %2854 = vperm.xlu0 %4992, %v6450_v40   ;;  %v7147_v40 = vpop.permute.xlu0 %2466  ;;  %vm2484_vm14 = vcmp.eq.s32.totalorder %v8562_v50, %v7013_v57 }
 0x364   : > { %2845 = vperm.xlu2 %4991, %v6388_v49   ;;  %vm2503_vm4 = vcmp.eq.s32.totalorder %v5622_v15, %v7147_v40 }
 0x365   : > { %2848 = vperm.xlu1 %4993, %v6402_v37  }
 0x367   : > { %v1820_v52 = vpop.f32.mrf.mxu1 }
 0x368   : > { %v1886_v25 = vadd.f32 %v1885_v2, %v1820_v52  ;;  %v1891_v38 = vpop.f32.mrf.mxu2  ;;  %v7158_v9 = vpop.f32.mrf.mxu3 }
 0x36a   : > { %4479 = vmatmul.msk.f32.gmra.mxu0 %vm284_vm0, %v1886_v25  ;;  %4621 = vmatmul.msk.f32.gmra.mxu3 %vm2499_vm15, %v8547_v26  ;;  %vm2486_vm15 = vcmp.eq.s32.totalorder %v8562_v50, %v7037_v56 }
 0x36b   : > { %4543 = vmatmul.msk.f32.gmra.mxu1 %vm2100_vm1, %v8547_v26  ;;  %2863 = vperm.xlu0 %4992, %v6501_v0   ;;  %v7161_v0 = vpop.permute.xlu1 %2469  ;;  %vm2488_vm1 = vcmp.eq.s32.totalorder %v8562_v50, %v7061_v35 }
 0x36c   : > { %2851 = vperm.xlu2 %4991, %v6430_v22   ;;  %vm2505_vm6 = vcmp.eq.s32.totalorder %v5622_v15, %v7161_v0 }
 0x36d   : > { %2857 = vperm.xlu1 %4993, %v8564_v3   ;;  %v7165_v3 = vld [vmem:[%s5273_s17 + $0x40] sm:$0xff] }
 0x36f   : > { %v1823_v53 = vpop.f32.mrf.mxu1 }
 0x370   : > { %v1889_v36 = vadd.f32 %v1888_v59, %v1823_v53  ;;  %v1894_v22 = vpop.f32.mrf.mxu2  ;;  %v7178_v2 = vpop.f32.mrf.mxu3  ;;  %v7231_v59 = vld [vmem:[%s8421_s1 + $0xe8] sm:$0xff] }
 0x372   : > { %4480 = vmatmul.msk.f32.gmra.mxu0 %vm284_vm0, %v1889_v36  ;;  %4622 = vmatmul.msk.f32.gmra.mxu3 %vm2501_vm2, %v8547_v26  ;;  %vm2490_vm2 = vcmp.eq.s32.totalorder %v8562_v50, %v7079_v24 }
 0x373   : > { %4544 = vmatmul.msk.f32.gmra.mxu1 %vm2102_vm3, %v8547_v26  ;;  %2872 = vperm.xlu0 %4992, %v6546_v6   ;;  %v7176_v6 = vpop.permute.xlu2 %2472  ;;  %v7215_v17 = vpop.permute.xlu1 %2478  ;;  %vm2492_vm3 = vcmp.eq.s32.totalorder %v8562_v50, %v7088_v28 }
 0x374   : > { %2860 = vperm.xlu2 %4991, %v7165_v3   ;;  %vm2507_vm8 = vcmp.eq.s32.totalorder %v5622_v15, %v7176_v6  ;;  %vm2511_vm13 = vcmp.eq.s32.totalorder %v5622_v15, %v7215_v17 }
 0x375   : > { %2866 = vperm.xlu1 %4993, %v6434_v30   ;;  %v7182_v30 = vld [vmem:[%s5273_s17 + $0x58] sm:$0xff] }
 0x376   : > { %8612 = vst [vmem:[#allocation60_spill] sm:$0xff] %v7182_v30 }
 0x377   : > { %v1826_v37 = vpop.f32.mrf.mxu1 }
 0x378   : > { %v1892_v49 = vadd.f32 %v1891_v38, %v1826_v37  ;;  %v1897_v18 = vpop.f32.mrf.mxu2  ;;  %v7251_v37 = vld [vmem:[%s8421_s1 + $0xd8] sm:$0xff] }
 0x37a   : > { %4481 = vmatmul.msk.f32.gmra.mxu0 %vm284_vm0, %v1892_v49  ;;  %4623 = vmatmul.msk.f32.gmra.mxu3 %vm2503_vm4, %v8547_v26  ;;  %vm2494_vm4 = vcmp.eq.s32.totalorder %v8562_v50, %v7099_v61 }
 0x37b   : > { %4545 = vmatmul.msk.f32.gmra.mxu1 %vm2104_vm5, %v8547_v26  ;;  %2881 = vperm.xlu0 %4992, %v6592_v43   ;;  %v7193_v43 = vpop.permute.xlu0 %2475  ;;  %vm2496_vm5 = vcmp.eq.s32.totalorder %v8562_v50, %v7108_v21 }
 0x37c   : > { %2869 = vperm.xlu2 %4991, %v7182_v30   ;;  %vm2509_vm11 = vcmp.eq.s32.totalorder %v5622_v15, %v7193_v43 }
 0x37d   : > { %2875 = vperm.xlu1 %4993, %v8567_v27   ;;  %v7200_v27 = vpop.f32.mrf.mxu3 }
 0x37f   : > { %v1829_v39 = vpop.f32.mrf.mxu1 }
 0x380   : > { %v1895_v34 = vadd.f32 %v1894_v22, %v1829_v39  ;;  %v7267_v39 = vld [vmem:[%s8421_s1 + $0xc8] sm:$0xff] }
 0x382   : > { %4482 = vmatmul.msk.f32.gmra.mxu0 %vm284_vm0, %v1895_v34  ;;  %4624 = vmatmul.msk.f32.gmra.mxu3 %vm2505_vm6, %v8547_v26  ;;  %vm2498_vm6 = vcmp.eq.s32.totalorder %v8562_v50, %v7119_v51  ;;  %v5171_v51 = vmov 7  }
 0x383   : > { %4546 = vmatmul.msk.f32.gmra.mxu1 %vm2106_vm7, %v8547_v26  ;;  %vm2500_vm7 = vcmp.eq.s32.totalorder %v8562_v50, %v7133_v7  ;;  %4996 = vset.pattern.permute.xlu0 %v5171_v51  ;;  %v7369_v7 = vld [vmem:[%s5273_s17 + $0x10] sm:$0xff] }
 0x384   : > { %2878 = vperm.xlu2 %4991, %v6576_v31   ;;  %v7211_v31 = vld [vmem:[%s8421_s1 + $0xf8] sm:$0xff]  ;;  %3245 = vperm.xlu0 %4996, %v7369_v7  }
 0x385   : > { %v7236_v36 = vpop.f32.mrf.mxu3  ;;  %4994 = vset.pattern.permute.xlu1 %v5171_v51 }
 0x387   : > { %v1832_v42 = vpop.f32.mrf.mxu1 }
 0x388   : > { %v1898_v19 = vadd.f32 %v1897_v18, %v1832_v42  ;;  %v7275_v18 = vld [vmem:[%s8421_s1 + $0xc0] sm:$0xff]  ;;  %v7282_v42 = vld [vmem:[%s8421_s1 + $0xb8] sm:$0xff] }
 0x38a   : > { %4483 = vmatmul.msk.f32.gmra.mxu0 %vm284_vm0, %v1898_v19  ;;  %4625 = vmatmul.msk.f32.gmra.mxu3 %vm2507_vm8, %v8547_v26  ;;  %vm2502_vm8 = vcmp.eq.s32.totalorder %v8562_v50, %v7147_v40 }
 0x38b   : > { %4547 = vmatmul.msk.f32.gmra.mxu1 %vm2108_vm9, %v8547_v26  ;;  %vm2504_vm9 = vcmp.eq.s32.totalorder %v8562_v50, %v7161_v0 }
 0x38c   : > { %4995 = vset.pattern.permute.xlu2 %v5171_v51 }
 0x38d   : > { %v2214_v57 = vpop.f32.mrf.mxu3 }
 0x38f   : > { %v2255_v52 = vpop.f32.mrf.mxu1 }
 0x390   : > { %v2256_v14 = vadd.f32 %v2255_v52, %v7096_v13  ;;  %v7220_v13 = vld [vmem:[%s8421_s1 + $0xf0] sm:$0xff] }
 0x392   : > { %4548 = vmatmul.msk.f32.vlgmr.msrb.gmra.mxu2 %vm284_vm0, %v2256_v14  ;;  %4596 = vmatmul.msk.f32.vlgmr.msrb.gmra.mxu0 %vm2480_vm10, %v8547_v26  ;;  %v7296_v14 = vld [vmem:[%s8421_s1 + $0xa8] sm:$0xff]  ;;  %vm2506_vm10 = vcmp.eq.s32.totalorder %v8562_v50, %v7176_v6 }
 0x393   : > { %4626 = vmatmul.msk.f32.gmra.mxu3 %vm2509_vm11, %v8547_v26  ;;  %3447 = vmatpush.msrb.mxu2 %v7211_v31  ;;  %vm2508_vm11 = vcmp.eq.s32.totalorder %v8562_v50, %v7193_v43 }
 0x394   : > { %3574 = vmatpush.msrb.mxu0 %v6742_v48 }
 0x395   : > { %3448 = vmatpush.msrb.mxu2 %v7220_v13 }
 0x396   : > { %3575 = vmatpush.msrb.mxu0 %v6752_v16 }
 0x397   : > { %v7226_v25 = vpop.f32.mrf.mxu0  ;;  %3449 = vmatpush.msrb.mxu2 %v7231_v59 }
 0x398   : > { %v2258_v53 = vpop.f32.mrf.mxu1 }
 0x399   : > { %v2259_v38 = vadd.f32 %v2258_v53, %v7110_v8  ;;  %3450 = vmatpush.msrb.mxu2 %v7242_v41  ;;  %v7257_v8 = vld [vmem:[%s8421_s1 + $0xd0] sm:$0xff] }
 0x39a   : > { %4597 = vmatmul.msk.f32.gmra.mxu0 %vm2482_vm12, %v8547_v26  ;;  %vm2510_vm12 = vcmp.eq.s32.totalorder %v8562_v50, %v7215_v17 }
 0x39b   : > { %4549 = vmatmul.msk.f32.gmra.mxu2 %vm284_vm0, %v2259_v38  ;;  %4627 = vmatmul.msk.f32.gmra.mxu3 %vm2511_vm13, %v8547_v26  ;;  %v7306_v38 = vld [vmem:[%s8421_s1 + $0xa0] sm:$0xff] }
 0x39c   : > { %3451 = vmatpush.msrb.mxu2 %v7251_v37 }
 0x39e   : > { %3452 = vmatpush.msrb.mxu2 %v7257_v8 }
 0x39f   : > { %v7262_v49 = vpop.f32.mrf.mxu0 }
 0x3a0   : > { %v2261_v22 = vpop.f32.mrf.mxu1  ;;  %3453 = vmatpush.msrb.mxu2 %v7267_v39 }
 0x3a1   : > { %v2262_v34 = vadd.f32 %v2261_v22, %v7124_v45  ;;  %v7288_v45 = vld [vmem:[%s8421_s1 + $0xb0] sm:$0xff]  ;;  %v2217_v22 = vpop.f32.mrf.mxu3 }
 0x3a2   : > { %4598 = vmatmul.msk.f32.gmra.mxu0 %vm2484_vm14, %v8547_v26  ;;  %3454 = vmatpush.msrb.mxu2 %v7275_v18 }
 0x3a3   : > { %4550 = vmatmul.msk.f32.gmra.mxu2 %vm284_vm0, %v2262_v34 }
 0x3a4   : > { %3455 = vmatpush.msrb.mxu2 %v7282_v42 }
 0x3a6   : > { %3456 = vmatpush.msrb.mxu2 %v7288_v45 }
 0x3a7   : > { %v7291_v19 = vpop.f32.mrf.mxu0 }
 0x3a8   : > { %v2264_v52 = vpop.f32.mrf.mxu1  ;;  %3457 = vmatpush.msrb.mxu2 %v7296_v14 }
 0x3a9   : > { %v2265_v53 = vadd.f32 %v2264_v52, %v7140_v32 }
 0x3aa   : > { %4599 = vmatmul.msk.f32.gmra.mxu0 %vm2486_vm15, %v8547_v26  ;;  %3458 = vmatpush.msrb.mxu2 %v7306_v38 }
 0x3ab   : > { %4551 = vmatmul.msk.f32.gmra.mxu2 %vm284_vm0, %v2265_v53 }
 0x3ac   : > { %3459 = vmatpush.msrb.mxu2 %v6564_v62  ;;  %v2220_v62 = vpop.f32.mrf.mxu3 }
 0x3ae   : > { %3460 = vmatpush.msrb.mxu2 %v6571_v12 }
 0x3af   : > { %v7312_v34 = vpop.f32.mrf.mxu0 }
 0x3b0   : > { %v2267_v56 = vpop.f32.mrf.mxu1  ;;  %3461 = vmatpush.msrb.mxu2 %v6583_v5 }
 0x3b1   : > { %v2268_v32 = vadd.f32 %v2267_v56, %v7158_v9 }
 0x3b2   : > { %4600 = vmatmul.msk.f32.gmra.mxu0 %vm2488_vm1, %v8547_v26  ;;  %3462 = vmatpush.msrb.mxu2 %v6601_v1 }
 0x3b3   : > { %4552 = vmatmul.msk.f32.gmra.mxu2 %vm284_vm0, %v2268_v32 }
 0x3b4   : > { %v2223_v1 = vpop.f32.mrf.mxu3 }
 0x3b6   : > { %v2837_v17 = vpop.permute.xlu2 %2836 }
 0x3b7   : > { %v7321_v52 = vpop.f32.mrf.mxu0  ;;  %vm2884_vm13 = vcmp.eq.s32.totalorder %v5622_v15, %v2837_v17  ;;  %vm2883_vm14 = vcmp.eq.s32.totalorder %v8562_v50, %v2837_v17 }
 0x3b8   : > { %v2270_v12 = vpop.f32.mrf.mxu1 }
 0x3b9   : > { %v2271_v5 = vadd.f32 %v2270_v12, %v7178_v2 }
 0x3ba   : > { %4601 = vmatmul.msk.f32.gmra.mxu0 %vm2490_vm2, %v8547_v26 }
 0x3bb   : > { %4553 = vmatmul.msk.f32.gmra.mxu2 %vm284_vm0, %v2271_v5 }
 0x3bc   : > { %v2226_v32 = vpop.f32.mrf.mxu3 }
 0x3bf   : > { %v7328_v35 = vpop.f32.mrf.mxu0 }
 0x3c0   : > { %v2273_v9 = vpop.f32.mrf.mxu1 }
 0x3c1   : > { %v2274_v53 = vadd.f32 %v2273_v9, %v7200_v27 }
 0x3c2   : > { %4602 = vmatmul.msk.f32.gmra.mxu0 %vm2492_vm3, %v8547_v26 }
 0x3c3   : > { %4554 = vmatmul.msk.f32.gmra.mxu2 %vm284_vm0, %v2274_v53 }
 0x3c4   : > { %v2229_v5 = vpop.f32.mrf.mxu3 }
 0x3c7   : > { %v7335_v24 = vpop.f32.mrf.mxu0 }
 0x3c8   : > { %v2276_v2 = vpop.f32.mrf.mxu1 }
 0x3c9   : > { %v2277_v56 = vadd.f32 %v2276_v2, %v7236_v36 }
 0x3ca   : > { %4603 = vmatmul.msk.f32.gmra.mxu0 %vm2494_vm4, %v8547_v26 }
 0x3cb   : > { %4555 = vmatmul.msk.f32.gmra.mxu2 %vm284_vm0, %v2277_v56  ;;  %v7365_v56 = vld [vmem:[%s5273_s17 + $0x8] sm:$0xff] }
 0x3cc   : > { %v2232_v21 = vpop.f32.mrf.mxu3  ;;  %3242 = vperm.xlu2 %4995, %v7365_v56  }
 0x3cf   : > { %v7342_v28 = vpop.f32.mrf.mxu0 }
 0x3d0   : > { %v2279_v27 = vpop.f32.mrf.mxu1 }
 0x3d1   : > { %v2280_v12 = vadd.f32 %v2279_v27, %v2214_v57 }
 0x3d2   : > { %4604 = vmatmul.msk.f32.gmra.mxu0 %vm2496_vm5, %v8547_v26 }
 0x3d3   : > { %4556 = vmatmul.msk.f32.gmra.mxu2 %vm284_vm0, %v2280_v12 }
 0x3d4   : > { %v2235_v12 = vpop.f32.mrf.mxu3 }
 0x3d7   : > { %v7348_v61 = vpop.f32.mrf.mxu0 }
 0x3d8   : > { %v2282_v36 = vpop.f32.mrf.mxu1 }
 0x3d9   : > { %v2283_v9 = vadd.f32 %v2282_v36, %v2217_v22  ;;  %v7361_v22 = vld [vmem:[%s5273_s17] sm:$0xff] }
 0x3da   : > { %4605 = vmatmul.msk.f32.gmra.mxu0 %vm2498_vm6, %v8547_v26  ;;  %3239 = vperm.xlu1 %4994, %v7361_v22  }
 0x3db   : > { %4557 = vmatmul.msk.f32.gmra.mxu2 %vm284_vm0, %v2283_v9  ;;  %v7379_v9 = vld [vmem:[%s5273_s17 + $0x18] sm:$0xff] }
 0x3dc   : > { %v2658_v51 = vpop.f32.mrf.mxu3 }
 0x3df   : > { %v7354_v57 = vpop.f32.mrf.mxu0 }
 0x3e0   : > { %v2285_v53 = vpop.f32.mrf.mxu1 }
 0x3e1   : > { %v2286_v2 = vadd.f32 %v2285_v53, %v2220_v62  ;;  %v7383_v53 = vld [vmem:[%s5273_s17 + $0x20] sm:$0xff] }
 0x3e2   : > { %4606 = vmatmul.msk.f32.gmra.mxu0 %vm2500_vm7, %v8547_v26  ;;  %3248 = vperm.xlu1 %4994, %v7379_v9  }
 0x3e3   : > { %4558 = vmatmul.msk.f32.gmra.mxu2 %vm284_vm0, %v2286_v2  ;;  %3251 = vperm.xlu2 %4995, %v7383_v53   ;;  %v7387_v2 = vld [vmem:[%s5273_s17 + $0x38] sm:$0xff] }
 0x3e4   : > { %3260 = vperm.xlu0 %4996, %v7387_v2  }
 0x3e7   : > { %v7372_v62 = vpop.f32.mrf.mxu0 }
 0x3e8   : > { %v2288_v27 = vpop.f32.mrf.mxu1 }
 0x3e9   : > { %v2289_v36 = vadd.f32 %v2288_v27, %v2223_v1 }
 0x3ea   : > { %4607 = vmatmul.msk.f32.gmra.mxu0 %vm2502_vm8, %v8547_v26 }
 0x3eb   : > { %4559 = vmatmul.msk.f32.gmra.mxu2 %vm284_vm0, %v2289_v36  ;;  %v7397_v36 = vld [vmem:[%s5273_s17 + $0x28] sm:$0xff]  ;;  %3257 = vperm.xlu2 %4995, %v7401_v46  }
 0x3ec   : > { %3254 = vperm.xlu1 %4994, %v7397_v36   ;;  %3269 = vperm.xlu0 %4996, %v7405_v60  }
 0x3ef   : > { %v7390_v40 = vpop.f32.mrf.mxu0 }
 0x3f0   : > { %v2291_v1 = vpop.f32.mrf.mxu1 }
 0x3f1   : > { %v2292_v27 = vadd.f32 %v2291_v1, %v2226_v32 }
 0x3f2   : > { %4608 = vmatmul.msk.f32.gmra.mxu0 %vm2504_vm9, %v8547_v26 }
 0x3f3   : > { %4560 = vmatmul.msk.f32.gmra.mxu2 %vm284_vm0, %v2292_v27  ;;  %v2661_v27 = vpop.f32.mrf.mxu3  ;;  %3266 = vperm.xlu2 %4995, %v7416_v55   ;;  %v7449_v55 = vld [vmem:[%s5273_s17 + $0x70] sm:$0xff] }
 0x3f4   : > { %3263 = vperm.xlu1 %4994, %v7165_v3   ;;  %3278 = vperm.xlu0 %4996, %v7420_v54   ;;  %8622 = vst [vmem:[#allocation37_spill] sm:$0xff] %v7449_v55 }
 0x3f7   : > { %v7408_v0 = vpop.f32.mrf.mxu0 }
 0x3f8   : > { %8614 = vst [vmem:[#allocation28_spill] sm:$0xff] %v7408_v0  ;;  %v2294_v32 = vpop.f32.mrf.mxu1 }
 0x3f9   : > { %v2295_v1 = vadd.f32 %v2294_v32, %v2229_v5 }
 0x3fa   : > { %4609 = vmatmul.msk.f32.gmra.mxu0 %vm2506_vm10, %v8547_v26 }
 0x3fb   : > { %4561 = vmatmul.msk.f32.gmra.mxu2 %vm284_vm0, %v2295_v1  ;;  %v7430_v32 = vpop.f32.mrf.mxu3  ;;  %v7433_v1 = vld [vmem:[%s5273_s17 + $0x60] sm:$0xff] }
 0x3fc   : > { %3272 = vperm.xlu1 %4994, %v7182_v30   ;;  %8618 = vst [vmem:[#allocation34_spill] sm:$0xff] %v7433_v1  ;;  %3275 = vperm.xlu2 %4995, %v7433_v1  }
 0x3ff   : > { %v7423_v60 = vpop.f32.mrf.mxu0 }
 0x400   : > { %8617 = vst [vmem:[#allocation33_spill] sm:$0xff] %v7423_v60  ;;  %v2297_v6 = vpop.f32.mrf.mxu1 }
 0x401   : > { %v2298_v5 = vadd.f32 %v2297_v6, %v2232_v21  ;;  %v8620_v21 = vld [vmem:[#allocation6_spill] sm:$0xff] }
 0x402   : > { %4610 = vmatmul.msk.f32.gmra.mxu0 %vm2508_vm11, %v8547_v26  ;;  %v7442_v6 = vadd.f32 %v6946_v11, %v8620_v21 }
 0x403   : > { %4562 = vmatmul.msk.f32.gmra.mxu2 %vm284_vm0, %v2298_v5  ;;  %v8621_v5 = vld [vmem:[#allocation26_spill] sm:$0xff] }
 0x404   : > { %v757_v30 = vadd.f32 %v8621_v5, %v7442_v6  ;;  %3281 = vperm.xlu1 %4994, %v7449_v55   ;;  %v1563_v5 = vadd.f32 %v6760_v20, %v7442_v6 }
 0x406   : > { %v804_v21 = vmax.f32 %v757_v30, 0.0  ;;  %v8625_v30 = vld [vmem:[#allocation32_spill] sm:$0xff] }
 0x407   : > { %v7436_v54 = vpop.f32.mrf.mxu0 }
 0x408   : > { %8619 = vst [vmem:[#allocation36_spill] sm:$0xff] %v7436_v54  ;;  %v2300_v60 = vpop.f32.mrf.mxu1  ;;  %v7453_v54 = vld [vmem:[%s5273_s17 + $0x78] sm:$0xff]  ;;  %s4072_s17 = scalar_lea.hbm %s8425_s5, %s4147_s8 }
 0x409   : > { %v2301_v43 = vadd.f32 %v2300_v60, %v2235_v12  ;;  %8623 = vst [vmem:[#allocation39_spill] sm:$0xff] %v7453_v54  ;;  %3284 = vperm.xlu2 %4995, %v7453_v54   ;;  %v1160_v60 = vadd.f32 %v6734_v63, %v7442_v6  ;;  %v7458_v12 = vpop.f32.mrf.mxu3  ;;  %v1966_v54 = vadd.f32 %v7195_v33, %v7442_v6  ;;  %v8624_v63 = vld [vmem:[#allocation7_spill] sm:$0xff]  ;;  %v2840_v33 = vpop.permute.xlu0 %2839  ;;  %s4075_s23 = sshll.u32 %s4072_s17, 4  ;;  %s4076_s23 = int_to_ptr.hbm [resolvable:$true] %s4075_s23 }
 0x40a   : > { %4611 = vmatmul.msk.f32.gmra.mxu0 %vm2510_vm12, %v8547_v26  ;;  %v7470_v0 = vadd.f32 %v6946_v11, %v8624_v63  ;;  %vm2886_vm15 = vcmp.eq.s32.totalorder %v5622_v15, %v2840_v33  ;;  %vm2885_vm1 = vcmp.eq.s32.totalorder %v8562_v50, %v2840_v33  ;;  %v2843_v63 = vpop.permute.xlu1 %2842  ;;  %s5113_s8 = sshra.s32 %s4076_s23, 4  ;;  %s5114_s8 = int_to_ptr.hbm [resolvable:$true] %s5113_s8 }
 0x40b   : > { %4563 = vmatmul.msk.f32.gmra.mxu2 %vm284_vm0, %v2301_v43  ;;  %v1207_v1 = vmax.f32 %v804_v21, %v1160_v60  ;;  %vm2888_vm2 = vcmp.eq.s32.totalorder %v5622_v15, %v2843_v63  ;;  %vm2887_vm3 = vcmp.eq.s32.totalorder %v8562_v50, %v2843_v63  ;;  %v8631_v63 = vld [vmem:[#allocation46_spill] sm:$0xff]  ;;  %s5115_s26 = scalar_lea.hbm %s5114_s8, 128  ;;  %p5120_p0 = scmp.lt.s32.totalorder %s5114_s8, %s8425_s5 }
 0x40c   : > { %p5116_p11 = scmp.ne.s32.totalorder %s5114_s8, %s5115_s26  ;;  %p5121_p1 = scmp.lt.s32.totalorder %s5119_s7, %s5115_s26 }
 0x40d   : > { %v1610_v20 = vmax.f32 %v1207_v1, %v1563_v5 }
 0x40e   : > { %p5117_p12 = pnand %p5116_p11, %p5243_p5  ;;  %p5122_p2 = por %p5121_p1, %p5120_p0 }
 0x40f   : > { %v2593_v43 = vpop.f32.mrf.mxu0 }
 0x410   : > { %v2659_v55 = vadd.f32 %v2658_v51, %v2593_v43  ;;  %v760_v51 = vadd.f32 %v8625_v30, %v7470_v0  ;;  %v1566_v43 = vadd.f32 %v6775_v23, %v7470_v0  ;;  %v8627_v23 = vld [vmem:[#allocation38_spill] sm:$0xff]  ;;  %p5118_p13 = pneg %p5117_p12 }
 0x411   : > { %v7493_v21 = vpop.f32.mrf.mxu3 }
 0x412   : > { %4628 = vmatmul.msk.f32.vlgmr.msra.gmra.mxu1 %vm284_vm0, %v2659_v55  ;;  %4692 = vmatmul.msk.f32.vlgmr.msra.gmra.mxu0 %vm2884_vm13, %v8547_v26  ;;  %v7478_v55 = vmax.f32 %v1610_v20, %v1966_v54  ;;  %v805_v1 = vmax.f32 %v760_v51, 0.0  ;;  %p5123_p3 = pnand %p5122_p2, %p5118_p13 }
 0x413   : > { %4676 = vmatmul.msk.f32.vlgmr.msra.gmra.mxu2 %vm2883_vm14, %v8547_v26  ;;  %3850 = vmatpush.msra.mxu1 %v7211_v31  ;;  %v1163_v31 = vadd.f32 %v6758_v58, %v7470_v0 }
 0x414   : > { %3977 = vmatpush.msra.mxu2 %v6742_v48 }
 0x415   : > { %v2368_v60 = vpop.f32.mrf.mxu2  ;;  %3851 = vmatpush.msra.mxu1 %v7220_v13 }
 0x416   : > { %v7481_v17 = vadd.f32 %v2368_v60, %v7442_v6  ;;  %3978 = vmatpush.msra.mxu2 %v6752_v16  ;;  %v8626_v16 = vld [vmem:[#allocation8_spill] sm:$0xff] }
 0x417   : > { %v2596_v48 = vpop.f32.mrf.mxu0  ;;  %3852 = vmatpush.msra.mxu1 %v7231_v59  ;;  %v7500_v58 = vadd.f32 %v6946_v11, %v8626_v16  ;;  %v1208_v59 = vmax.f32 %v805_v1, %v1163_v31  ;;  %v8628_v31 = vld [vmem:[#allocation9_spill] sm:$0xff] }
 0x418   : > { %v2662_v13 = vadd.f32 %v2661_v27, %v2596_v48  ;;  %v1969_v27 = vadd.f32 %v7226_v25, %v7470_v0 }
 0x419   : > { %3853 = vmatpush.msra.mxu1 %v7242_v41  ;;  %v763_v5 = vadd.f32 %v8627_v23, %v7500_v58  ;;  %v1611_v41 = vmax.f32 %v1208_v59, %v1566_v43  ;;  %v1166_v30 = vadd.f32 %v6773_v4, %v7500_v58  ;;  %v1569_v33 = vadd.f32 %v6790_v29, %v7500_v58  ;;  %v8629_v29 = vld [vmem:[#allocation44_spill] sm:$0xff]  ;;  %v2846_v23 = vpop.permute.xlu2 %2845  ;;  %v8656_v4 = vld [vmem:[#allocation66_spill] sm:$0xff] }
 0x41a   : > { %4629 = vmatmul.msk.f32.gmra.mxu1 %vm284_vm0, %v2662_v13  ;;  %4693 = vmatmul.msk.f32.gmra.mxu0 %vm2886_vm15, %v8547_v26  ;;  %v7533_v13 = vpop.f32.mrf.mxu3  ;;  %vm2890_vm4 = vcmp.eq.s32.totalorder %v5622_v15, %v2846_v23  ;;  %vm2889_vm5 = vcmp.eq.s32.totalorder %v8562_v50, %v2846_v23 }
 0x41b   : > { %4677 = vmatmul.msk.f32.gmra.mxu2 %vm2885_vm1, %v8547_v26  ;;  %3854 = vmatpush.msra.mxu1 %v7251_v37  ;;  %v7511_v51 = vmax.f32 %v1611_v41, %v1969_v27 }
 0x41d   : > { %3855 = vmatpush.msra.mxu1 %v7257_v8  ;;  %v806_v8 = vmax.f32 %v763_v5, 0.0 }
 0x41e   : > { %v2371_v20 = vpop.f32.mrf.mxu2 }
 0x41f   : > { %v7515_v25 = vadd.f32 %v2371_v20, %v7470_v0  ;;  %v2599_v60 = vpop.f32.mrf.mxu0  ;;  %3856 = vmatpush.msra.mxu1 %v7267_v39  ;;  %v7529_v39 = vadd.f32 %v6946_v11, %v8628_v31  ;;  %v1209_v48 = vmax.f32 %v806_v8, %v1166_v30 }
 0x420   : > { %v2665_v37 = vadd.f32 %v7430_v32, %v2599_v60  ;;  %v1972_v32 = vadd.f32 %v7262_v49, %v7500_v58 }
 0x421   : > { %3857 = vmatpush.msra.mxu1 %v7275_v18  ;;  %v766_v18 = vadd.f32 %v8629_v29, %v7529_v39  ;;  %v1612_v1 = vmax.f32 %v1209_v48, %v1569_v33  ;;  %v1169_v16 = vadd.f32 %v6788_v10, %v7529_v39  ;;  %v1572_v41 = vadd.f32 %v6805_v47, %v7529_v39  ;;  %v2849_v29 = vpop.permute.xlu1 %2848 }
 0x422   : > { %4630 = vmatmul.msk.f32.gmra.mxu1 %vm284_vm0, %v2665_v37  ;;  %4694 = vmatmul.msk.f32.gmra.mxu0 %vm2888_vm2, %v8547_v26  ;;  %v1975_v47 = vadd.f32 %v7291_v19, %v7529_v39  ;;  %v2676_v60 = vpop.f32.mrf.mxu3  ;;  %v5095_v37 = vld [vmem:[%s8421_s1 + $0x90] sm:$0xff]  ;;  %vm2892_vm6 = vcmp.eq.s32.totalorder %v5622_v15, %v2849_v29  ;;  %vm2891_vm7 = vcmp.eq.s32.totalorder %v8562_v50, %v2849_v29 }
 0x423   : > { %4678 = vmatmul.msk.f32.gmra.mxu2 %vm2887_vm3, %v8547_v26  ;;  %3858 = vmatpush.msra.mxu1 %v7282_v42  ;;  %v7542_v59 = vmax.f32 %v1612_v1, %v1972_v32  ;;  %v807_v5 = vmax.f32 %v766_v18, 0.0  ;;  %v5096_v32 = vld [vmem:[%s8421_s1 + $0x88] sm:$0xff] }
 0x425   : > { %3859 = vmatpush.msra.mxu1 %v7288_v45  ;;  %v8630_v45 = vld [vmem:[#allocation10_spill] sm:$0xff] }
 0x426   : > { %v2374_v43 = vpop.f32.mrf.mxu2 }
 0x427   : > { %v7545_v49 = vadd.f32 %v2374_v43, %v7500_v58  ;;  %v2602_v27 = vpop.f32.mrf.mxu0  ;;  %3860 = vmatpush.msra.mxu1 %v7296_v14  ;;  %v7560_v14 = vadd.f32 %v6946_v11, %v8630_v45  ;;  %v8632_v43 = vld [vmem:[#allocation29_spill] sm:$0xff] }
 0x428   : > { %v2668_v42 = vadd.f32 %v7458_v12, %v2602_v27  ;;  %v1210_v12 = vmax.f32 %v807_v5, %v1169_v16  ;;  %v5097_v27 = vld [vmem:[%s8421_s1 + $0x80] sm:$0xff] }
 0x429   : > { %3861 = vmatpush.msra.mxu1 %v7306_v38  ;;  %v5094_v38 = vld [vmem:[%s8421_s1 + $0x98] sm:$0xff]  ;;  %v769_v20 = vadd.f32 %v8631_v63, %v7560_v14  ;;  %v1172_v19 = vadd.f32 %v6803_v44, %v7560_v14  ;;  %v1575_v16 = vadd.f32 %v8632_v43, %v7560_v14  ;;  %v1978_v5 = vadd.f32 %v7312_v34, %v7560_v14 }
 0x42a   : > { %4631 = vmatmul.msk.f32.gmra.mxu1 %vm284_vm0, %v2668_v42  ;;  %4695 = vmatmul.msk.f32.gmra.mxu0 %vm2890_vm4, %v8547_v26  ;;  %v1613_v30 = vmax.f32 %v1210_v12, %v1572_v41  ;;  %v8634_v41 = vld [vmem:[#allocation47_spill] sm:$0xff]  ;;  %v8652_v44 = vld [vmem:[#allocation64_spill] sm:$0xff] }
 0x42b   : > { %4679 = vmatmul.msk.f32.gmra.mxu2 %vm2889_vm5, %v8547_v26  ;;  %3862 = vmatpush.msra.mxu1 %v5094_v38  ;;  %v808_v1 = vmax.f32 %v769_v20, 0.0  ;;  %v8635_v38 = vld [vmem:[#allocation23_spill] sm:$0xff] }
 0x42c   : > { %v7575_v33 = vmax.f32 %v1613_v30, %v1975_v47  ;;  %v2679_v30 = vpop.f32.mrf.mxu3 }
 0x42d   : > { %3863 = vmatpush.msra.mxu1 %v5095_v37  ;;  %v1211_v42 = vmax.f32 %v808_v1, %v1172_v19  ;;  %v2852_v19 = vpop.permute.xlu2 %2851  ;;  %v8637_v1 = vld [vmem:[#allocation12_spill] sm:$0xff] }
 0x42e   : > { %v2377_v8 = vpop.f32.mrf.mxu2  ;;  %vm2894_vm8 = vcmp.eq.s32.totalorder %v5622_v15, %v2852_v19  ;;  %vm2893_vm9 = vcmp.eq.s32.totalorder %v8562_v50, %v2852_v19  ;;  %v7622_v43 = vadd.f32 %v6946_v11, %v8637_v1 }
 0x42f   : > { %v7578_v31 = vadd.f32 %v2377_v8, %v7529_v39  ;;  %v2605_v48 = vpop.f32.mrf.mxu0  ;;  %3864 = vmatpush.msra.mxu1 %v5096_v32  ;;  %v1614_v12 = vmax.f32 %v1211_v42, %v1575_v16  ;;  %v8636_v32 = vld [vmem:[#allocation41_spill] sm:$0xff] }
 0x430   : > { %v2671_v18 = vadd.f32 %v7493_v21, %v2605_v48  ;;  %v8633_v21 = vld [vmem:[#allocation11_spill] sm:$0xff] }
 0x431   : > { %3865 = vmatpush.msra.mxu1 %v5097_v27  ;;  %v7597_v23 = vadd.f32 %v6946_v11, %v8633_v21  ;;  %v7606_v20 = vmax.f32 %v1614_v12, %v1978_v5  ;;  %v8638_v27 = vld [vmem:[#allocation48_spill] sm:$0xff] }
 0x432   : > { %4632 = vmatmul.msk.f32.gmra.mxu1 %vm284_vm0, %v2671_v18  ;;  %4696 = vmatmul.msk.f32.gmra.mxu0 %vm2892_vm6, %v8547_v26  ;;  %v775_v21 = vadd.f32 %v8638_v27, %v7622_v43 }
 0x433   : > { %4680 = vmatmul.msk.f32.gmra.mxu2 %vm2891_vm7, %v8547_v26  ;;  %v772_v45 = vadd.f32 %v8634_v41, %v7597_v23  ;;  %v1175_v63 = vadd.f32 %v8635_v38, %v7597_v23  ;;  %v1578_v29 = vadd.f32 %v8636_v32, %v7597_v23  ;;  %v1981_v16 = vadd.f32 %v7321_v52, %v7597_v23  ;;  %v8639_v41 = vld [vmem:[#allocation35_spill] sm:$0xff]  ;;  %v8640_v52 = vld [vmem:[#allocation62_spill] sm:$0xff]  ;;  %v8648_v32 = vld [vmem:[#allocation61_spill] sm:$0xff] }
 0x434   : > { %v810_v19 = vmax.f32 %v775_v21, 0.0 }
 0x435   : > { %v809_v48 = vmax.f32 %v772_v45, 0.0  ;;  %v1178_v45 = vadd.f32 %v8639_v41, %v7622_v43 }
 0x436   : > { %v2380_v47 = vpop.f32.mrf.mxu2 }
 0x437   : > { %v7609_v37 = vadd.f32 %v2380_v47, %v7560_v14  ;;  %v2608_v8 = vpop.f32.mrf.mxu0 }
 0x438   : > { %v2674_v34 = vadd.f32 %v7533_v13, %v2608_v8  ;;  %v1212_v13 = vmax.f32 %v809_v48, %v1175_v63  ;;  %v2855_v63 = vpop.permute.xlu0 %2854  ;;  %v2682_v48 = vpop.f32.mrf.mxu3 }
 0x439   : > { %vm2896_vm10 = vcmp.eq.s32.totalorder %v5622_v15, %v2855_v63  ;;  %vm2895_vm11 = vcmp.eq.s32.totalorder %v8562_v50, %v2855_v63 }
 0x43a   : > { %4633 = vmatmul.msk.f32.gmra.mxu1 %vm284_vm0, %v2674_v34  ;;  %4697 = vmatmul.msk.f32.gmra.mxu0 %vm2894_vm8, %v8547_v26  ;;  %v1615_v42 = vmax.f32 %v1212_v13, %v1578_v29  ;;  %v1581_v34 = vadd.f32 %v8640_v52, %v7622_v43  ;;  %v8641_v29 = vld [vmem:[#allocation13_spill] sm:$0xff]  ;;  %v1984_v13 = vadd.f32 %v7328_v35, %v7622_v43 }
 0x43b   : > { %4681 = vmatmul.msk.f32.gmra.mxu2 %vm2893_vm9, %v8547_v26  ;;  %v7646_v1 = vadd.f32 %v6946_v11, %v8641_v29  ;;  %v8644_v35 = vld [vmem:[#allocation57_spill] sm:$0xff] }
 0x43c   : > { %v7631_v12 = vmax.f32 %v1615_v42, %v1981_v16  ;;  %v8642_v16 = vld [vmem:[#allocation49_spill] sm:$0xff] }
 0x43d   : > { %v778_v27 = vadd.f32 %v8642_v16, %v7646_v1  ;;  %v1584_v52 = vadd.f32 %v8644_v35, %v7646_v1  ;;  %v7671_v29 = vld [vmem:[%s8424_s4] ss:$0 sm:$0xff]  ;;  %v1987_v16 = vadd.f32 %v7335_v24, %v7646_v1 }
 0x43e   : > { %v2383_v5 = vpop.f32.mrf.mxu2 }
 0x43f   : > { %v7634_v47 = vadd.f32 %v2383_v5, %v7597_v23  ;;  %v2611_v38 = vpop.f32.mrf.mxu0  ;;  %v8643_v5 = vld [vmem:[#allocation58_spill] sm:$0xff] }
 0x440   : > { %v2677_v8 = vadd.f32 %v2676_v60, %v2611_v38  ;;  %v1213_v60 = vmax.f32 %v810_v19, %v1178_v45  ;;  %v1181_v41 = vadd.f32 %v8643_v5, %v7646_v1  ;;  %v2858_v45 = vpop.permute.xlu1 %2857  ;;  %v811_v19 = vmax.f32 %v778_v27, 0.0  ;;  %v2685_v27 = vpop.f32.mrf.mxu3 }
 0x441   : > { %vm2898_vm12 = vcmp.eq.s32.totalorder %v5622_v15, %v2858_v45  ;;  %vm2897_vm13 = vcmp.eq.s32.totalorder %v8562_v50, %v2858_v45  ;;  %v8647_v45 = vld [vmem:[#allocation59_spill] sm:$0xff] }
 0x442   : > { %4634 = vmatmul.msk.f32.gmra.mxu1 %vm284_vm0, %v2677_v8  ;;  %4698 = vmatmul.msk.f32.gmra.mxu0 %vm2896_vm10, %v8547_v26  ;;  %v1616_v21 = vmax.f32 %v1213_v60, %v1581_v34 }
 0x443   : > { %4682 = vmatmul.msk.f32.gmra.mxu2 %vm2895_vm11, %v8547_v26 }
 0x444   : > { %v7655_v38 = vmax.f32 %v1616_v21, %v1984_v13  ;;  %v1214_v13 = vmax.f32 %v811_v19, %v1181_v41  ;;  %v8646_v21 = vld [vmem:[#allocation50_spill] sm:$0xff]  ;;  %v2861_v19 = vpop.permute.xlu2 %2860 }
 0x445   : > { %vm2900_vm14 = vcmp.eq.s32.totalorder %v5622_v15, %v2861_v19  ;;  %vm2899_vm15 = vcmp.eq.s32.totalorder %v8562_v50, %v2861_v19 }
 0x446   : > { %v2386_v42 = vpop.f32.mrf.mxu2  ;;  %v1617_v5 = vmax.f32 %v1214_v13, %v1584_v52  ;;  %v8649_v13 = vld [vmem:[#allocation15_spill] sm:$0xff] }
 0x447   : > { %v7658_v63 = vadd.f32 %v2386_v42, %v7622_v43  ;;  %v2614_v11 = vpop.f32.mrf.mxu0 }
 0x448   : > { %v2680_v8 = vadd.f32 %v2679_v30, %v2614_v11  ;;  %v8645_v30 = vld [vmem:[#allocation14_spill] sm:$0xff]  ;;  %v7684_v35 = vmax.f32 %v1617_v5, %v1987_v16  ;;  %v7699_v16 = vadd.f32 %v7671_v29, %v8649_v13 }
 0x449   : > { %v7675_v60 = vadd.f32 %v7671_v29, %v8645_v30 }
 0x44a   : > { %4635 = vmatmul.msk.f32.gmra.mxu1 %vm284_vm0, %v2680_v8  ;;  %4699 = vmatmul.msk.f32.gmra.mxu0 %vm2898_vm12, %v8547_v26  ;;  %v1590_v10 = vadd.f32 %v8652_v44, %v7699_v16  ;;  %v8654_v44 = vld [vmem:[#allocation52_spill] sm:$0xff] }
 0x44b   : > { %4683 = vmatmul.msk.f32.gmra.mxu2 %vm2897_vm13, %v8547_v26  ;;  %v781_v42 = vadd.f32 %v8646_v21, %v7675_v60  ;;  %v1184_v8 = vadd.f32 %v8647_v45, %v7675_v60  ;;  %v1587_v18 = vadd.f32 %v8648_v32, %v7675_v60  ;;  %v1990_v21 = vadd.f32 %v7342_v28, %v7675_v60  ;;  %v8650_v32 = vld [vmem:[#allocation51_spill] sm:$0xff] }
 0x44d   : > { %v812_v24 = vmax.f32 %v781_v42, 0.0  ;;  %v784_v42 = vadd.f32 %v8650_v32, %v7699_v16  ;;  %v1993_v32 = vadd.f32 %v7348_v61, %v7699_v16 }
 0x44e   : > { %v2389_v11 = vpop.f32.mrf.mxu2 }
 0x44f   : > { %v7687_v30 = vadd.f32 %v2389_v11, %v7646_v1  ;;  %v2617_v41 = vpop.f32.mrf.mxu0  ;;  %v2688_v11 = vpop.f32.mrf.mxu3  ;;  %v813_v28 = vmax.f32 %v784_v42, 0.0 }
 0x450   : > { %v2683_v34 = vadd.f32 %v2682_v48, %v2617_v41  ;;  %v1215_v48 = vmax.f32 %v812_v24, %v1184_v8  ;;  %v2864_v24 = vpop.permute.xlu0 %2863 }
 0x451   : > { %vm2902_vm1 = vcmp.eq.s32.totalorder %v5622_v15, %v2864_v24  ;;  %vm2901_vm2 = vcmp.eq.s32.totalorder %v8562_v50, %v2864_v24 }
 0x452   : > { %4636 = vmatmul.msk.f32.gmra.mxu1 %vm284_vm0, %v2683_v34  ;;  %4700 = vmatmul.msk.f32.gmra.mxu0 %vm2900_vm14, %v8547_v26  ;;  %v1618_v5 = vmax.f32 %v1215_v48, %v1587_v18  ;;  %v8651_v34 = vld [vmem:[#allocation5_spill] sm:$0xff]  ;;  %v8653_v48 = vld [vmem:[#allocation16_spill] sm:$0xff] }
 0x453   : > { %4684 = vmatmul.msk.f32.gmra.mxu2 %vm2899_vm15, %v8547_v26  ;;  %v1187_v41 = vadd.f32 %v8651_v34, %v7699_v16  ;;  %v8655_v34 = vld [vmem:[#allocation63_spill] sm:$0xff] }
 0x454   : > { %v7708_v19 = vmax.f32 %v1618_v5, %v1990_v21  ;;  %v7723_v21 = vadd.f32 %v7671_v29, %v8653_v48 }
 0x456   : > { %v2392_v45 = vpop.f32.mrf.mxu2  ;;  %v787_v42 = vadd.f32 %v8654_v44, %v7723_v21  ;;  %v1593_v54 = vadd.f32 %v8656_v4, %v7723_v21  ;;  %v1996_v44 = vadd.f32 %v7354_v57, %v7723_v21  ;;  %v5172_v4 = vmov 8  }
 0x457   : > { %v7711_v13 = vadd.f32 %v2392_v45, %v7675_v60  ;;  %v2620_v8 = vpop.f32.mrf.mxu0  ;;  %v2691_v24 = vpop.f32.mrf.mxu3  ;;  %4998 = vset.pattern.permute.xlu1 %v5172_v4  ;;  %4997 = vset.pattern.permute.xlu0 %v5172_v4 }
 0x458   : > { %v2686_v52 = vadd.f32 %v2685_v27, %v2620_v8  ;;  %v1216_v27 = vmax.f32 %v813_v28, %v1187_v41  ;;  %v2867_v28 = vpop.permute.xlu1 %2866  ;;  %v814_v61 = vmax.f32 %v787_v42, 0.0  ;;  %v8658_v42 = vld [vmem:[#allocation53_spill] sm:$0xff]  ;;  %3645 = vperm.xlu1 %4998, %v7365_v56   ;;  %3642 = vperm.xlu0 %4997, %v7361_v22   ;;  %v8660_v56 = vld [vmem:[#allocation68_spill] sm:$0xff] }
 0x459   : > { %vm2904_vm3 = vcmp.eq.s32.totalorder %v5622_v15, %v2867_v28  ;;  %vm2903_vm4 = vcmp.eq.s32.totalorder %v8562_v50, %v2867_v28  ;;  %4999 = vset.pattern.permute.xlu2 %v5172_v4 }
 0x45a   : > { %4637 = vmatmul.msk.f32.gmra.mxu1 %vm284_vm0, %v2686_v52  ;;  %4701 = vmatmul.msk.f32.gmra.mxu0 %vm2902_vm1, %v8547_v26  ;;  %v1619_v5 = vmax.f32 %v1216_v27, %v1590_v10  ;;  %v1190_v52 = vadd.f32 %v8655_v34, %v7723_v21  ;;  %v8657_v27 = vld [vmem:[#allocation17_spill] sm:$0xff] }
 0x45b   : > { %4685 = vmatmul.msk.f32.gmra.mxu2 %vm2901_vm2, %v8547_v26  ;;  %v8659_v34 = vld [vmem:[#allocation65_spill] sm:$0xff]  ;;  %3648 = vperm.xlu2 %4999, %v7369_v7  }
 0x45c   : > { %v7732_v8 = vmax.f32 %v1619_v5, %v1993_v32  ;;  %v7747_v32 = vadd.f32 %v7671_v29, %v8657_v27 }
 0x45e   : > { %v2395_v45 = vpop.f32.mrf.mxu2  ;;  %v790_v5 = vadd.f32 %v8658_v42, %v7747_v32  ;;  %v1999_v42 = vadd.f32 %v7372_v62, %v7747_v32 }
 0x45f   : > { %v7735_v48 = vadd.f32 %v2395_v45, %v7699_v16  ;;  %v2623_v41 = vpop.f32.mrf.mxu0  ;;  %v2694_v22 = vpop.f32.mrf.mxu3 }
 0x460   : > { %v2689_v18 = vadd.f32 %v2688_v11, %v2623_v41  ;;  %v1217_v11 = vmax.f32 %v814_v61, %v1190_v52  ;;  %v1193_v52 = vadd.f32 %v8659_v34, %v7747_v32  ;;  %v2870_v61 = vpop.permute.xlu2 %2869  ;;  %3651 = vperm.xlu1 %4998, %v7379_v9   ;;  %3657 = vperm.xlu0 %4997, %v7397_v36  }
 0x461   : > { %vm2906_vm5 = vcmp.eq.s32.totalorder %v5622_v15, %v2870_v61  ;;  %vm2905_vm6 = vcmp.eq.s32.totalorder %v8562_v50, %v2870_v61 }
 0x462   : > { %4638 = vmatmul.msk.f32.gmra.mxu1 %vm284_vm0, %v2689_v18  ;;  %4702 = vmatmul.msk.f32.gmra.mxu0 %vm2904_vm3, %v8547_v26  ;;  %v1620_v45 = vmax.f32 %v1217_v11, %v1593_v54  ;;  %v815_v54 = vmax.f32 %v790_v5, 0.0  ;;  %v1596_v11 = vadd.f32 %v8660_v56, %v7747_v32  ;;  %v8662_v5 = vld [vmem:[#allocation54_spill] sm:$0xff] }
 0x463   : > { %4686 = vmatmul.msk.f32.gmra.mxu2 %vm2903_vm4, %v8547_v26  ;;  %3654 = vperm.xlu2 %4999, %v7383_v53  }
 0x464   : > { %v7758_v41 = vmax.f32 %v1620_v45, %v1996_v44  ;;  %v8661_v44 = vld [vmem:[#allocation18_spill] sm:$0xff] }
 0x465   : > { %v7774_v7 = vadd.f32 %v7671_v29, %v8661_v44 }
 0x466   : > { %v2398_v18 = vpop.f32.mrf.mxu2 }
 0x467   : > { %v7761_v57 = vadd.f32 %v2398_v18, %v7723_v21  ;;  %v2626_v28 = vpop.f32.mrf.mxu0  ;;  %v793_v45 = vadd.f32 %v8662_v5, %v7774_v7  ;;  %v2697_v5 = vpop.f32.mrf.mxu3 }
 0x468   : > { %v2692_v27 = vadd.f32 %v2691_v24, %v2626_v28  ;;  %v1218_v24 = vmax.f32 %v815_v54, %v1193_v52  ;;  %v8663_v28 = vld [vmem:[#allocation67_spill] sm:$0xff]  ;;  %v2873_v54 = vpop.permute.xlu0 %2872  ;;  %3660 = vperm.xlu1 %4998, %v7401_v46   ;;  %3666 = vperm.xlu0 %4997, %v7165_v3  }
 0x469   : > { %v1196_v61 = vadd.f32 %v8663_v28, %v7774_v7  ;;  %v816_v44 = vmax.f32 %v793_v45, 0.0  ;;  %vm2908_vm7 = vcmp.eq.s32.totalorder %v5622_v15, %v2873_v54  ;;  %vm2907_vm8 = vcmp.eq.s32.totalorder %v8562_v50, %v2873_v54  ;;  %v8667_v45 = vld [vmem:[#allocation55_spill] sm:$0xff]  ;;  %v2876_v28 = vpop.permute.xlu1 %2875  ;;  %v8668_v54 = vld [vmem:[#allocation69_spill] sm:$0xff] }
 0x46a   : > { %4639 = vmatmul.msk.f32.gmra.mxu1 %vm284_vm0, %v2692_v27  ;;  %4703 = vmatmul.msk.f32.gmra.mxu0 %vm2906_vm5, %v8547_v26  ;;  %v1621_v18 = vmax.f32 %v1218_v24, %v1596_v11  ;;  %v8664_v11 = vld [vmem:[#allocation70_spill] sm:$0xff]  ;;  %v8665_v24 = vld [vmem:[#allocation19_spill] sm:$0xff]  ;;  %vm2910_vm9 = vcmp.eq.s32.totalorder %v5622_v15, %v2876_v28  ;;  %vm2909_vm10 = vcmp.eq.s32.totalorder %v8562_v50, %v2876_v28 }
 0x46b   : > { %4687 = vmatmul.msk.f32.gmra.mxu2 %vm2905_vm6, %v8547_v26  ;;  %v1599_v9 = vadd.f32 %v8664_v11, %v7774_v7  ;;  %v7801_v53 = vadd.f32 %v7671_v29, %v8665_v24  ;;  %3663 = vperm.xlu2 %4999, %v7387_v2   ;;  %v8676_v28 = vld [vmem:[#allocation30_spill] sm:$0xff]  ;;  %v8681_v3 = vld [vmem:[#allocation27_spill] sm:$0xff] }
 0x46c   : > { %v7785_v27 = vmax.f32 %v1621_v18, %v1999_v42  ;;  %v2002_v42 = vadd.f32 %v7390_v40, %v7774_v7 }
 0x46d   : > { %8666 = vst [vmem:[#allocation40_spill] sm:$0xff] %v7801_v53  ;;  %v796_v18 = vadd.f32 %v8667_v45, %v7801_v53 }
 0x46e   : > { %v2401_v34 = vpop.f32.mrf.mxu2 }
 0x46f   : > { %v7788_v52 = vadd.f32 %v2401_v34, %v7747_v32  ;;  %v2629_v62 = vpop.f32.mrf.mxu0  ;;  %v817_v24 = vmax.f32 %v796_v18, 0.0  ;;  %v8675_v18 = vld [vmem:[#allocation56_spill] sm:$0xff] }
 0x470   : > { %v2695_v56 = vadd.f32 %v2694_v22, %v2629_v62  ;;  %v1219_v22 = vmax.f32 %v816_v44, %v1196_v61  ;;  %3669 = vperm.xlu1 %4998, %v8676_v28  }
 0x472   : > { %4640 = vmatmul.msk.f32.gmra.mxu1 %vm284_vm0, %v2695_v56  ;;  %4704 = vmatmul.msk.f32.gmra.mxu0 %vm2908_vm7, %v8547_v26  ;;  %v1622_v34 = vmax.f32 %v1219_v22, %v1599_v9  ;;  %v1199_v56 = vadd.f32 %v8668_v54, %v7801_v53  ;;  %v8671_v9 = vld [vmem:[#allocation72_spill] sm:$0xff]  ;;  %v2700_v54 = vpop.f32.mrf.mxu3 }
 0x473   : > { %4688 = vmatmul.msk.f32.gmra.mxu2 %vm2907_vm8, %v8547_v26  ;;  %v1602_v46 = vadd.f32 %v8671_v9, %v7801_v53  ;;  %v8672_v22 = vld [vmem:[#allocation20_spill] sm:$0xff]  ;;  %3672 = vperm.xlu2 %4999, %v8681_v3  }
 0x474   : > { %v7812_v61 = vmax.f32 %v1622_v34, %v2002_v42  ;;  %v7828_v42 = vadd.f32 %v7671_v29, %v8672_v22  ;;  %v1220_v2 = vmax.f32 %v817_v24, %v1199_v56  ;;  %v8678_v29 = vld [vmem:[#allocation71_spill] sm:$0xff] }
 0x476   : > { %v2404_v62 = vpop.f32.mrf.mxu2  ;;  %8669 = vst [vmem:[#allocation42_spill] sm:$0xff] %v7812_v61  ;;  %v799_v34 = vadd.f32 %v8675_v18, %v7828_v42  ;;  %v1202_v22 = vadd.f32 %v8678_v29, %v7828_v42  ;;  %v2882_v29 = vpop.permute.xlu0 %2881 }
 0x477   : > { %v7815_v40 = vadd.f32 %v2404_v62, %v7774_v7  ;;  %v2632_v44 = vpop.f32.mrf.mxu0  ;;  %8673 = vst [vmem:[#allocation45_spill] sm:$0xff] %v7828_v42  ;;  %v1623_v62 = vmax.f32 %v1220_v2, %v1602_v46  ;;  %v8682_v2 = vld [vmem:[#allocation22_spill] sm:$0xff]  ;;  %vm2914_vm13 = vcmp.eq.s32.totalorder %v5622_v15, %v2882_v29  ;;  %vm2913_vm14 = vcmp.eq.s32.totalorder %v8562_v50, %v2882_v29 }
 0x478   : > { %v2698_v11 = vadd.f32 %v2697_v5, %v2632_v44  ;;  %v8674_v5 = vld [vmem:[#allocation28_spill] sm:$0xff]  ;;  %v818_v46 = vmax.f32 %v799_v34, 0.0  ;;  %v1605_v28 = vadd.f32 %v8682_v2, %v7828_v42 }
 0x479   : > { %8670 = vst [vmem:[#allocation43_spill] sm:$0xff] %v7815_v40  ;;  %v2005_v45 = vadd.f32 %v8674_v5, %v7801_v53  ;;  %v8677_v44 = vld [vmem:[#allocation60_spill] sm:$0xff] }
 0x47a   : > { %4641 = vmatmul.msk.f32.gmra.mxu1 %vm284_vm0, %v2698_v11  ;;  %4705 = vmatmul.msk.f32.gmra.mxu0 %vm2910_vm9, %v8547_v26  ;;  %v2879_v11 = vpop.permute.xlu2 %2878 }
 0x47b   : > { %4689 = vmatmul.msk.f32.gmra.mxu2 %vm2909_vm10, %v8547_v26  ;;  %3675 = vperm.xlu0 %4997, %v8677_v44   ;;  %v7839_v56 = vmax.f32 %v1623_v62, %v2005_v45  ;;  %vm2912_vm11 = vcmp.eq.s32.totalorder %v5622_v15, %v2879_v11  ;;  %vm2911_vm12 = vcmp.eq.s32.totalorder %v8562_v50, %v2879_v11  ;;  %v8683_v62 = vld [vmem:[#allocation33_spill] sm:$0xff]  ;;  %v2703_v11 = vpop.f32.mrf.mxu3 }
 0x47c   : > { %v1221_v45 = vmax.f32 %v818_v46, %v1202_v22  ;;  %v2008_v3 = vadd.f32 %v8683_v62, %v7828_v42  ;;  %v8688_v22 = vld [vmem:[#allocation31_spill] sm:$0xff]  ;;  %v8690_v62 = vld [vmem:[#allocation36_spill] sm:$0xff] }
 0x47d   : > { %8679 = vst [vmem:[#allocation6_spill] sm:$0xff] %v7839_v56  ;;  %3681 = vperm.xlu2 %4999, %v8688_v22  }
 0x47e   : > { %v2407_v9 = vpop.f32.mrf.mxu2  ;;  %v1624_v34 = vmax.f32 %v1221_v45, %v1605_v28  ;;  %v8689_v45 = vld [vmem:[#allocation24_spill] sm:$0xff] }
 0x47f   : > { %v7842_v24 = vadd.f32 %v2407_v9, %v7801_v53  ;;  %v2635_v5 = vpop.f32.mrf.mxu0  ;;  %v8685_v9 = vld [vmem:[#allocation37_spill] sm:$0xff] }
 0x480   : > { %v2701_v18 = vadd.f32 %v2700_v54, %v2635_v5  ;;  %v8684_v54 = vld [vmem:[#allocation34_spill] sm:$0xff]  ;;  %v7858_v2 = vmax.f32 %v1624_v34, %v2008_v3  ;;  %v2011_v3 = vadd.f32 %v8690_v62, %v8689_v45  ;;  %v8691_v34 = vld [vmem:[#allocation39_spill] sm:$0xff] }
 0x481   : > { %8680 = vst [vmem:[#allocation26_spill] sm:$0xff] %v7842_v24  ;;  %3678 = vperm.xlu1 %4998, %v8684_v54   ;;  %v3240_v54 = vpop.permute.xlu1 %3239 }
 0x482   : > { %4642 = vmatmul.msk.f32.gmra.mxu1 %vm284_vm0, %v2701_v18  ;;  %4706 = vmatmul.msk.f32.gmra.mxu0 %vm2912_vm11, %v8547_v26  ;;  %8686 = vst [vmem:[#allocation7_spill] sm:$0xff] %v7858_v2  ;;  %vm3286_vm15 = vcmp.eq.s32.totalorder %v8562_v50, %v3240_v54  ;;  %vm3287_vm1 = vcmp.eq.s32.totalorder %v5622_v15, %v3240_v54  ;;  %v3246_v54 = vpop.permute.xlu0 %3245 }
 0x483   : > { %4690 = vmatmul.msk.f32.gmra.mxu2 %vm2911_vm12, %v8547_v26  ;;  %3684 = vperm.xlu0 %4997, %v8685_v9   ;;  %v8692_v9 = vld [vmem:[#allocation21_spill] sm:$0xff]  ;;  %vm3290_vm4 = vcmp.eq.s32.totalorder %v8562_v50, %v3246_v54  ;;  %vm3291_vm5 = vcmp.eq.s32.totalorder %v5622_v15, %v3246_v54 }
 0x486   : > { %v2410_v5 = vpop.f32.mrf.mxu2 }
 0x487   : > { %v7861_v18 = vadd.f32 %v2410_v5, %v7828_v42  ;;  %v2638_v44 = vpop.f32.mrf.mxu0  ;;  %v8693_v5 = vld [vmem:[#allocation25_spill] sm:$0xff] }
 0x488   : > { %v2704_v46 = vadd.f32 %v2703_v11, %v2638_v44  ;;  %v8694_v11 = vmax.f32 %v8692_v9, %v8693_v5 }
 0x489   : > { %8687 = vst [vmem:[#allocation32_spill] sm:$0xff] %v7861_v18  ;;  %3687 = vperm.xlu1 %4998, %v8691_v34   ;;  %v3243_v34 = vpop.permute.xlu2 %3242  ;;  %v3249_v10 = vpop.permute.xlu1 %3248 }
 0x48a   : > { %4643 = vmatmul.msk.f32.gmra.mxu1 %vm284_vm0, %v2704_v46  ;;  %4707 = vmatmul.msk.f32.gmra.mxu0 %vm2914_vm13, %v8547_v26  ;;  %v7877_v22 = vmax.f32 %v8694_v11, %v2011_v3  ;;  %vm3288_vm2 = vcmp.eq.s32.totalorder %v8562_v50, %v3243_v34  ;;  %vm3289_vm3 = vcmp.eq.s32.totalorder %v5622_v15, %v3243_v34 }
 0x48b   : > { %4691 = vmatmul.msk.f32.gmra.mxu2 %vm2913_vm14, %v8547_v26  ;;  %vm3292_vm6 = vcmp.eq.s32.totalorder %v8562_v50, %v3249_v10  ;;  %vm3293_vm7 = vcmp.eq.s32.totalorder %v5622_v15, %v3249_v10 }
 0x48c   : > { %8695 = vst [vmem:[#allocation8_spill] sm:$0xff] %v7877_v22 }
 0x48e   : > { %v2413_v44 = vpop.f32.mrf.mxu2 }
 0x48f   : > { %v7881_v29 = vadd.f32 %v2413_v44, %v8689_v45  ;;  %v7883_v46 = vpop.f32.mrf.mxu1  ;;  %v3061_v28 = vpop.f32.mrf.mxu0 }
 0x491   : > { %8696 = vst [vmem:[#allocation38_spill] sm:$0xff] %v7881_v29 }
 0x492   : > { %4756 = vmatmul.msk.f32.vlgmr.msrb.gmra.mxu1 %vm3286_vm15, %v8547_v26 }
 0x493   : > { %4772 = vmatmul.msk.f32.vlgmr.msrb.gmra.mxu2 %vm3287_vm1, %v8547_v26 }
 0x496   : > { %v2996_v3 = vpop.f32.mrf.mxu2 }
 0x497   : > { %v3062_v9 = vadd.f32 %v3061_v28, %v2996_v3  ;;  %v7891_v5 = vpop.f32.mrf.mxu1  ;;  %v3064_v44 = vpop.f32.mrf.mxu0 }
 0x499   : > { %4708 = vmatmul.msk.f32.vlgmr.msra.gmra.mxu3 %vm284_vm0, %v3062_v9 }
 0x49a   : > { %4757 = vmatmul.msk.f32.gmra.mxu1 %vm3288_vm2, %v8547_v26 }
 0x49b   : > { %4773 = vmatmul.msk.f32.gmra.mxu2 %vm3289_vm3, %v8547_v26 }
 0x49e   : > { %v2999_v11 = vpop.f32.mrf.mxu2 }
 0x49f   : > { %v3065_v62 = vadd.f32 %v3064_v44, %v2999_v11  ;;  %v7898_v36 = vpop.f32.mrf.mxu1  ;;  %v3067_v4 = vpop.f32.mrf.mxu0 }
 0x4a1   : > { %4709 = vmatmul.msk.f32.gmra.mxu3 %vm284_vm0, %v3065_v62 }
 0x4a2   : > { %4758 = vmatmul.msk.f32.gmra.mxu1 %vm3290_vm4, %v8547_v26 }
 0x4a3   : > { %4774 = vmatmul.msk.f32.gmra.mxu2 %vm3291_vm5, %v8547_v26 }
 0x4a6   : > { %v3002_v28 = vpop.f32.mrf.mxu2 }
 0x4a7   : > { %v3068_v34 = vadd.f32 %v3067_v4, %v3002_v28  ;;  %v7904_v3 = vpop.f32.mrf.mxu1  ;;  %v3070_v9 = vpop.f32.mrf.mxu0 }
 0x4a8   : > { %v3252_v4 = vpop.permute.xlu2 %3251 }
 0x4a9   : > { %4710 = vmatmul.msk.f32.gmra.mxu3 %vm284_vm0, %v3068_v34  ;;  %vm3294_vm8 = vcmp.eq.s32.totalorder %v8562_v50, %v3252_v4  ;;  %vm3295_vm9 = vcmp.eq.s32.totalorder %v5622_v15, %v3252_v4 }
 0x4aa   : > { %4759 = vmatmul.msk.f32.gmra.mxu1 %vm3292_vm6, %v8547_v26 }
 0x4ab   : > { %4775 = vmatmul.msk.f32.gmra.mxu2 %vm3293_vm7, %v8547_v26 }
 0x4ae   : > { %v3005_v62 = vpop.f32.mrf.mxu2 }
 0x4af   : > { %v3071_v44 = vadd.f32 %v3070_v9, %v3005_v62  ;;  %v7911_v54 = vpop.f32.mrf.mxu1  ;;  %v3073_v11 = vpop.f32.mrf.mxu0 }
 0x4b0   : > { %v3255_v9 = vpop.permute.xlu1 %3254 }
 0x4b1   : > { %4711 = vmatmul.msk.f32.gmra.mxu3 %vm284_vm0, %v3071_v44  ;;  %vm3296_vm10 = vcmp.eq.s32.totalorder %v8562_v50, %v3255_v9  ;;  %vm3297_vm11 = vcmp.eq.s32.totalorder %v5622_v15, %v3255_v9 }
 0x4b2   : > { %4760 = vmatmul.msk.f32.gmra.mxu1 %vm3294_vm8, %v8547_v26 }
 0x4b3   : > { %4776 = vmatmul.msk.f32.gmra.mxu2 %vm3295_vm9, %v8547_v26 }
 0x4b6   : > { %v3008_v10 = vpop.f32.mrf.mxu2 }
 0x4b7   : > { %v3074_v28 = vadd.f32 %v3073_v11, %v3008_v10  ;;  %v7918_v34 = vpop.f32.mrf.mxu1  ;;  %v3076_v29 = vpop.f32.mrf.mxu0 }
 0x4b8   : > { %v3258_v11 = vpop.permute.xlu2 %3257 }
 0x4b9   : > { %4712 = vmatmul.msk.f32.gmra.mxu3 %vm284_vm0, %v3074_v28  ;;  %vm3298_vm12 = vcmp.eq.s32.totalorder %v8562_v50, %v3258_v11  ;;  %vm3299_vm13 = vcmp.eq.s32.totalorder %v5622_v15, %v3258_v11 }
 0x4ba   : > { %4761 = vmatmul.msk.f32.gmra.mxu1 %vm3296_vm10, %v8547_v26 }
 0x4bb   : > { %4777 = vmatmul.msk.f32.gmra.mxu2 %vm3297_vm11, %v8547_v26 }
 0x4be   : > { %v3011_v62 = vpop.f32.mrf.mxu2 }
 0x4bf   : > { %v3077_v44 = vadd.f32 %v3076_v29, %v3011_v62  ;;  %v7925_v4 = vpop.f32.mrf.mxu1  ;;  %v3079_v22 = vpop.f32.mrf.mxu0 }
 0x4c0   : > { %v3261_v29 = vpop.permute.xlu0 %3260 }
 0x4c1   : > { %4713 = vmatmul.msk.f32.gmra.mxu3 %vm284_vm0, %v3077_v44  ;;  %vm3300_vm14 = vcmp.eq.s32.totalorder %v8562_v50, %v3261_v29  ;;  %vm3301_vm15 = vcmp.eq.s32.totalorder %v5622_v15, %v3261_v29 }
 0x4c2   : > { %4762 = vmatmul.msk.f32.gmra.mxu1 %vm3298_vm12, %v8547_v26 }
 0x4c3   : > { %4778 = vmatmul.msk.f32.gmra.mxu2 %vm3299_vm13, %v8547_v26 }
 0x4c6   : > { %v3014_v10 = vpop.f32.mrf.mxu2 }
 0x4c7   : > { %v3080_v28 = vadd.f32 %v3079_v22, %v3014_v10  ;;  %v7932_v9 = vpop.f32.mrf.mxu1  ;;  %v3082_v45 = vpop.f32.mrf.mxu0 }
 0x4c8   : > { %v3264_v22 = vpop.permute.xlu1 %3263 }
 0x4c9   : > { %4714 = vmatmul.msk.f32.gmra.mxu3 %vm284_vm0, %v3080_v28  ;;  %vm3302_vm1 = vcmp.eq.s32.totalorder %v8562_v50, %v3264_v22  ;;  %vm3303_vm2 = vcmp.eq.s32.totalorder %v5622_v15, %v3264_v22 }
 0x4ca   : > { %4763 = vmatmul.msk.f32.gmra.mxu1 %vm3300_vm14, %v8547_v26 }
 0x4cb   : > { %4779 = vmatmul.msk.f32.gmra.mxu2 %vm3301_vm15, %v8547_v26 }
 0x4ce   : > { %v3017_v62 = vpop.f32.mrf.mxu2 }
 0x4cf   : > { %v3083_v44 = vadd.f32 %v3082_v45, %v3017_v62  ;;  %v7939_v11 = vpop.f32.mrf.mxu1  ;;  %v3085_v18 = vpop.f32.mrf.mxu0 }
 0x4d0   : > { %v3267_v45 = vpop.permute.xlu2 %3266 }
 0x4d1   : > { %4715 = vmatmul.msk.f32.gmra.mxu3 %vm284_vm0, %v3083_v44  ;;  %vm3304_vm3 = vcmp.eq.s32.totalorder %v8562_v50, %v3267_v45  ;;  %vm3305_vm4 = vcmp.eq.s32.totalorder %v5622_v15, %v3267_v45 }
 0x4d2   : > { %4764 = vmatmul.msk.f32.gmra.mxu1 %vm3302_vm1, %v8547_v26 }
 0x4d3   : > { %4780 = vmatmul.msk.f32.gmra.mxu2 %vm3303_vm2, %v8547_v26 }
 0x4d6   : > { %v3020_v10 = vpop.f32.mrf.mxu2 }
 0x4d7   : > { %v3086_v28 = vadd.f32 %v3085_v18, %v3020_v10  ;;  %v7946_v29 = vpop.f32.mrf.mxu1  ;;  %v3088_v2 = vpop.f32.mrf.mxu0 }
 0x4d8   : > { %v3270_v18 = vpop.permute.xlu0 %3269  ;;  %v3276_v56 = vpop.permute.xlu2 %3275 }
 0x4d9   : > { %4716 = vmatmul.msk.f32.gmra.mxu3 %vm284_vm0, %v3086_v28  ;;  %vm3306_vm5 = vcmp.eq.s32.totalorder %v8562_v50, %v3270_v18  ;;  %vm3307_vm6 = vcmp.eq.s32.totalorder %v5622_v15, %v3270_v18  ;;  %vm3310_vm9 = vcmp.eq.s32.totalorder %v8562_v50, %v3276_v56  ;;  %vm3311_vm10 = vcmp.eq.s32.totalorder %v5622_v15, %v3276_v56 }
 0x4da   : > { %4765 = vmatmul.msk.f32.gmra.mxu1 %vm3304_vm3, %v8547_v26 }
 0x4db   : > { %4781 = vmatmul.msk.f32.gmra.mxu2 %vm3305_vm4, %v8547_v26 }
 0x4de   : > { %v3023_v62 = vpop.f32.mrf.mxu2 }
 0x4df   : > { %v3089_v44 = vadd.f32 %v3088_v2, %v3023_v62  ;;  %v7953_v22 = vpop.f32.mrf.mxu1  ;;  %v3091_v42 = vpop.f32.mrf.mxu0 }
 0x4e0   : > { %v3273_v2 = vpop.permute.xlu1 %3272 }
 0x4e1   : > { %4717 = vmatmul.msk.f32.gmra.mxu3 %vm284_vm0, %v3089_v44  ;;  %vm3308_vm7 = vcmp.eq.s32.totalorder %v8562_v50, %v3273_v2  ;;  %vm3309_vm8 = vcmp.eq.s32.totalorder %v5622_v15, %v3273_v2 }
 0x4e2   : > { %4766 = vmatmul.msk.f32.gmra.mxu1 %vm3306_vm5, %v8547_v26 }
 0x4e3   : > { %4782 = vmatmul.msk.f32.gmra.mxu2 %vm3307_vm6, %v8547_v26 }
 0x4e6   : > { %v3026_v10 = vpop.f32.mrf.mxu2 }
 0x4e7   : > { %v3092_v28 = vadd.f32 %v3091_v42, %v3026_v10  ;;  %v7960_v45 = vpop.f32.mrf.mxu1  ;;  %v3094_v24 = vpop.f32.mrf.mxu0 }
 0x4e8   : > { %v3279_v10 = vpop.permute.xlu0 %3278  ;;  %v3282_v56 = vpop.permute.xlu1 %3281 }
 0x4e9   : > { %4718 = vmatmul.msk.f32.gmra.mxu3 %vm284_vm0, %v3092_v28  ;;  %vm3312_vm11 = vcmp.eq.s32.totalorder %v8562_v50, %v3279_v10  ;;  %vm3313_vm12 = vcmp.eq.s32.totalorder %v5622_v15, %v3279_v10  ;;  %vm3314_vm13 = vcmp.eq.s32.totalorder %v8562_v50, %v3282_v56  ;;  %vm3315_vm14 = vcmp.eq.s32.totalorder %v5622_v15, %v3282_v56  ;;  %v3285_v10 = vpop.permute.xlu2 %3284 }
 0x4ea   : > { %4767 = vmatmul.msk.f32.gmra.mxu1 %vm3308_vm7, %v8547_v26  ;;  %vm3316_vm15 = vcmp.eq.s32.totalorder %v8562_v50, %v3285_v10  ;;  %vm3317_vm1 = vcmp.eq.s32.totalorder %v5622_v15, %v3285_v10 }
 0x4eb   : > { %4783 = vmatmul.msk.f32.gmra.mxu2 %vm3309_vm8, %v8547_v26 }
 0x4ee   : > { %v3029_v62 = vpop.f32.mrf.mxu2 }
 0x4ef   : > { %v3095_v44 = vadd.f32 %v3094_v24, %v3029_v62  ;;  %v7967_v18 = vpop.f32.mrf.mxu1  ;;  %v3097_v42 = vpop.f32.mrf.mxu0 }
 0x4f0   : > { %8697 = vst [vmem:[#allocation9_spill] sm:$0xff] %v7967_v18  ;;  %v2775_v18 = vadd.f32 %v7891_v5, %v7470_v0 }
 0x4f1   : > { %4719 = vmatmul.msk.f32.gmra.mxu3 %vm284_vm0, %v3095_v44 }
 0x4f2   : > { %4768 = vmatmul.msk.f32.gmra.mxu1 %vm3310_vm9, %v8547_v26 }
 0x4f3   : > { %4784 = vmatmul.msk.f32.gmra.mxu2 %vm3311_vm10, %v8547_v26 }
 0x4f6   : > { %v3032_v28 = vpop.f32.mrf.mxu2 }
 0x4f7   : > { %v3098_v2 = vadd.f32 %v3097_v42, %v3032_v28  ;;  %v7974_v53 = vpop.f32.mrf.mxu1  ;;  %v3100_v24 = vpop.f32.mrf.mxu0 }
 0x4f8   : > { %8698 = vst [vmem:[#allocation44_spill] sm:$0xff] %v7974_v53 }
 0x4f9   : > { %4720 = vmatmul.msk.f32.gmra.mxu3 %vm284_vm0, %v3098_v2 }
 0x4fa   : > { %4769 = vmatmul.msk.f32.gmra.mxu1 %vm3312_vm11, %v8547_v26 }
 0x4fb   : > { %4785 = vmatmul.msk.f32.gmra.mxu2 %vm3313_vm12, %v8547_v26 }
 0x4fe   : > { %v3035_v62 = vpop.f32.mrf.mxu2 }
 0x4ff   : > { %v3101_v44 = vadd.f32 %v3100_v24, %v3035_v62  ;;  %v7981_v40 = vpop.f32.mrf.mxu1  ;;  %v3103_v42 = vpop.f32.mrf.mxu0 }
 0x500   : > { %8699 = vst [vmem:[#allocation10_spill] sm:$0xff] %v7981_v40  ;;  %v3643_v24 = vpop.permute.xlu0 %3642 }
 0x501   : > { %4721 = vmatmul.msk.f32.gmra.mxu3 %vm284_vm0, %v3101_v44  ;;  %vm3690_vm2 = vcmp.eq.s32.totalorder %v5622_v15, %v3643_v24  ;;  %vm3689_vm3 = vcmp.eq.s32.totalorder %v8562_v50, %v3643_v24 }
 0x502   : > { %4770 = vmatmul.msk.f32.gmra.mxu1 %vm3314_vm13, %v8547_v26 }
 0x503   : > { %4786 = vmatmul.msk.f32.gmra.mxu2 %vm3315_vm14, %v8547_v26 }
 0x506   : > { %v3038_v28 = vpop.f32.mrf.mxu2 }
 0x507   : > { %v3104_v2 = vadd.f32 %v3103_v42, %v3038_v28  ;;  %v7988_v53 = vpop.f32.mrf.mxu1  ;;  %v3106_v56 = vpop.f32.mrf.mxu0 }
 0x508   : > { %8700 = vst [vmem:[#allocation46_spill] sm:$0xff] %v7988_v53  ;;  %v3646_v42 = vpop.permute.xlu1 %3645  ;;  %v2772_v53 = vadd.f32 %v7883_v46, %v7442_v6 }
 0x509   : > { %4722 = vmatmul.msk.f32.gmra.mxu3 %vm284_vm0, %v3104_v2  ;;  %vm3692_vm4 = vcmp.eq.s32.totalorder %v5622_v15, %v3646_v42  ;;  %vm3691_vm5 = vcmp.eq.s32.totalorder %v8562_v50, %v3646_v42 }
 0x50a   : > { %4771 = vmatmul.msk.f32.gmra.mxu1 %vm3316_vm15, %v8547_v26 }
 0x50b   : > { %4787 = vmatmul.msk.f32.gmra.mxu2 %vm3317_vm1, %v8547_v26 }
 0x50e   : > { %v3041_v62 = vpop.f32.mrf.mxu2 }
 0x50f   : > { %v3107_v44 = vadd.f32 %v3106_v56, %v3041_v62  ;;  %v3399_v40 = vpop.f32.mrf.mxu1  ;;  %v8701_v62 = vmax.f32 %v7478_v55, %v7481_v17  ;;  %v8702_v17 = vmax.f32 %v7511_v51, %v7515_v25  ;;  %v8703_v25 = vmax.f32 %v7542_v59, %v7545_v49 }
 0x510   : > { %v8704_v49 = vmax.f32 %v7575_v33, %v7578_v31  ;;  %v8705_v31 = vmax.f32 %v7606_v20, %v7609_v37  ;;  %v8706_v37 = vmax.f32 %v7631_v12, %v7634_v47  ;;  %v8707_v47 = vmax.f32 %v7655_v38, %v7658_v63 }
 0x511   : > { %4723 = vmatmul.msk.f32.gmra.mxu3 %vm284_vm0, %v3107_v44  ;;  %v8008_v44 = vmax.f32 %v8701_v62, %v2772_v53  ;;  %v8025_v53 = vmax.f32 %v8702_v17, %v2775_v18  ;;  %v8708_v63 = vmax.f32 %v7684_v35, %v7687_v30  ;;  %v8709_v30 = vmax.f32 %v7708_v19, %v7711_v13 }
 0x512   : > { %4852 = vmatmul.msk.f32.vlgmr.msra.gmra.mxu1 %vm3690_vm2, %v8547_v26  ;;  %v8710_v13 = vmax.f32 %v7732_v8, %v7735_v48  ;;  %v8711_v48 = vmax.f32 %v7758_v41, %v7761_v57  ;;  %v8712_v57 = vmax.f32 %v7785_v27, %v7788_v52  ;;  %v8714_v52 = vld [vmem:[#allocation42_spill] sm:$0xff] }
 0x516   : > { %v3464_v28 = vpop.f32.mrf.mxu2 }
 0x517   : > { %v3465_v10 = vadd.f32 %v3464_v28, %v3399_v40  ;;  %v3402_v2 = vpop.f32.mrf.mxu1  ;;  %v3649_v40 = vpop.permute.xlu2 %3648 }
 0x518   : > { %vm3694_vm6 = vcmp.eq.s32.totalorder %v5622_v15, %v3649_v40  ;;  %vm3693_vm7 = vcmp.eq.s32.totalorder %v8562_v50, %v3649_v40 }
 0x519   : > { %4788 = vmatmul.msk.f32.vlgmr.msrb.gmra.mxu0 %vm284_vm0, %v3465_v10  ;;  %4836 = vmatmul.msk.f32.vlgmr.msrb.gmra.mxu3 %vm3689_vm3, %v8547_v26 }
 0x51a   : > { %4853 = vmatmul.msk.f32.gmra.mxu1 %vm3692_vm4, %v8547_v26 }
 0x51c   : > { %v3174_v56 = vpop.f32.mrf.mxu3 }
 0x51d   : > { %v8011_v24 = vadd.f32 %v3174_v56, %v7442_v6 }
 0x51e   : > { %v3467_v28 = vpop.f32.mrf.mxu2 }
 0x51f   : > { %v3222_v46 = vmax.f32 %v8008_v44, %v8011_v24  ;;  %v3468_v10 = vadd.f32 %v3467_v28, %v3402_v2  ;;  %v3405_v61 = vpop.f32.mrf.mxu1  ;;  %v3652_v28 = vpop.permute.xlu1 %3651 }
 0x520   : > { %vm3696_vm8 = vcmp.eq.s32.totalorder %v5622_v15, %v3652_v28  ;;  %vm3695_vm9 = vcmp.eq.s32.totalorder %v8562_v50, %v3652_v28 }
 0x521   : > { %4789 = vmatmul.msk.f32.gmra.mxu0 %vm284_vm0, %v3468_v10  ;;  %4837 = vmatmul.msk.f32.gmra.mxu3 %vm3691_vm5, %v8547_v26  ;;  %v2778_v10 = vadd.f32 %v7898_v36, %v7500_v58 }
 0x522   : > { %4854 = vmatmul.msk.f32.gmra.mxu1 %vm3694_vm6, %v8547_v26 }
 0x523   : > { %v8042_v18 = vmax.f32 %v8703_v25, %v2778_v10 }
 0x524   : > { %v3177_v55 = vpop.f32.mrf.mxu3 }
 0x525   : > { %v8028_v42 = vadd.f32 %v3177_v55, %v7470_v0 }
 0x526   : > { %v3470_v2 = vpop.f32.mrf.mxu2 }
 0x527   : > { %v3471_v56 = vadd.f32 %v3470_v2, %v3405_v61  ;;  %v3408_v62 = vpop.f32.mrf.mxu1  ;;  %v3655_v2 = vpop.permute.xlu2 %3654 }
 0x528   : > { %vm3698_vm10 = vcmp.eq.s32.totalorder %v5622_v15, %v3655_v2  ;;  %vm3697_vm11 = vcmp.eq.s32.totalorder %v8562_v50, %v3655_v2 }
 0x529   : > { %4790 = vmatmul.msk.f32.gmra.mxu0 %vm284_vm0, %v3471_v56  ;;  %4838 = vmatmul.msk.f32.gmra.mxu3 %vm3693_vm7, %v8547_v26  ;;  %v2781_v56 = vadd.f32 %v7904_v3, %v7529_v39 }
 0x52a   : > { %4855 = vmatmul.msk.f32.gmra.mxu1 %vm3696_vm8, %v8547_v26 }
 0x52c   : > { %v3180_v51 = vpop.f32.mrf.mxu3 }
 0x52d   : > { %v8045_v61 = vadd.f32 %v3180_v51, %v7500_v58 }
 0x52e   : > { %v3473_v40 = vpop.f32.mrf.mxu2 }
 0x52f   : > { %v3474_v55 = vadd.f32 %v3473_v40, %v3408_v62  ;;  %v3411_v17 = vpop.f32.mrf.mxu1  ;;  %v8059_v62 = vmax.f32 %v8704_v49, %v2781_v56  ;;  %v3658_v40 = vpop.permute.xlu0 %3657 }
 0x530   : > { %vm3700_vm12 = vcmp.eq.s32.totalorder %v5622_v15, %v3658_v40  ;;  %vm3699_vm13 = vcmp.eq.s32.totalorder %v8562_v50, %v3658_v40 }
 0x531   : > { %4791 = vmatmul.msk.f32.gmra.mxu0 %vm284_vm0, %v3474_v55  ;;  %4839 = vmatmul.msk.f32.gmra.mxu3 %vm3695_vm9, %v8547_v26  ;;  %v2784_v55 = vadd.f32 %v7911_v54, %v7560_v14 }
 0x532   : > { %4856 = vmatmul.msk.f32.gmra.mxu1 %vm3698_vm10, %v8547_v26 }
 0x534   : > { %v3183_v59 = vpop.f32.mrf.mxu3 }
 0x535   : > { %v8062_v28 = vadd.f32 %v3183_v59, %v7529_v39 }
 0x536   : > { %v3476_v10 = vpop.f32.mrf.mxu2 }
 0x537   : > { %v3477_v51 = vadd.f32 %v3476_v10, %v3411_v17  ;;  %v3414_v25 = vpop.f32.mrf.mxu1  ;;  %v8076_v17 = vmax.f32 %v8705_v31, %v2784_v55  ;;  %v3661_v10 = vpop.permute.xlu1 %3660 }
 0x538   : > { %vm3702_vm14 = vcmp.eq.s32.totalorder %v5622_v15, %v3661_v10  ;;  %vm3701_vm15 = vcmp.eq.s32.totalorder %v8562_v50, %v3661_v10 }
 0x539   : > { %4792 = vmatmul.msk.f32.gmra.mxu0 %vm284_vm0, %v3477_v51  ;;  %4840 = vmatmul.msk.f32.gmra.mxu3 %vm3697_vm11, %v8547_v26  ;;  %v2787_v51 = vadd.f32 %v7918_v34, %v7597_v23  ;;  %v8723_v34 = vld [vmem:[#allocation10_spill] sm:$0xff] }
 0x53a   : > { %4857 = vmatmul.msk.f32.gmra.mxu1 %vm3700_vm12, %v8547_v26 }
 0x53c   : > { %v3186_v33 = vpop.f32.mrf.mxu3 }
 0x53d   : > { %v8079_v56 = vadd.f32 %v3186_v33, %v7560_v14 }
 0x53e   : > { %v3479_v2 = vpop.f32.mrf.mxu2 }
 0x53f   : > { %v3480_v59 = vadd.f32 %v3479_v2, %v3414_v25  ;;  %v3417_v49 = vpop.f32.mrf.mxu1  ;;  %v8093_v25 = vmax.f32 %v8706_v37, %v2787_v51  ;;  %v3664_v2 = vpop.permute.xlu2 %3663 }
 0x540   : > { %vm3704_vm1 = vcmp.eq.s32.totalorder %v5622_v15, %v3664_v2  ;;  %vm3703_vm2 = vcmp.eq.s32.totalorder %v8562_v50, %v3664_v2 }
 0x541   : > { %4793 = vmatmul.msk.f32.gmra.mxu0 %vm284_vm0, %v3480_v59  ;;  %4841 = vmatmul.msk.f32.gmra.mxu3 %vm3699_vm13, %v8547_v26  ;;  %v2790_v59 = vadd.f32 %v7925_v4, %v7622_v43  ;;  %v8722_v4 = vld [vmem:[#allocation45_spill] sm:$0xff] }
 0x542   : > { %4858 = vmatmul.msk.f32.gmra.mxu1 %vm3702_vm14, %v8547_v26  ;;  %v2814_v54 = vadd.f32 %v8723_v34, %v8722_v4 }
 0x544   : > { %v3189_v20 = vpop.f32.mrf.mxu3 }
 0x545   : > { %v8096_v40 = vadd.f32 %v3189_v20, %v7597_v23 }
 0x546   : > { %v3482_v55 = vpop.f32.mrf.mxu2 }
 0x547   : > { %v3483_v33 = vadd.f32 %v3482_v55, %v3417_v49  ;;  %v3420_v31 = vpop.f32.mrf.mxu1  ;;  %v8110_v49 = vmax.f32 %v8707_v47, %v2790_v59  ;;  %v3667_v55 = vpop.permute.xlu0 %3666 }
 0x548   : > { %vm3706_vm3 = vcmp.eq.s32.totalorder %v5622_v15, %v3667_v55  ;;  %vm3705_vm4 = vcmp.eq.s32.totalorder %v8562_v50, %v3667_v55 }
 0x549   : > { %4794 = vmatmul.msk.f32.gmra.mxu0 %vm284_vm0, %v3483_v33  ;;  %4842 = vmatmul.msk.f32.gmra.mxu3 %vm3701_vm15, %v8547_v26  ;;  %v2793_v33 = vadd.f32 %v7932_v9, %v7646_v1 }
 0x54a   : > { %4859 = vmatmul.msk.f32.gmra.mxu1 %vm3704_vm1, %v8547_v26 }
 0x54c   : > { %v3192_v12 = vpop.f32.mrf.mxu3 }
 0x54d   : > { %v8113_v10 = vadd.f32 %v3192_v12, %v7622_v43 }
 0x54e   : > { %v3485_v51 = vpop.f32.mrf.mxu2 }
 0x54f   : > { %v3486_v20 = vadd.f32 %v3485_v51, %v3420_v31  ;;  %v3423_v37 = vpop.f32.mrf.mxu1  ;;  %v8127_v31 = vmax.f32 %v8708_v63, %v2793_v33  ;;  %v3670_v51 = vpop.permute.xlu1 %3669 }
 0x550   : > { %vm3708_vm5 = vcmp.eq.s32.totalorder %v5622_v15, %v3670_v51  ;;  %vm3707_vm6 = vcmp.eq.s32.totalorder %v8562_v50, %v3670_v51 }
 0x551   : > { %4795 = vmatmul.msk.f32.gmra.mxu0 %vm284_vm0, %v3486_v20  ;;  %4843 = vmatmul.msk.f32.gmra.mxu3 %vm3703_vm2, %v8547_v26  ;;  %v2796_v20 = vadd.f32 %v7939_v11, %v7675_v60  ;;  %v8718_v11 = vld [vmem:[#allocation44_spill] sm:$0xff] }
 0x552   : > { %4860 = vmatmul.msk.f32.gmra.mxu1 %vm3706_vm3, %v8547_v26 }
 0x554   : > { %v3195_v38 = vpop.f32.mrf.mxu3 }
 0x555   : > { %v8130_v59 = vadd.f32 %v3195_v38, %v7646_v1 }
 0x556   : > { %v3488_v2 = vpop.f32.mrf.mxu2 }
 0x557   : > { %v3489_v12 = vadd.f32 %v3488_v2, %v3423_v37  ;;  %v3426_v47 = vpop.f32.mrf.mxu1  ;;  %v8144_v37 = vmax.f32 %v8709_v30, %v2796_v20  ;;  %v3673_v2 = vpop.permute.xlu2 %3672 }
 0x558   : > { %vm3710_vm7 = vcmp.eq.s32.totalorder %v5622_v15, %v3673_v2  ;;  %vm3709_vm8 = vcmp.eq.s32.totalorder %v8562_v50, %v3673_v2 }
 0x559   : > { %4796 = vmatmul.msk.f32.gmra.mxu0 %vm284_vm0, %v3489_v12  ;;  %4844 = vmatmul.msk.f32.gmra.mxu3 %vm3705_vm4, %v8547_v26  ;;  %v2799_v12 = vadd.f32 %v7946_v29, %v7699_v16  ;;  %v8717_v29 = vld [vmem:[#allocation40_spill] sm:$0xff] }
 0x55a   : > { %4861 = vmatmul.msk.f32.gmra.mxu1 %vm3708_vm5, %v8547_v26  ;;  %v2811_v9 = vadd.f32 %v8718_v11, %v8717_v29  ;;  %v8728_v11 = vld [vmem:[#allocation46_spill] sm:$0xff] }
 0x55c   : > { %v3198_v35 = vpop.f32.mrf.mxu3 }
 0x55d   : > { %v8147_v55 = vadd.f32 %v3198_v35, %v7675_v60 }
 0x55e   : > { %v3491_v33 = vpop.f32.mrf.mxu2 }
 0x55f   : > { %v3492_v38 = vadd.f32 %v3491_v33, %v3426_v47  ;;  %v3429_v63 = vpop.f32.mrf.mxu1  ;;  %v8161_v47 = vmax.f32 %v8710_v13, %v2799_v12  ;;  %v3676_v33 = vpop.permute.xlu0 %3675 }
 0x560   : > { %vm3712_vm9 = vcmp.eq.s32.totalorder %v5622_v15, %v3676_v33  ;;  %vm3711_vm10 = vcmp.eq.s32.totalorder %v8562_v50, %v3676_v33 }
 0x561   : > { %4797 = vmatmul.msk.f32.gmra.mxu0 %vm284_vm0, %v3492_v38  ;;  %4845 = vmatmul.msk.f32.gmra.mxu3 %vm3707_vm6, %v8547_v26  ;;  %v2802_v38 = vadd.f32 %v7953_v22, %v7723_v21 }
 0x562   : > { %4862 = vmatmul.msk.f32.gmra.mxu1 %vm3710_vm7, %v8547_v26 }
 0x564   : > { %v3201_v19 = vpop.f32.mrf.mxu3 }
 0x565   : > { %v8164_v51 = vadd.f32 %v3201_v19, %v7699_v16 }
 0x566   : > { %v3494_v20 = vpop.f32.mrf.mxu2 }
 0x567   : > { %v3495_v35 = vadd.f32 %v3494_v20, %v3429_v63  ;;  %v3432_v30 = vpop.f32.mrf.mxu1  ;;  %v8178_v63 = vmax.f32 %v8711_v48, %v2802_v38  ;;  %v3679_v20 = vpop.permute.xlu1 %3678 }
 0x568   : > { %vm3714_vm11 = vcmp.eq.s32.totalorder %v5622_v15, %v3679_v20  ;;  %v3682_v38 = vpop.permute.xlu2 %3681  ;;  %vm3713_vm12 = vcmp.eq.s32.totalorder %v8562_v50, %v3679_v20  ;;  %v3685_v20 = vpop.permute.xlu0 %3684 }
 0x569   : > { %4798 = vmatmul.msk.f32.gmra.mxu0 %vm284_vm0, %v3495_v35  ;;  %4846 = vmatmul.msk.f32.gmra.mxu3 %vm3709_vm8, %v8547_v26  ;;  %v2805_v35 = vadd.f32 %v7960_v45, %v7747_v32  ;;  %vm3716_vm13 = vcmp.eq.s32.totalorder %v5622_v15, %v3682_v38  ;;  %vm3715_vm14 = vcmp.eq.s32.totalorder %v8562_v50, %v3682_v38 }
 0x56a   : > { %4863 = vmatmul.msk.f32.gmra.mxu1 %vm3712_vm9, %v8547_v26  ;;  %vm3718_vm15 = vcmp.eq.s32.totalorder %v5622_v15, %v3685_v20  ;;  %vm3717_vm1 = vcmp.eq.s32.totalorder %v8562_v50, %v3685_v20 }
 0x56c   : > { %v3204_v8 = vpop.f32.mrf.mxu3 }
 0x56d   : > { %v8181_v12 = vadd.f32 %v3204_v8, %v7723_v21 }
 0x56e   : > { %v3497_v2 = vpop.f32.mrf.mxu2 }
 0x56f   : > { %v3498_v19 = vadd.f32 %v3497_v2, %v3432_v30  ;;  %v3435_v13 = vpop.f32.mrf.mxu1  ;;  %v8195_v30 = vmax.f32 %v8712_v57, %v2805_v35  ;;  %v8715_v35 = vld [vmem:[#allocation43_spill] sm:$0xff]  ;;  %v3688_v38 = vpop.permute.xlu1 %3687 }
 0x570   : > { %vm3720_vm2 = vcmp.eq.s32.totalorder %v5622_v15, %v3688_v38  ;;  %vm3719_vm3 = vcmp.eq.s32.totalorder %v8562_v50, %v3688_v38 }
 0x571   : > { %4799 = vmatmul.msk.f32.gmra.mxu0 %vm284_vm0, %v3498_v19  ;;  %4847 = vmatmul.msk.f32.gmra.mxu3 %vm3711_vm10, %v8547_v26  ;;  %v8713_v19 = vld [vmem:[#allocation9_spill] sm:$0xff] }
 0x572   : > { %4864 = vmatmul.msk.f32.gmra.mxu1 %vm3714_vm11, %v8547_v26  ;;  %v2808_v22 = vadd.f32 %v8713_v19, %v7774_v7 }
 0x574   : > { %v3207_v41 = vpop.f32.mrf.mxu3 }
 0x575   : > { %v8198_v33 = vadd.f32 %v3207_v41, %v7747_v32  ;;  %v8716_v41 = vmax.f32 %v8714_v52, %v8715_v35  ;;  %v8720_v52 = vld [vmem:[#allocation26_spill] sm:$0xff] }
 0x576   : > { %v3500_v8 = vpop.f32.mrf.mxu2 }
 0x577   : > { %v3501_v48 = vadd.f32 %v3500_v8, %v3435_v13  ;;  %v3438_v2 = vpop.f32.mrf.mxu1  ;;  %v8212_v57 = vmax.f32 %v8716_v41, %v2808_v22 }
 0x579   : > { %4800 = vmatmul.msk.f32.gmra.mxu0 %vm284_vm0, %v3501_v48  ;;  %4848 = vmatmul.msk.f32.gmra.mxu3 %vm3713_vm12, %v8547_v26 }
 0x57a   : > { %4865 = vmatmul.msk.f32.gmra.mxu1 %vm3716_vm13, %v8547_v26 }
 0x57c   : > { %v3210_v27 = vpop.f32.mrf.mxu3 }
 0x57d   : > { %v8215_v13 = vadd.f32 %v3210_v27, %v7774_v7  ;;  %v8719_v27 = vld [vmem:[#allocation6_spill] sm:$0xff] }
 0x57e   : > { %v3503_v8 = vpop.f32.mrf.mxu2  ;;  %v8721_v35 = vmax.f32 %v8719_v27, %v8720_v52  ;;  %v8725_v27 = vld [vmem:[#allocation32_spill] sm:$0xff] }
 0x57f   : > { %v3504_v45 = vadd.f32 %v3503_v8, %v3438_v2  ;;  %v3441_v48 = vpop.f32.mrf.mxu1 }
 0x580   : > { %v8229_v41 = vmax.f32 %v8721_v35, %v2811_v9 }
 0x581   : > { %4801 = vmatmul.msk.f32.gmra.mxu0 %vm284_vm0, %v3504_v45  ;;  %4849 = vmatmul.msk.f32.gmra.mxu3 %vm3715_vm14, %v8547_v26 }
 0x582   : > { %4866 = vmatmul.msk.f32.gmra.mxu1 %vm3718_vm15, %v8547_v26 }
 0x584   : > { %v3213_v22 = vpop.f32.mrf.mxu3 }
 0x585   : > { %v8232_v2 = vadd.f32 %v3213_v22, %v8717_v29  ;;  %v8724_v22 = vld [vmem:[#allocation7_spill] sm:$0xff] }
 0x586   : > { %v3506_v8 = vpop.f32.mrf.mxu2  ;;  %v8726_v52 = vmax.f32 %v8724_v22, %v8725_v27  ;;  %v8729_v22 = vld [vmem:[#allocation8_spill] sm:$0xff]  ;;  %v8730_v27 = vld [vmem:[#allocation38_spill] sm:$0xff] }
 0x587   : > { %v3507_v19 = vadd.f32 %v3506_v8, %v3441_v48  ;;  %v3444_v45 = vpop.f32.mrf.mxu1 }
 0x588   : > { %v8246_v35 = vmax.f32 %v8726_v52, %v2814_v54 }
 0x589   : > { %4802 = vmatmul.msk.f32.gmra.mxu0 %vm284_vm0, %v3507_v19  ;;  %4850 = vmatmul.msk.f32.gmra.mxu3 %vm3717_vm1, %v8547_v26  ;;  %v8727_v19 = vld [vmem:[#allocation24_spill] sm:$0xff] }
 0x58a   : > { %4867 = vmatmul.msk.f32.gmra.mxu1 %vm3720_vm2, %v8547_v26  ;;  %v2817_v3 = vadd.f32 %v8728_v11, %v8727_v19 }
 0x58c   : > { %v3216_v9 = vpop.f32.mrf.mxu3 }
 0x58d   : > { %v8249_v48 = vadd.f32 %v3216_v9, %v8722_v4  ;;  %v8731_v9 = vmax.f32 %v8729_v22, %v8730_v27 }
 0x58e   : > { %v3509_v20 = vpop.f32.mrf.mxu2 }
 0x58f   : > { %v3510_v15 = vadd.f32 %v3509_v20, %v3444_v45  ;;  %v3867_v8 = vpop.f32.mrf.mxu1  ;;  %v8261_v52 = vmax.f32 %v8731_v9, %v2817_v3 }
 0x591   : > { %4803 = vmatmul.msk.f32.gmra.mxu0 %vm284_vm0, %v3510_v15  ;;  %4851 = vmatmul.msk.f32.gmra.mxu3 %vm3719_vm3, %v8547_v26 }
 0x594   : > { %v3219_v54 = vpop.f32.mrf.mxu3 }
 0x595   : > { %v8264_v36 = vadd.f32 %v3219_v54, %v8727_v19 }
 0x597   : > { %v3870_v50 = vpop.f32.mrf.mxu1 }
 0x59c   : > { %v3802_v38 = vpop.f32.mrf.mxu3 }
 0x59d   : > { %v3868_v20 = vadd.f32 %v3867_v8, %v3802_v38 }
 0x59f   : > { %4868 = vmatmul.msk.f32.vlgmr.msra.gmra.mxu2 %vm284_vm0, %v3868_v20  ;;  %v3873_v11 = vpop.f32.mrf.mxu1 }
 0x5a4   : > { %v3805_v15 = vpop.f32.mrf.mxu3 }
 0x5a5   : > { %v3871_v26 = vadd.f32 %v3870_v50, %v3805_v15 }
 0x5a7   : > { %4869 = vmatmul.msk.f32.gmra.mxu2 %vm284_vm0, %v3871_v26  ;;  %v3876_v34 = vpop.f32.mrf.mxu1 }
 0x5ac   : > { %v3808_v22 = vpop.f32.mrf.mxu3 }
 0x5ad   : > { %v3874_v3 = vadd.f32 %v3873_v11, %v3808_v22 }
 0x5af   : > { %4870 = vmatmul.msk.f32.gmra.mxu2 %vm284_vm0, %v3874_v3  ;;  %v3879_v54 = vpop.f32.mrf.mxu1 }
 0x5b4   : > { %v3811_v27 = vpop.f32.mrf.mxu3 }
 0x5b5   : > { %v3877_v9 = vadd.f32 %v3876_v34, %v3811_v27 }
 0x5b7   : > { %4871 = vmatmul.msk.f32.gmra.mxu2 %vm284_vm0, %v3877_v9  ;;  %v3882_v45 = vpop.f32.mrf.mxu1 }
 0x5bc   : > { %v3814_v5 = vpop.f32.mrf.mxu3 }
 0x5bd   : > { %v3880_v8 = vadd.f32 %v3879_v54, %v3814_v5 }
 0x5bf   : > { %4872 = vmatmul.msk.f32.gmra.mxu2 %vm284_vm0, %v3880_v8  ;;  %v3885_v38 = vpop.f32.mrf.mxu1 }
 0x5c4   : > { %v3817_v20 = vpop.f32.mrf.mxu3 }
 0x5c5   : > { %v3883_v50 = vadd.f32 %v3882_v45, %v3817_v20 }
 0x5c7   : > { %4873 = vmatmul.msk.f32.gmra.mxu2 %vm284_vm0, %v3883_v50  ;;  %v3888_v15 = vpop.f32.mrf.mxu1 }
 0x5cc   : > { %v3820_v26 = vpop.f32.mrf.mxu3 }
 0x5cd   : > { %v3886_v11 = vadd.f32 %v3885_v38, %v3820_v26 }
 0x5cf   : > { %4874 = vmatmul.msk.f32.gmra.mxu2 %vm284_vm0, %v3886_v11  ;;  %v3891_v22 = vpop.f32.mrf.mxu1 }
 0x5d4   : > { %v3823_v3 = vpop.f32.mrf.mxu3 }
 0x5d5   : > { %v3889_v34 = vadd.f32 %v3888_v15, %v3823_v3 }
 0x5d7   : > { %4875 = vmatmul.msk.f32.gmra.mxu2 %vm284_vm0, %v3889_v34  ;;  %v3894_v27 = vpop.f32.mrf.mxu1 }
 0x5dc   : > { %v3826_v9 = vpop.f32.mrf.mxu3 }
 0x5dd   : > { %v3892_v5 = vadd.f32 %v3891_v22, %v3826_v9  ;;  %v3577_v22 = vpop.f32.mrf.mxu0 }
 0x5df   : > { %4876 = vmatmul.msk.f32.gmra.mxu2 %vm284_vm0, %v3892_v5  ;;  %v3897_v54 = vpop.f32.mrf.mxu1 }
 0x5e4   : > { %v3829_v8 = vpop.f32.mrf.mxu3 }
 0x5e5   : > { %v3895_v45 = vadd.f32 %v3894_v27, %v3829_v8 }
 0x5e7   : > { %4877 = vmatmul.msk.f32.gmra.mxu2 %vm284_vm0, %v3895_v45  ;;  %v3900_v20 = vpop.f32.mrf.mxu1 }
 0x5ec   : > { %v3832_v50 = vpop.f32.mrf.mxu3 }
 0x5ed   : > { %v3898_v38 = vadd.f32 %v3897_v54, %v3832_v50  ;;  %v3580_v54 = vpop.f32.mrf.mxu0 }
 0x5ef   : > { %4878 = vmatmul.msk.f32.gmra.mxu2 %vm284_vm0, %v3898_v38  ;;  %v3903_v15 = vpop.f32.mrf.mxu1 }
 0x5f4   : > { %v3835_v26 = vpop.f32.mrf.mxu3 }
 0x5f5   : > { %v3901_v11 = vadd.f32 %v3900_v20, %v3835_v26  ;;  %v3583_v20 = vpop.f32.mrf.mxu0 }
 0x5f7   : > { %4879 = vmatmul.msk.f32.gmra.mxu2 %vm284_vm0, %v3901_v11  ;;  %v3906_v9 = vpop.f32.mrf.mxu1 }
 0x5fc   : > { %v3838_v3 = vpop.f32.mrf.mxu3 }
 0x5fd   : > { %v3904_v34 = vadd.f32 %v3903_v15, %v3838_v3  ;;  %v3586_v15 = vpop.f32.mrf.mxu0  ;;  %v3578_v3 = vadd.f32 %v3577_v22, %v7442_v6 }
 0x5ff   : > { %4880 = vmatmul.msk.f32.gmra.mxu2 %vm284_vm0, %v3904_v34  ;;  %v3909_v8 = vpop.f32.mrf.mxu1 }
 0x604   : > { %v3841_v27 = vpop.f32.mrf.mxu3 }
 0x605   : > { %v3907_v5 = vadd.f32 %v3906_v9, %v3841_v27  ;;  %v3625_v9 = vmax.f32 %v3222_v46, %v3578_v3 }
 0x607   : > { %4881 = vmatmul.msk.f32.gmra.mxu2 %vm284_vm0, %v3907_v5  ;;  %v3912_v38 = vpop.f32.mrf.mxu1 }
 0x60c   : > { %v3844_v45 = vpop.f32.mrf.mxu3 }
 0x60d   : > { %v3910_v50 = vadd.f32 %v3909_v8, %v3844_v45  ;;  %v3589_v8 = vpop.f32.mrf.mxu0  ;;  %v3581_v45 = vadd.f32 %v3580_v54, %v7470_v0 }
 0x60f   : > { %4882 = vmatmul.msk.f32.gmra.mxu2 %vm284_vm0, %v3910_v50  ;;  %v8732_v50 = vmax.f32 %v8025_v53, %v8028_v42  ;;  %v3587_v53 = vadd.f32 %v3586_v15, %v7529_v39 }
 0x614   : > { %v3847_v26 = vpop.f32.mrf.mxu3 }
 0x615   : > { %v3913_v11 = vadd.f32 %v3912_v38, %v3847_v26  ;;  %v3626_v38 = vmax.f32 %v8732_v50, %v3581_v45  ;;  %v3592_v46 = vpop.f32.mrf.mxu0  ;;  %v8733_v26 = vmax.f32 %v8042_v18, %v8045_v61  ;;  %v3590_v18 = vadd.f32 %v3589_v8, %v7560_v14 }
 0x617   : > { %4883 = vmatmul.msk.f32.gmra.mxu2 %vm284_vm0, %v3913_v11 }
 0x61d   : > { %v3595_v42 = vpop.f32.mrf.mxu0 }
 0x622   : > { %v3980_v34 = vpop.f32.mrf.mxu2 }
 0x623   : > { %v3981_v27 = vadd.f32 %v3980_v34, %v7442_v6  ;;  %v3584_v6 = vadd.f32 %v3583_v20, %v7500_v58 }
 0x625   : > { %v4028_v5 = vmax.f32 %v3625_v9, %v3981_v27  ;;  %v3627_v11 = vmax.f32 %v8733_v26, %v3584_v6  ;;  %v8734_v9 = vmax.f32 %v8059_v62, %v8062_v28  ;;  %v3593_v62 = vadd.f32 %v3592_v46, %v7597_v23 }
 0x626   : > { %v8738_v26 = vmax.f32 %v8127_v31, %v8130_v59 }
 0x627   : > { %4044 = vst [vmem:[%s8293_s15] sm:$0xff] %v4028_v5  ;;  %v3628_v20 = vmax.f32 %v8734_v9, %v3587_v53  ;;  %v8739_v53 = vmax.f32 %v8144_v37, %v8147_v55 }
 0x62a   : > { %v3983_v22 = vpop.f32.mrf.mxu2 }
 0x62b   : > { %v3984_v44 = vadd.f32 %v3983_v22, %v7470_v0  ;;  %v3598_v22 = vpop.f32.mrf.mxu0 }
 0x62d   : > { %v4029_v24 = vmax.f32 %v3626_v38, %v3984_v44 }
 0x62f   : > { %4045 = vst [vmem:[%s8293_s15 + $0x8] sm:$0xff] %v4029_v24 }
 0x632   : > { %v3986_v54 = vpop.f32.mrf.mxu2 }
 0x633   : > { %v3987_v3 = vadd.f32 %v3986_v54, %v7500_v58  ;;  %v8735_v58 = vmax.f32 %v8076_v17, %v8079_v56  ;;  %v3601_v24 = vpop.f32.mrf.mxu0  ;;  %v3596_v17 = vadd.f32 %v3595_v42, %v7622_v43  ;;  %v8737_v56 = vmax.f32 %v8110_v49, %v8113_v10 }
 0x634   : > { %v3602_v49 = vadd.f32 %v3601_v24, %v7675_v60 }
 0x635   : > { %v4030_v34 = vmax.f32 %v3627_v11, %v3987_v3  ;;  %v3629_v45 = vmax.f32 %v8735_v58, %v3590_v18  ;;  %v3631_v6 = vmax.f32 %v8737_v56, %v3596_v17 }
 0x636   : > { %v3633_v42 = vmax.f32 %v8739_v53, %v3602_v49 }
 0x637   : > { %4046 = vst [vmem:[%s8293_s15 + $0x10] sm:$0xff] %v4030_v34 }
 0x63a   : > { %v3989_v0 = vpop.f32.mrf.mxu2 }
 0x63b   : > { %v3990_v27 = vadd.f32 %v3989_v0, %v7529_v39  ;;  %v8736_v39 = vmax.f32 %v8093_v25, %v8096_v40  ;;  %v3599_v25 = vadd.f32 %v3598_v22, %v7646_v1  ;;  %v3604_v40 = vpop.f32.mrf.mxu0 }
 0x63c   : > { %v3605_v31 = vadd.f32 %v3604_v40, %v7699_v16 }
 0x63d   : > { %v4031_v5 = vmax.f32 %v3628_v20, %v3990_v27  ;;  %v3630_v38 = vmax.f32 %v8736_v39, %v3593_v62  ;;  %v3632_v11 = vmax.f32 %v8738_v26, %v3599_v25 }
 0x63f   : > { %4047 = vst [vmem:[%s8293_s15 + $0x18] sm:$0xff] %v4031_v5 }
 0x642   : > { %v3992_v61 = vpop.f32.mrf.mxu2 }
 0x643   : > { %v3993_v15 = vadd.f32 %v3992_v61, %v7560_v14  ;;  %v3607_v10 = vpop.f32.mrf.mxu0 }
 0x644   : > { %v3608_v37 = vadd.f32 %v3607_v10, %v7723_v21 }
 0x645   : > { %v4032_v50 = vmax.f32 %v3629_v45, %v3993_v15 }
 0x647   : > { %4048 = vst [vmem:[%s8293_s15 + $0x20] sm:$0xff] %v4032_v50 }
 0x64a   : > { %v3995_v28 = vpop.f32.mrf.mxu2 }
 0x64b   : > { %v3996_v8 = vadd.f32 %v3995_v28, %v7597_v23  ;;  %v3610_v5 = vpop.f32.mrf.mxu0  ;;  %v8743_v28 = vmax.f32 %v8212_v57, %v8215_v13 }
 0x64d   : > { %v4033_v44 = vmax.f32 %v3630_v38, %v3996_v8 }
 0x64f   : > { %4049 = vst [vmem:[%s8293_s15 + $0x28] sm:$0xff] %v4033_v44  ;;  %v8744_v44 = vmax.f32 %v8229_v41, %v8232_v2 }
 0x652   : > { %v3998_v14 = vpop.f32.mrf.mxu2 }
 0x653   : > { %v3999_v46 = vadd.f32 %v3998_v14, %v7622_v43  ;;  %v3613_v15 = vpop.f32.mrf.mxu0 }
 0x655   : > { %v4034_v54 = vmax.f32 %v3631_v6, %v3999_v46 }
 0x657   : > { %4050 = vst [vmem:[%s8293_s15 + $0x30] sm:$0xff] %v4034_v54 }
 0x65a   : > { %v4001_v23 = vpop.f32.mrf.mxu2 }
 0x65b   : > { %v4002_v3 = vadd.f32 %v4001_v23, %v7646_v1  ;;  %v8740_v1 = vmax.f32 %v8161_v47, %v8164_v51  ;;  %v3611_v47 = vadd.f32 %v3610_v5, %v7747_v32  ;;  %v8742_v51 = vmax.f32 %v8195_v30, %v8198_v33 }
 0x65d   : > { %v4035_v34 = vmax.f32 %v3632_v11, %v4002_v3  ;;  %v3634_v20 = vmax.f32 %v8740_v1, %v3605_v31  ;;  %v3636_v22 = vmax.f32 %v8742_v51, %v3611_v47 }
 0x65f   : > { %4051 = vst [vmem:[%s8293_s15 + $0x38] sm:$0xff] %v4035_v34 }
 0x662   : > { %v4004_v43 = vpop.f32.mrf.mxu2 }
 0x663   : > { %v4005_v0 = vadd.f32 %v4004_v43, %v7675_v60  ;;  %v8741_v60 = vmax.f32 %v8178_v63, %v8181_v12  ;;  %v3614_v63 = vadd.f32 %v3613_v15, %v7774_v7  ;;  %v3616_v12 = vpop.f32.mrf.mxu0 }
 0x664   : > { %v3617_v30 = vadd.f32 %v3616_v12, %v8717_v29 }
 0x665   : > { %v4036_v9 = vmax.f32 %v3633_v42, %v4005_v0  ;;  %v3635_v61 = vmax.f32 %v8741_v60, %v3608_v37  ;;  %v3637_v39 = vmax.f32 %v8743_v28, %v3614_v63 }
 0x666   : > { %v3638_v24 = vmax.f32 %v8744_v44, %v3617_v30 }
 0x667   : > { %4052 = vst [vmem:[%s8293_s15 + $0x40] sm:$0xff] %v4036_v9 }
 0x66a   : > { %v4007_v59 = vpop.f32.mrf.mxu2 }
 0x66b   : > { %v4008_v27 = vadd.f32 %v4007_v59, %v7699_v16 }
 0x66d   : > { %v4037_v18 = vmax.f32 %v3634_v20, %v4008_v27 }
 0x66f   : > { %4053 = vst [vmem:[%s8293_s15 + $0x48] sm:$0xff] %v4037_v18 }
 0x672   : > { %v4010_v55 = vpop.f32.mrf.mxu2 }
 0x673   : > { %v4011_v58 = vadd.f32 %v4010_v55, %v7723_v21 }
 0x675   : > { %v4038_v45 = vmax.f32 %v3635_v61, %v4011_v58 }
 0x677   : > { %4054 = vst [vmem:[%s8293_s15 + $0x50] sm:$0xff] %v4038_v45 }
 0x67a   : > { %v4013_v16 = vpop.f32.mrf.mxu2 }
 0x67b   : > { %v4014_v50 = vadd.f32 %v4013_v16, %v7747_v32  ;;  %v3619_v32 = vpop.f32.mrf.mxu0 }
 0x67c   : > { %v3620_v57 = vadd.f32 %v3619_v32, %v8722_v4 }
 0x67d   : > { %v4039_v62 = vmax.f32 %v3636_v22, %v4014_v50 }
 0x67f   : > { %4055 = vst [vmem:[%s8293_s15 + $0x58] sm:$0xff] %v4039_v62 }
 0x682   : > { %v4016_v21 = vpop.f32.mrf.mxu2 }
 0x683   : > { %v4017_v38 = vadd.f32 %v4016_v21, %v7774_v7  ;;  %v8745_v7 = vmax.f32 %v8246_v35, %v8249_v48  ;;  %v3622_v46 = vpop.f32.mrf.mxu0  ;;  %v8746_v35 = vmax.f32 %v8261_v52, %v8264_v36 }
 0x684   : > { %v3623_v41 = vadd.f32 %v3622_v46, %v8727_v19 }
 0x685   : > { %v4040_v8 = vmax.f32 %v3637_v39, %v4017_v38  ;;  %v3639_v56 = vmax.f32 %v8745_v7, %v3620_v57 }
 0x686   : > { %v3640_v48 = vmax.f32 %v8746_v35, %v3623_v41 }
 0x687   : > { %4056 = vst [vmem:[%s8293_s15 + $0x60] sm:$0xff] %v4040_v8 }
 0x68a   : > { %v4019_v33 = vpop.f32.mrf.mxu2 }
 0x68b   : > { %v4020_v17 = vadd.f32 %v4019_v33, %v8717_v29 }
 0x68d   : > { %v4041_v14 = vmax.f32 %v3638_v24, %v4020_v17 }
 0x68f   : > { %4057 = vst [vmem:[%s8293_s15 + $0x68] sm:$0xff] %v4041_v14 }
 0x692   : > { %v4022_v13 = vpop.f32.mrf.mxu2 }
 0x693   : > { %v4023_v6 = vadd.f32 %v4022_v13, %v8722_v4 }
 0x695   : > { %v4042_v29 = vmax.f32 %v3639_v56, %v4023_v6 }
 0x697   : > { %4058 = vst [vmem:[%s8293_s15 + $0x70] sm:$0xff] %v4042_v29 }
 0x69a   : > { %v4025_v2 = vpop.f32.mrf.mxu2 }
 0x69b   : > { %v4026_v4 = vadd.f32 %v4025_v2, %v8727_v19 }
 0x69d   : > { %v4043_v54 = vmax.f32 %v3640_v48, %v4026_v4 }
 0x69f   : > { %4059 = vst [vmem:[%s8293_s15 + $0x78] sm:$0xff] %v4043_v54 }
 0x6a0   : > { %5126 = shalt.err (!%p5123_p3)
}
 0x6a1   : > { %s5173_s11 = smov 128   ;;  %s5174_s12 = smov 8  }
 0x6a2   : > { %4922 = dma.vmem_to_hbm [thread:$0]  (%p5243_p5), %s4074_s25, 2048, %s4076_s23, %s4061_s22, %s5173_s11, %s5173_s11, %s5174_s12  }
 0x6a3 PF: > { %p4928_p4 = scmp.ge.s32.totalorder %s5161_s21, 2  ;;  %s4090_s14 = sand.u32 1, %s5149_s18  }
 0x6a4   : > { %s4091_s15 = scalar_lea.sflag [#allocation3], %s4090_s14 }
 0x6a5   : > { %p4925_p7 = pnand %p4928_p4, %p5247_p6 }
 0x6a7   : > { %p4926_p8 = pneg %p4925_p7 }
 0x6a9   : > { %5144 = dma.done.wait (%p4926_p8), %s4091_s15, 2048  }
 0x6aa   : > { %5146 = vsyncadd (%p4926_p8), %s4091_s15, 4294965248  ;;  %p15_p9 = scmp.ge.s32.totalorder %s5230_s24, 4   ;;  %s8747_s18 = smov %s5153_s19 }
 0x6ab   : > { %s8748_s19 = smov %s5157_s20  ;;  %s8749_s20 = smov %s5241_s27 }
 0x6ac   : > { %s8750_s21 = smov %s5230_s24  ;;  %17 = sbr.rel (!%p15_p9) target bundleno = 3 (0x3), region = 76 }
 0x6b1   :  { %4097 = vsyncpa [#allocation3], 1 }
 0x6b2   :  { %4099 = vsyncpa [#allocation3 + $0x1], 1 }

</bundles_post_ra>
